<compile_context>
chip_gen: v7x
topology: tpu7x:2x2x1
jax: 0.10.0
libtpu: 0.0.40
codegen_flags: <defaults>
</compile_context>

<pallas_src>
import functools

import jax
import jax.numpy as jnp
from jax.experimental import pallas as pl
from jax.experimental.pallas import tpu as pltpu


def _conv3x3_relu_kernel(x_ref, w_ref, b_ref, o_ref, col_ref, *,
                         m_pad, ew, kh, kw, c_in):
    """One output-channel block of the even-grid 3x3 conv + bias + ReLU.

    x_ref:   (c_in, cols_pad)        bf16  channel-major flattened padded e-grid
    w_ref:   (c_out_blk, kh*kw*c_in) bf16  packed weights, K ordered (i, j, ci)
    b_ref:   (c_out_blk, 1)          f32   bias column
    o_ref:   (c_out_blk, m_pad)      f32   column r = oy*ew + ox (valid ox < ow)
    col_ref: (kh*kw*c_in, m_pad)     bf16  VMEM scratch: transposed im2col
    """
    # Build the transposed im2col: 9 static slab copies (lane-offset slices are
    # XLU rotates; the XLU is otherwise idle here).
    for t in range(kh * kw):
        i, j = divmod(t, kw)
        off = i * ew + j                          # static flat-row offset of tap
        col_ref[pl.ds(t * c_in, c_in), :] = x_ref[:, pl.ds(off, m_pad)]

    # Single K = kh*kw*c_in matmul; accumulation stays inside the MXU f32 path
    # (no 120-vreg accumulator spilling through VMEM per tap).
    out = jnp.dot(w_ref[...], col_ref[...], preferred_element_type=jnp.float32)
    out = out + b_ref[...]
    o_ref[...] = jnp.maximum(out, 0.0).astype(o_ref.dtype)


def prepare_conv_params(weight, bias):
    """One-time weight/bias repack -- hoist out of the per-call hot path.

    weight: (C_out, C_in, kh, kw) f32  ->  (C_out, kh*kw*C_in) bf16
    bias:   (C_out,)              f32  ->  (C_out, 1) f32
    """
    c_out, c_in, kh, kw = weight.shape
    w_packed = jnp.transpose(weight, (0, 2, 3, 1)).reshape(c_out, kh * kw * c_in)
    return w_packed.astype(jnp.bfloat16), bias.reshape(c_out, 1).astype(jnp.float32)


def _default_grid_blocks():
    """2 output-channel blocks on v7x (2 TensorCores/chip), 1 elsewhere."""
    try:
        kind = jax.devices()[0].device_kind.lower()
        return 2 if "v7" in kind else 1
    except Exception:  # pragma: no cover - be robust to odd device strings
        return 1


@functools.partial(jax.jit, static_argnames=("n_blocks",))
def conv2d_relu(x_nchw, w_packed, b_col, *, n_blocks=1):
    """Conv2d(C_in, C_out, 3, stride=2, padding=2, dilation=2) + ReLU, NCHW."""
    n, c_in, h, w = x_nchw.shape
    c_out, k_dim = w_packed.shape
    kh = kw = 3
    stride = padding = dilation = 2
    assert n == 1 and k_dim == kh * kw * c_in
    assert c_out % n_blocks == 0

    oh = (h + 2 * padding - dilation * (kh - 1) - 1) // stride + 1   # 10
    ow = (w + 2 * padding - dilation * (kw - 1) - 1) // stride + 1   # 10

    # stride == dilation == 2 with even padding => only even padded coordinates
    # are ever read.  Subsample the even grid (channel-major, no transpose) and
    # pad by padding//2 on each side of the e-grid.
    pad_e = padding // 2
    eh = h // stride + 2 * pad_e                                     # 12
    ew = w // stride + 2 * pad_e                                     # 12
    x_e = jnp.pad(x_nchw[0, :, ::stride, ::stride],
                  ((0, 0), (pad_e, pad_e), (pad_e, pad_e)))          # (c_in, 12, 12)

    m = oh * ew                               # 120 output columns (row pitch ew)
    m_pad = ((m + 127) // 128) * 128          # 128: lane-dense matmul N / output
    # Max flat index touched by any tap is (kh-1)*ew + (kw-1) + m_pad - 1 = 153;
    # pad the flattened e-grid past it (zeros) and up to a lane multiple.
    cols_pad = ((((kh - 1) * ew + (kw - 1) + m_pad) + 127) // 128) * 128   # 256
    x_cols = jnp.pad(x_e.reshape(c_in, eh * ew),
                     ((0, 0), (0, cols_pad - eh * ew))).astype(jnp.bfloat16)

    c_blk = c_out // n_blocks
    kernel = functools.partial(_conv3x3_relu_kernel,
                               m_pad=m_pad, ew=ew, kh=kh, kw=kw, c_in=c_in)

    out = pl.pallas_call(
        kernel,
        out_shape=jax.ShapeDtypeStruct((c_out, m_pad), jnp.float32),
        grid_spec=pltpu.PrefetchScalarGridSpec(
            num_scalar_prefetch=0,
            grid=(n_blocks,),
            in_specs=[
                pl.BlockSpec((c_in, cols_pad), lambda i: (0, 0)),   # activations (~64 KB)
                pl.BlockSpec((c_blk, k_dim), lambda i: (i, 0)),     # packed weights
                pl.BlockSpec((c_blk, 1), lambda i: (i, 0)),         # bias
            ],
            out_specs=pl.BlockSpec((c_blk, m_pad), lambda i: (i, 0)),
            scratch_shapes=[pltpu.VMEM((k_dim, m_pad), jnp.bfloat16)],
        ),
        compiler_params=pltpu.CompilerParams(
            dimension_semantics=("parallel",)),
    )(x_cols, w_packed, b_col)

    # (c_out, m_pad) -> drop pad cols -> (c_out, oh, ew) -> keep valid ox -> NCHW.
    # No transpose: just slice + reshape + slice.
    out = out[:, :m].reshape(c_out, oh, ew)[:, :, :ow]
    return out[None].astype(x_nchw.dtype)


if __name__ == "__main__":
    key = jax.random.PRNGKey(0)
    kx, kw_, kb = jax.random.split(key, 3)

    # Shapes from the module: x1 = (1, 128, 20, 20), Conv2d(128, 1024, 3, s=2, p=2, d=2)
    x1 = jax.random.normal(kx, (1, 128, 20, 20), dtype=jnp.float32)

    c_in, c_out, ksz = 128, 1024, 3
    fan_in = c_in * ksz * ksz
    bound = 1.0 / (fan_in ** 0.5)
    weight = jax.random.uniform(kw_, (c_out, c_in, ksz, ksz),
                                minval=-bound, maxval=bound, dtype=jnp.float32)
    bias = jax.random.uniform(kb, (c_out,), minval=-bound, maxval=bound,
                              dtype=jnp.float32)

    # One-time preprocessing, cached across calls (hoisted out of the hot path).
    w_packed, b_col = jax.block_until_ready(prepare_conv_params(weight, bias))

    n_blocks = _default_grid_blocks()
    out = conv2d_relu(x1, w_packed, b_col, n_blocks=n_blocks)
    out = jax.block_until_ready(out)
    assert out.shape == (1, 1024, 10, 10), out.shape
    assert bool(jnp.all(out >= 0.0))

    # Reference check (f32 conv; bf16 kernel inputs => loose tolerance).
    ref = jax.lax.conv_general_dilated(
        x1, weight, window_strides=(2, 2), padding=((2, 2), (2, 2)),
        rhs_dilation=(2, 2), dimension_numbers=("NCHW", "OIHW", "NCHW"),
        precision=jax.lax.Precision.HIGHEST)
    ref = jnp.maximum(ref + bias[None, :, None, None], 0.0)
    assert bool(jnp.allclose(out, ref, atol=5e-2, rtol=5e-2)), \
        float(jnp.max(jnp.abs(out - ref)))

    print("KERNEL_OK")
</pallas_src>

<mosaic_0001>
module attributes {stable_mosaic.version = 11 : i64} {
  func.func @_conv3x3_relu_kernel(%arg0: i32, %arg1: memref<128x256xbf16, #tpu.memory_space<vmem>>, %arg2: memref<1024x1152xbf16, #tpu.memory_space<vmem>>, %arg3: memref<1024x1xf32, #tpu.memory_space<vmem>>, %arg4: memref<1024x128xf32, #tpu.memory_space<vmem>>, %arg5: memref<1152x128xbf16, #tpu.memory_space<vmem>>) attributes {dimension_semantics = [#tpu.dimension_semantics<parallel>], iteration_bounds = array<i64: 1>, scalar_prefetch = 0 : i64, scratch_operands = 1 : i64, tpu.core_type = #tpu.core_type<tc>, window_params = [{pipeline_mode = #tpu.pipeline_mode<synchronous>, transform_indices = @transform_0, window_bounds = array<i64: 128, 256>}, {transform_indices = @transform_1, window_bounds = array<i64: 1024, 1152>}, {transform_indices = @transform_2, window_bounds = array<i64: 1024, 1>}, {transform_indices = @transform_3, window_bounds = array<i64: 1024, 128>}]} {
    %c0 = arith.constant 0 : index
    %c0_0 = arith.constant 0 : index
    %0 = vector.load %arg1[%c0, %c0_0] : memref<128x256xbf16, #tpu.memory_space<vmem>>, vector<128x128xbf16>
    %c0_1 = arith.constant 0 : index
    %c0_2 = arith.constant 0 : index
    %1 = vector.load %arg5[%c0_1, %c0_2] : memref<1152x128xbf16, #tpu.memory_space<vmem>>, vector<128x128xbf16>
    tpu.vector_store %arg5[%c0_1, %c0_2], %0 {strides = array<i32>} : memref<1152x128xbf16, #tpu.memory_space<vmem>>, vector<128x128xbf16>,
    %c0_3 = arith.constant 0 : index
    %c1 = arith.constant 1 : index
    %2 = vector.load %arg1[%c0_3, %c1] : memref<128x256xbf16, #tpu.memory_space<vmem>>, vector<128x128xbf16>
    %c128 = arith.constant 128 : index
    %c0_4 = arith.constant 0 : index
    %3 = vector.load %arg5[%c128, %c0_4] : memref<1152x128xbf16, #tpu.memory_space<vmem>>, vector<128x128xbf16>
    tpu.vector_store %arg5[%c128, %c0_4], %2 {strides = array<i32>} : memref<1152x128xbf16, #tpu.memory_space<vmem>>, vector<128x128xbf16>,
    %c0_5 = arith.constant 0 : index
    %c2 = arith.constant 2 : index
    %4 = vector.load %arg1[%c0_5, %c2] : memref<128x256xbf16, #tpu.memory_space<vmem>>, vector<128x128xbf16>
    %c256 = arith.constant 256 : index
    %c0_6 = arith.constant 0 : index
    %5 = vector.load %arg5[%c256, %c0_6] : memref<1152x128xbf16, #tpu.memory_space<vmem>>, vector<128x128xbf16>
    tpu.vector_store %arg5[%c256, %c0_6], %4 {strides = array<i32>} : memref<1152x128xbf16, #tpu.memory_space<vmem>>, vector<128x128xbf16>,
    %c0_7 = arith.constant 0 : index
    %c12 = arith.constant 12 : index
    %6 = vector.load %arg1[%c0_7, %c12] : memref<128x256xbf16, #tpu.memory_space<vmem>>, vector<128x128xbf16>
    %c384 = arith.constant 384 : index
    %c0_8 = arith.constant 0 : index
    %7 = vector.load %arg5[%c384, %c0_8] : memref<1152x128xbf16, #tpu.memory_space<vmem>>, vector<128x128xbf16>
    tpu.vector_store %arg5[%c384, %c0_8], %6 {strides = array<i32>} : memref<1152x128xbf16, #tpu.memory_space<vmem>>, vector<128x128xbf16>,
    %c0_9 = arith.constant 0 : index
    %c13 = arith.constant 13 : index
    %8 = vector.load %arg1[%c0_9, %c13] : memref<128x256xbf16, #tpu.memory_space<vmem>>, vector<128x128xbf16>
    %c512 = arith.constant 512 : index
    %c0_10 = arith.constant 0 : index
    %9 = vector.load %arg5[%c512, %c0_10] : memref<1152x128xbf16, #tpu.memory_space<vmem>>, vector<128x128xbf16>
    tpu.vector_store %arg5[%c512, %c0_10], %8 {strides = array<i32>} : memref<1152x128xbf16, #tpu.memory_space<vmem>>, vector<128x128xbf16>,
    %c0_11 = arith.constant 0 : index
    %c14 = arith.constant 14 : index
    %10 = vector.load %arg1[%c0_11, %c14] : memref<128x256xbf16, #tpu.memory_space<vmem>>, vector<128x128xbf16>
    %c640 = arith.constant 640 : index
    %c0_12 = arith.constant 0 : index
    %11 = vector.load %arg5[%c640, %c0_12] : memref<1152x128xbf16, #tpu.memory_space<vmem>>, vector<128x128xbf16>
    tpu.vector_store %arg5[%c640, %c0_12], %10 {strides = array<i32>} : memref<1152x128xbf16, #tpu.memory_space<vmem>>, vector<128x128xbf16>,
    %c0_13 = arith.constant 0 : index
    %c24 = arith.constant 24 : index
    %12 = vector.load %arg1[%c0_13, %c24] : memref<128x256xbf16, #tpu.memory_space<vmem>>, vector<128x128xbf16>
    %c768 = arith.constant 768 : index
    %c0_14 = arith.constant 0 : index
    %13 = vector.load %arg5[%c768, %c0_14] : memref<1152x128xbf16, #tpu.memory_space<vmem>>, vector<128x128xbf16>
    tpu.vector_store %arg5[%c768, %c0_14], %12 {strides = array<i32>} : memref<1152x128xbf16, #tpu.memory_space<vmem>>, vector<128x128xbf16>,
    %c0_15 = arith.constant 0 : index
    %c25 = arith.constant 25 : index
    %14 = vector.load %arg1[%c0_15, %c25] : memref<128x256xbf16, #tpu.memory_space<vmem>>, vector<128x128xbf16>
    %c896 = arith.constant 896 : index
    %c0_16 = arith.constant 0 : index
    %15 = vector.load %arg5[%c896, %c0_16] : memref<1152x128xbf16, #tpu.memory_space<vmem>>, vector<128x128xbf16>
    tpu.vector_store %arg5[%c896, %c0_16], %14 {strides = array<i32>} : memref<1152x128xbf16, #tpu.memory_space<vmem>>, vector<128x128xbf16>,
    %c0_17 = arith.constant 0 : index
    %c26 = arith.constant 26 : index
    %16 = vector.load %arg1[%c0_17, %c26] : memref<128x256xbf16, #tpu.memory_space<vmem>>, vector<128x128xbf16>
    %c1024 = arith.constant 1024 : index
    %c0_18 = arith.constant 0 : index
    %17 = vector.load %arg5[%c1024, %c0_18] : memref<1152x128xbf16, #tpu.memory_space<vmem>>, vector<128x128xbf16>
    tpu.vector_store %arg5[%c1024, %c0_18], %16 {strides = array<i32>} : memref<1152x128xbf16, #tpu.memory_space<vmem>>, vector<128x128xbf16>,
    %c0_19 = arith.constant 0 : index
    %c0_20 = arith.constant 0 : index
    %18 = vector.load %arg2[%c0_19, %c0_20] : memref<1024x1152xbf16, #tpu.memory_space<vmem>>, vector<1024x1152xbf16>
    %c0_21 = arith.constant 0 : index
    %c0_22 = arith.constant 0 : index
    %19 = vector.load %arg5[%c0_21, %c0_22] : memref<1152x128xbf16, #tpu.memory_space<vmem>>, vector<1152x128xbf16>
    %cst = arith.constant dense<0.000000e+00> : vector<1024x128xf32>
    %20 = tpu.matmul %18, %19, %cst {dimension_numbers = #tpu.dot_dimension_numbers<[1], [0], [0], [1], [0, 0, 1, 1], [], []>} : vector<1024x1152xbf16>, vector<1152x128xbf16>, vector<1024x128xf32> -> vector<1024x128xf32>
    %c0_23 = arith.constant 0 : index
    %c0_24 = arith.constant 0 : index
    %21 = vector.load %arg3[%c0_23, %c0_24] : memref<1024x1xf32, #tpu.memory_space<vmem>>, vector<1024x1xf32>
    %22 = vector.broadcast %21 : vector<1024x1xf32> to vector<1024x128xf32>
    %23 = arith.addf %20, %22 : vector<1024x128xf32>
    %cst_25 = arith.constant 0.000000e+00 : f32
    %24 = vector.broadcast %cst_25 : f32 to vector<1024x128xf32>
    %25 = arith.maximumf %23, %24 : vector<1024x128xf32>
    %c0_26 = arith.constant 0 : index
    %c0_27 = arith.constant 0 : index
    %26 = vector.load %arg4[%c0_26, %c0_27] : memref<1024x128xf32, #tpu.memory_space<vmem>>, vector<1024x128xf32>
    tpu.vector_store %arg4[%c0_26, %c0_27], %25 {strides = array<i32>} : memref<1024x128xf32, #tpu.memory_space<vmem>>, vector<1024x128xf32>,
    return
  }
  func.func @transform_0(%arg0: i32) -> (i32, i32) {
    %c0_i32 = arith.constant 0 : i32
    %c0_i32_0 = arith.constant 0 : i32
    %c0_i32_1 = arith.constant 0 : i32
    return %c0_i32, %c0_i32_0 : i32, i32
  }
  func.func @transform_1(%arg0: i32) -> (i32, i32) {
    %c0_i32 = arith.constant 0 : i32
    %c0_i32_0 = arith.constant 0 : i32
    return %arg0, %c0_i32 : i32, i32
  }
  func.func @transform_2(%arg0: i32) -> (i32, i32) {
    %c0_i32 = arith.constant 0 : i32
    %c0_i32_0 = arith.constant 0 : i32
    return %arg0, %c0_i32 : i32, i32
  }
  func.func @transform_3(%arg0: i32) -> (i32, i32) {
    %c0_i32 = arith.constant 0 : i32
    %c0_i32_0 = arith.constant 0 : i32
    return %arg0, %c0_i32 : i32, i32
  }
}

</mosaic_0001>

<bundles_post_ra>
// kernel: conv2d_relu.1
= control target key start
LH: loop header
LB: loop body
LE: loop exit
PB: predicated region body
PF: predicated region fallthrough
CT: control target
= control target key end

     0   :  { %8 = vsyncpa [#allocation4], 0  ;;  %s11277_s12 = smov [#allocation3]   ;;  %s13599_s0 = inlined_call_operand.vmem [shape: bf16[128,256], index: 0, kind: input, shape index: {}]   ;;  %s13600_s1 = inlined_call_operand.hbm [shape: bf16[1024,1152], index: 1, kind: input, shape index: {}]   ;;  %s13601_s2 = inlined_call_operand.vmem [shape: f32[1024,1], index: 2, kind: input, shape index: {}]   ;;  %s13602_s3 = inlined_call_operand.vmem [shape: f32[1024,128], index: 3, kind: output, shape index: {}]  }
   0x1   :  { %s16_s13 = sshll.u32 %s11277_s12, 4  ;;  %s11253_s16 = scalar_lea.hbm %s13600_s1, 73728  ;;  %s17_s13 = int_to_ptr.vmem [resolvable:$true] %s16_s13 }
   0x2   :  { %p11254_p0 = scmp.ne.s32.totalorder %s13600_s1, %s11253_s16  ;;  %p11257_p1 = scmp.lt.u32.totalorder %s11253_s16, %s13600_s1 }
   0x4   :  { %p11259_p2 = pnand %p11257_p1, %p11254_p0 }
   0x6   :  { %11262 = shalt.err (!%p11259_p2)
}
   0x7   :  { %s11263_s21 = scalar_lea.vmem %s17_s13, 73728  ;;  %p11268_p4 = scmp.lt.s32.totalorder %s17_s13, %s17_s13 }
   0x8   :  { %p11264_p3 = scmp.ne.s32.totalorder %s17_s13, %s11263_s21  ;;  %p11269_p5 = scmp.lt.s32.totalorder %s11263_s21, %s11263_s21 }
   0xa   :  { %p11270_p6 = por %p11269_p5, %p11268_p4 }
   0xc   :  { %p11271_p7 = pnand %p11270_p6, %p11264_p3 }
   0xe   :  { %11274 = shalt.err (!%p11271_p7)
}
   0xf   :  { %s11278_s22 = smov 576   ;;  %s11279_s23 = smov 36  }
  0x10   :  { %22 = dma.hbm_to_vmem [thread:$0]  %s13600_s1, 73728, %s17_s13, [#allocation4], %s11278_s22, %s11278_s22, %s11279_s23  }
  0x11   :  { %11275 = dma.done.wait [#allocation4], 73728  }
  0x12   :  { %11276 = vsyncadd [#allocation4], 4294893568  ;;  %v11280_v0 = vmov 0   ;;  %v11328_v1 = vld [vmem:[%s13599_s0 + $0x10] ss:$8 sps:$4 sm:$0xff]   ;;  %s11281_s1 = smov 126  }
  0x13   :  { %5621 = vmatprep.subr.bf16.mxu1 %v11280_v0  ;;  %6166 = vmatprep.subr.bf16.mxu0 %v11280_v0  ;;  %v11333_v2 = vld [vmem:[%s13599_s0 + $0x14] ss:$8 sps:$4 sm:$0xff]   ;;  %v11340_v3 = vld [vmem:[%s13599_s0] ss:$8 sps:$4 sm:$0xff]   ;;  %v11345_v4 = vld [vmem:[%s13599_s0 + $0x4] ss:$8 sps:$4 sm:$0xff]  }
  0x14   :  { %10348 = vset.pattern.permute.xlu1 %v11280_v0  ;;  %10347 = vset.pattern.permute.xlu0 %v11280_v0  ;;  %v11354_v5 = vld [vmem:[%s13599_s0 + $0x24] ss:$8 sps:$4 sm:$0xff]   ;;  %v11361_v6 = vld [vmem:[%s13599_s0 + $0x20] ss:$8 sps:$4 sm:$0xff]   ;;  %v11368_v7 = vld [vmem:[%s13599_s0 + $0x34] ss:$8 sps:$4 sm:$0xff]  }
  0x15   :  { %322 = vrot.lane.b32.xlu1 %v11328_v1, %s11281_s1  ;;  %318 = vrot.lane.b32.xlu0 %v11340_v3, %s11281_s1  ;;  %v10373_v8 = vld [vmem:[%s13599_s0] ss:$8 sps:$4 sm:$0xff]   ;;  %v11378_v9 = vld [vmem:[%s13599_s0 + $0x30] ss:$8 sps:$4 sm:$0xff]   ;;  %s11282_s18 = smov 116   ;;  %s11283_s21 = smov 127  }
  0x16   :  { %5622 = vmatpush1.bf16.msra.mxu1 %v10373_v8  ;;  %v10374_v10 = vld [vmem:[%s13599_s0 + $0x10] ss:$8 sps:$4 sm:$0xff]   ;;  %v11388_v11 = vld [vmem:[%s13599_s0 + $0x44] ss:$8 sps:$4 sm:$0xff]   ;;  %v11394_v12 = vld [vmem:[%s13599_s0 + $0x40] ss:$8 sps:$4 sm:$0xff]  }
  0x17   :  { %5623 = vmatprep.subr.bf16.mxu1 %v11280_v0  ;;  %v11401_v13 = vld [vmem:[%s13599_s0 + $0x54] ss:$8 sps:$4 sm:$0xff]   ;;  %v10375_v14 = vld [vmem:[%s13599_s0 + $0x20] ss:$8 sps:$4 sm:$0xff]   ;;  %v11411_v15 = vld [vmem:[%s13599_s0 + $0x50] ss:$8 sps:$4 sm:$0xff]  }
  0x18   :  { %v10376_v16 = vld [vmem:[%s13599_s0 + $0x30] ss:$8 sps:$4 sm:$0xff]   ;;  %v11422_v17 = vld [vmem:[%s13599_s0 + $0x64] ss:$8 sps:$4 sm:$0xff]   ;;  %v11429_v18 = vld [vmem:[%s13599_s0 + $0x60] ss:$8 sps:$4 sm:$0xff]  }
  0x19   :  { %324 = vrot.lane.b32.xlu1 %v11333_v2, %s11281_s1  ;;  %320 = vrot.lane.b32.xlu0 %v11345_v4, %s11281_s1  ;;  %v10377_v19 = vld [vmem:[%s13599_s0 + $0x40] ss:$8 sps:$4 sm:$0xff]   ;;  %v11440_v20 = vld [vmem:[%s13599_s0 + $0x74] ss:$8 sps:$4 sm:$0xff]   ;;  %v10383_v25 = vld [vmem:[#allocation3 + $0xc] ss:$36 sps:$4 sm:$0xff]  }
  0x1a   :  { %5624 = vmatpush1.bf16.msra.mxu1 %v10374_v10  ;;  %v11447_v21 = vld [vmem:[%s13599_s0 + $0x70] ss:$8 sps:$4 sm:$0xff]   ;;  %v10379_v23 = vld [vmem:[%s13599_s0 + $0x60] ss:$8 sps:$4 sm:$0xff]   ;;  %6198 = vmatprep.mubr.bf16.mxu0 %v10383_v25  ;;  %vm350_vm0 = vcmask 1031168   ;;  %s11285_s22 = smov 114  }
  0x1b   :  { %5625 = vmatprep.subr.bf16.mxu1 %v11280_v0  ;;  %v10378_v22 = vld [vmem:[%s13599_s0 + $0x50] ss:$8 sps:$4 sm:$0xff]   ;;  %v10386_v26 = vld [vmem:[#allocation3 + $0x4] ss:$36 sps:$4 sm:$0xff]   ;;  %vm487_vm1 = vcmask 949248   ;;  %vm213_vm2 = vcmask 1039360  }
  0x1c   :  { %v10380_v24 = vld [vmem:[%s13599_s0 + $0x70] ss:$8 sps:$4 sm:$0xff]   ;;  %5653 = vmatprep.mubr.bf16.mxu1 %v10386_v26  ;;  %v11237_v62 = vld [vmem:[%s13599_s0 + $0x4] ss:$8 sps:$4 sm:$0xff]   ;;  %s11286_s25 = smov 104   ;;  %s11287_s6 = smov 103  }
  0x1d   :  { %328 = vrot.lane.b32.xlu1 %v11354_v5, %s11281_s1  ;;  %326 = vrot.lane.b32.xlu0 %v11361_v6, %s11281_s1  ;;  %v11240_v8 = vld [vmem:[%s13599_s0 + $0x10] ss:$8 sps:$4 sm:$0xff]   ;;  %vm624_vm3 = vcmask 941056   ;;  %vm761_vm4 = vcmask 932864   ;;  %vm898_vm5 = vcmask 850944   ;;  %vm1035_vm6 = vcmask 842752  }
  0x1e   :  { %5626 = vmatpush1.bf16.msra.mxu1 %v10375_v14  ;;  %v11243_v14 = vld [vmem:[%s13599_s0 + $0x34] ss:$8 sps:$4 sm:$0xff]   ;;  %vm1172_vm7 = vcmask 834560  }
  0x1f   :  { %5627 = vmatprep.subr.bf16.mxu1 %v11280_v0 }
  0x21   :  { %332 = vrot.lane.b32.xlu1 %v11368_v7, %s11281_s1  ;;  %330 = vrot.lane.b32.xlu0 %v11378_v9, %s11281_s1 }
  0x22   :  { %5628 = vmatpush1.bf16.msra.mxu1 %v10376_v16 }
  0x23   :  { %5629 = vmatprep.subr.bf16.mxu1 %v11280_v0 }
  0x25   :  { %336 = vrot.lane.b32.xlu1 %v11388_v11, %s11281_s1  ;;  %334 = vrot.lane.b32.xlu0 %v11394_v12, %s11281_s1 }
  0x26   :  { %5630 = vmatpush1.bf16.msra.mxu1 %v10377_v19  ;;  %v11245_v19 = vld [vmem:[%s13599_s0 + $0x44] ss:$8 sps:$4 sm:$0xff]  }
  0x27   :  { %5631 = vmatprep.subr.bf16.mxu1 %v11280_v0 }
  0x29   :  { %340 = vrot.lane.b32.xlu1 %v11401_v13, %s11281_s1  ;;  %338 = vrot.lane.b32.xlu0 %v11411_v15, %s11281_s1 }
  0x2a   :  { %5632 = vmatpush1.bf16.msra.mxu1 %v10378_v22 }
  0x2b   :  { %5633 = vmatprep.subr.bf16.mxu1 %v11280_v0 }
  0x2d   :  { %344 = vrot.lane.b32.xlu1 %v11422_v17, %s11281_s1  ;;  %342 = vrot.lane.b32.xlu0 %v11429_v18, %s11281_s1 }
  0x2e   :  { %5634 = vmatpush1.bf16.msra.mxu1 %v10379_v23  ;;  %v11246_v23 = vld [vmem:[%s13599_s0 + $0x40] ss:$8 sps:$4 sm:$0xff]  }
  0x2f   :  { %5635 = vmatprep.subr.bf16.mxu1 %v11280_v0 }
  0x31   :  { %348 = vrot.lane.b32.xlu1 %v11440_v20, %s11281_s1  ;;  %346 = vrot.lane.b32.xlu0 %v11447_v21, %s11281_s1  ;;  %s11284_s1 = smov 115  }
  0x32   :  { %5636 = vmatpush1.bf16.msra.mxu1 %v10380_v24  ;;  %v11247_v24 = vld [vmem:[%s13599_s0 + $0x54] ss:$8 sps:$4 sm:$0xff]  }
  0x33   :  { %5637 = vmatprep.subr.bf16.mxu1 %v11280_v0 }
  0x35   :  { %457 = vrot.lane.b32.xlu1 %v11345_v4, %s11282_s18  ;;  %455 = vrot.lane.b32.xlu0 %v11340_v3, %s11282_s18 }
  0x39   :  { %183 = vrot.lane.b32.xlu1 %v11345_v4, %s11283_s21  ;;  %181 = vrot.lane.b32.xlu0 %v11340_v3, %s11283_s21 }
  0x3d   :  { %461 = vrot.lane.b32.xlu1 %v11333_v2, %s11282_s18  ;;  %459 = vrot.lane.b32.xlu0 %v11328_v1, %s11282_s18 }
  0x41   :  { %187 = vrot.lane.b32.xlu1 %v11333_v2, %s11283_s21  ;;  %185 = vrot.lane.b32.xlu0 %v11328_v1, %s11283_s21 }
  0x45   :  { %465 = vrot.lane.b32.xlu1 %v11354_v5, %s11282_s18  ;;  %463 = vrot.lane.b32.xlu0 %v11361_v6, %s11282_s18 }
  0x49   :  { %191 = vrot.lane.b32.xlu1 %v11354_v5, %s11283_s21  ;;  %189 = vrot.lane.b32.xlu0 %v11361_v6, %s11283_s21 }
  0x4d   :  { %469 = vrot.lane.b32.xlu1 %v11368_v7, %s11282_s18  ;;  %467 = vrot.lane.b32.xlu0 %v11378_v9, %s11282_s18 }
  0x51   :  { %195 = vrot.lane.b32.xlu1 %v11368_v7, %s11283_s21  ;;  %193 = vrot.lane.b32.xlu0 %v11378_v9, %s11283_s21 }
  0x55   :  { %473 = vrot.lane.b32.xlu1 %v11388_v11, %s11282_s18  ;;  %471 = vrot.lane.b32.xlu0 %v11394_v12, %s11282_s18 }
  0x59   :  { %199 = vrot.lane.b32.xlu1 %v11388_v11, %s11283_s21  ;;  %197 = vrot.lane.b32.xlu0 %v11394_v12, %s11283_s21 }
  0x5d   :  { %477 = vrot.lane.b32.xlu1 %v11401_v13, %s11282_s18  ;;  %475 = vrot.lane.b32.xlu0 %v11411_v15, %s11282_s18 }
  0x61   :  { %203 = vrot.lane.b32.xlu1 %v11401_v13, %s11283_s21  ;;  %201 = vrot.lane.b32.xlu0 %v11411_v15, %s11283_s21 }
  0x65   :  { %481 = vrot.lane.b32.xlu1 %v11422_v17, %s11282_s18  ;;  %479 = vrot.lane.b32.xlu0 %v11429_v18, %s11282_s18 }
  0x69   :  { %207 = vrot.lane.b32.xlu1 %v11422_v17, %s11283_s21  ;;  %205 = vrot.lane.b32.xlu0 %v11429_v18, %s11283_s21 }
  0x6d   :  { %485 = vrot.lane.b32.xlu1 %v11440_v20, %s11282_s18  ;;  %483 = vrot.lane.b32.xlu0 %v11447_v21, %s11282_s18 }
  0x71   :  { %211 = vrot.lane.b32.xlu1 %v11440_v20, %s11283_s21  ;;  %209 = vrot.lane.b32.xlu0 %v11447_v21, %s11283_s21 }
  0x75   :  { %594 = vrot.lane.b32.xlu1 %v11345_v4, %s11284_s1  ;;  %592 = vrot.lane.b32.xlu0 %v11340_v3, %s11284_s1 }
  0x79   :  { %598 = vrot.lane.b32.xlu1 %v11333_v2, %s11284_s1  ;;  %596 = vrot.lane.b32.xlu0 %v11328_v1, %s11284_s1 }
  0x7d   :  { %602 = vrot.lane.b32.xlu1 %v11354_v5, %s11284_s1  ;;  %600 = vrot.lane.b32.xlu0 %v11361_v6, %s11284_s1 }
  0x81   :  { %606 = vrot.lane.b32.xlu1 %v11368_v7, %s11284_s1  ;;  %604 = vrot.lane.b32.xlu0 %v11378_v9, %s11284_s1 }
  0x85   :  { %610 = vrot.lane.b32.xlu1 %v11388_v11, %s11284_s1  ;;  %608 = vrot.lane.b32.xlu0 %v11394_v12, %s11284_s1 }
  0x87   :  { %v323_v27 = vpop.permute.xlu1 %322  ;;  %v319_v28 = vpop.permute.xlu0 %318 }
  0x89   :  { %614 = vrot.lane.b32.xlu1 %v11401_v13, %s11284_s1  ;;  %612 = vrot.lane.b32.xlu0 %v11411_v15, %s11284_s1 }
  0x8b   :  { %v325_v29 = vpop.permute.xlu1 %324  ;;  %v321_v30 = vpop.permute.xlu0 %320 }
  0x8c   :  { %v11547_v31 = vsel %vm350_vm0, %v319_v28, %v321_v30  ;;  %v11554_v34 = vsel %vm350_vm0, %v323_v27, %v325_v29  ;;  %v11248_v28 = vld [vmem:[%s13599_s0 + $0x50] ss:$8 sps:$4 sm:$0xff]   ;;  %v11249_v29 = vld [vmem:[%s13599_s0 + $0x64] ss:$8 sps:$4 sm:$0xff]  }
  0x8d   :  { %618 = vrot.lane.b32.xlu1 %v11422_v17, %s11284_s1  ;;  %6167 = vmatpush1.bf16.msra.mxu0 %v11547_v31 }
  0x8e   :  { %616 = vrot.lane.b32.xlu0 %v11429_v18, %s11284_s1  ;;  %6168 = vmatprep.subr.bf16.mxu0 %v11280_v0 }
  0x8f   :  { %v329_v32 = vpop.permute.xlu1 %328  ;;  %v327_v33 = vpop.permute.xlu0 %326 }
  0x90   :  { %v11562_v37 = vsel %vm350_vm0, %v327_v33, %v329_v32  ;;  %v11710_v33 = vld [vmem:[%s13599_s0 + $0x4] ss:$8 sps:$4 sm:$0xff]  }
  0x91   :  { %622 = vrot.lane.b32.xlu1 %v11440_v20, %s11284_s1  ;;  %6169 = vmatpush1.bf16.msra.mxu0 %v11554_v34 }
  0x92   :  { %620 = vrot.lane.b32.xlu0 %v11447_v21, %s11284_s1  ;;  %6170 = vmatprep.subr.bf16.mxu0 %v11280_v0 }
  0x93   :  { %v333_v35 = vpop.permute.xlu1 %332  ;;  %v331_v36 = vpop.permute.xlu0 %330 }
  0x94   :  { %v11571_v40 = vsel %vm350_vm0, %v331_v36, %v333_v35  ;;  %v11250_v36 = vld [vmem:[%s13599_s0 + $0x60] ss:$8 sps:$4 sm:$0xff]  }
  0x95   :  { %731 = vrot.lane.b32.xlu1 %v11345_v4, %s11285_s22  ;;  %6171 = vmatpush1.bf16.msra.mxu0 %v11562_v37  ;;  %v11239_v4 = vld [vmem:[%s13599_s0 + $0x14] ss:$8 sps:$4 sm:$0xff]  }
  0x96   :  { %729 = vrot.lane.b32.xlu0 %v11340_v3, %s11285_s22  ;;  %6172 = vmatprep.subr.bf16.mxu0 %v11280_v0  ;;  %v11238_v3 = vld [vmem:[%s13599_s0] ss:$8 sps:$4 sm:$0xff]  }
  0x97   :  { %v337_v38 = vpop.permute.xlu1 %336  ;;  %v335_v39 = vpop.permute.xlu0 %334 }
  0x98   :  { %v11580_v43 = vsel %vm350_vm0, %v335_v39, %v337_v38  ;;  %v11251_v38 = vld [vmem:[%s13599_s0 + $0x74] ss:$8 sps:$4 sm:$0xff]  }
  0x99   :  { %735 = vrot.lane.b32.xlu1 %v11333_v2, %s11285_s22  ;;  %6173 = vmatpush1.bf16.msra.mxu0 %v11571_v40 }
  0x9a   :  { %733 = vrot.lane.b32.xlu0 %v11328_v1, %s11285_s22  ;;  %6174 = vmatprep.subr.bf16.mxu0 %v11280_v0 }
  0x9b   :  { %v341_v41 = vpop.permute.xlu1 %340  ;;  %v339_v42 = vpop.permute.xlu0 %338 }
  0x9c   :  { %v11589_v46 = vsel %vm350_vm0, %v339_v42, %v341_v41  ;;  %v11728_v42 = vld [vmem:[%s13599_s0] ss:$8 sps:$4 sm:$0xff]  }
  0x9d   :  { %739 = vrot.lane.b32.xlu1 %v11354_v5, %s11285_s22  ;;  %6175 = vmatpush1.bf16.msra.mxu0 %v11580_v43 }
  0x9e   :  { %737 = vrot.lane.b32.xlu0 %v11361_v6, %s11285_s22  ;;  %6176 = vmatprep.subr.bf16.mxu0 %v11280_v0 }
  0x9f   :  { %v345_v44 = vpop.permute.xlu1 %344  ;;  %v343_v45 = vpop.permute.xlu0 %342 }
  0xa0   :  { %v11598_v49 = vsel %vm350_vm0, %v343_v45, %v345_v44  ;;  %v11252_v45 = vld [vmem:[%s13599_s0 + $0x70] ss:$8 sps:$4 sm:$0xff]  }
  0xa1   :  { %743 = vrot.lane.b32.xlu1 %v11368_v7, %s11285_s22  ;;  %6177 = vmatpush1.bf16.msra.mxu0 %v11589_v46 }
  0xa2   :  { %741 = vrot.lane.b32.xlu0 %v11378_v9, %s11285_s22  ;;  %6178 = vmatprep.subr.bf16.mxu0 %v11280_v0  ;;  %v11241_v9 = vld [vmem:[%s13599_s0 + $0x24] ss:$8 sps:$4 sm:$0xff]  }
  0xa3   :  { %v349_v47 = vpop.permute.xlu1 %348  ;;  %v347_v48 = vpop.permute.xlu0 %346 }
  0xa4   :  { %v11607_v52 = vsel %vm350_vm0, %v347_v48, %v349_v47  ;;  %v11740_v47 = vld [vmem:[%s13599_s0 + $0x14] ss:$8 sps:$4 sm:$0xff]  }
  0xa5   :  { %747 = vrot.lane.b32.xlu1 %v11388_v11, %s11285_s22  ;;  %6179 = vmatpush1.bf16.msra.mxu0 %v11598_v49 }
  0xa6   :  { %745 = vrot.lane.b32.xlu0 %v11394_v12, %s11285_s22  ;;  %6180 = vmatprep.subr.bf16.mxu0 %v11280_v0 }
  0xa7   :  { %v458_v50 = vpop.permute.xlu1 %457  ;;  %v456_v51 = vpop.permute.xlu0 %455 }
  0xa8   :  { %v11616_v55 = vsel %vm487_vm1, %v456_v51, %v458_v50  ;;  %v11746_v51 = vld [vmem:[%s13599_s0 + $0x10] ss:$8 sps:$4 sm:$0xff]  }
  0xa9   :  { %751 = vrot.lane.b32.xlu1 %v11401_v13, %s11285_s22  ;;  %6181 = vmatpush1.bf16.msra.mxu0 %v11607_v52  ;;  %v11242_v13 = vld [vmem:[%s13599_s0 + $0x20] ss:$8 sps:$4 sm:$0xff]  }
  0xaa   :  { %749 = vrot.lane.b32.xlu0 %v11411_v15, %s11285_s22  ;;  %6182 = vmatprep.subr.bf16.mxu0 %v11280_v0 }
  0xab   :  { %v184_v53 = vpop.permute.xlu1 %183  ;;  %v182_v54 = vpop.permute.xlu0 %181 }
  0xac   :  { %v214_v56 = vsel %vm213_vm2, %v182_v54, %v184_v53  ;;  %v11751_v53 = vld [vmem:[%s13599_s0 + $0x24] ss:$8 sps:$4 sm:$0xff]  }
  0xad   :  { %755 = vrot.lane.b32.xlu1 %v11422_v17, %s11285_s22  ;;  %6183 = vmatpush1.bf16.msra.mxu0 %v11616_v55 }
  0xae   :  { %5638 = vmatpush1.bf16.msra.mxu1 %v214_v56  ;;  %6184 = vmatprep.subr.bf16.mxu0 %v11280_v0 }
  0xaf   :  { %v462_v57 = vpop.permute.xlu1 %461  ;;  %5639 = vmatprep.subr.bf16.mxu1 %v11280_v0  ;;  %v460_v58 = vpop.permute.xlu0 %459  ;;  %753 = vrot.lane.b32.xlu0 %v11429_v18, %s11285_s22  ;;  %v11244_v18 = vld [vmem:[%s13599_s0 + $0x30] ss:$8 sps:$4 sm:$0xff]  }
  0xb0   :  { %v11627_v59 = vsel %vm487_vm1, %v460_v58, %v462_v57  ;;  %v11765_v58 = vld [vmem:[%s13599_s0 + $0x20] ss:$8 sps:$4 sm:$0xff]  }
  0xb1   :  { %759 = vrot.lane.b32.xlu1 %v11440_v20, %s11285_s22  ;;  %6185 = vmatpush1.bf16.msra.mxu0 %v11627_v59 }
  0xb2   :  { %6186 = vmatprep.subr.bf16.mxu0 %v11280_v0 }
  0xb3   :  { %v188_v60 = vpop.permute.xlu1 %187  ;;  %v186_v61 = vpop.permute.xlu0 %185  ;;  %757 = vrot.lane.b32.xlu0 %v11447_v21, %s11285_s22 }
  0xb4   :  { %v215_v63 = vsel %vm213_vm2, %v186_v61, %v188_v60  ;;  %v11775_v61 = vld [vmem:[%s13599_s0 + $0x34] ss:$8 sps:$4 sm:$0xff]  }
  0xb5   :  { %868 = vrot.lane.b32.xlu1 %v11237_v62, %s11286_s25  ;;  %5640 = vmatpush1.bf16.msra.mxu1 %v215_v63 }
  0xb6   :  { %5641 = vmatprep.subr.bf16.mxu1 %v11280_v0 }
  0xb7   :  { %v466_v1 = vpop.permute.xlu1 %465  ;;  %v464_v2 = vpop.permute.xlu0 %463  ;;  %866 = vrot.lane.b32.xlu0 %v11238_v3, %s11286_s25 }
  0xb8   :  { %v11648_v5 = vsel %vm487_vm1, %v464_v2, %v466_v1  ;;  %v11781_v1 = vld [vmem:[%s13599_s0 + $0x30] ss:$8 sps:$4 sm:$0xff]   ;;  %v11786_v2 = vld [vmem:[%s13599_s0 + $0x44] ss:$8 sps:$4 sm:$0xff]  }
  0xb9   :  { %872 = vrot.lane.b32.xlu1 %v11239_v4, %s11286_s25  ;;  %6187 = vmatpush1.bf16.msra.mxu0 %v11648_v5 }
  0xba   :  { %6188 = vmatprep.subr.bf16.mxu0 %v11280_v0 }
  0xbb   :  { %v192_v6 = vpop.permute.xlu1 %191  ;;  %v190_v7 = vpop.permute.xlu0 %189  ;;  %870 = vrot.lane.b32.xlu0 %v11240_v8, %s11286_s25 }
  0xbc   :  { %v216_v10 = vsel %vm213_vm2, %v190_v7, %v192_v6  ;;  %v10381_v6 = vld [vmem:[#allocation3 + $0x8] ss:$36 sps:$4 sm:$0xff]   ;;  %v10387_v7 = vld [vmem:[#allocation3 + $0x54] ss:$36 sps:$4 sm:$0xff]  }
  0xbd   :  { %876 = vrot.lane.b32.xlu1 %v11241_v9, %s11286_s25  ;;  %5642 = vmatpush1.bf16.msra.mxu1 %v216_v10  ;;  %v11800_v9 = vld [vmem:[%s13599_s0 + $0x40] ss:$8 sps:$4 sm:$0xff]  }
  0xbe   :  { %5643 = vmatprep.subr.bf16.mxu1 %v11280_v0 }
  0xbf   :  { %v470_v11 = vpop.permute.xlu1 %469  ;;  %v468_v12 = vpop.permute.xlu0 %467  ;;  %874 = vrot.lane.b32.xlu0 %v11242_v13, %s11286_s25  ;;  %v10384_v13 = vld [vmem:[#allocation3] ss:$36 sps:$4 sm:$0xff]  }
  0xc0   :  { %v11671_v15 = vsel %vm487_vm1, %v468_v12, %v470_v11  ;;  %v11810_v11 = vld [vmem:[%s13599_s0 + $0x54] ss:$8 sps:$4 sm:$0xff]  }
  0xc1   :  { %880 = vrot.lane.b32.xlu1 %v11243_v14, %s11286_s25  ;;  %6189 = vmatpush1.bf16.msra.mxu0 %v11671_v15  ;;  %v10390_v14 = vld [vmem:[#allocation3 + $0x4c] ss:$36 sps:$4 sm:$0xff]  }
  0xc2   :  { %6190 = vmatprep.subr.bf16.mxu0 %v11280_v0 }
  0xc3   :  { %v196_v16 = vpop.permute.xlu1 %195  ;;  %v194_v17 = vpop.permute.xlu0 %193  ;;  %878 = vrot.lane.b32.xlu0 %v11244_v18, %s11286_s25  ;;  %v10389_v18 = vld [vmem:[#allocation3 + $0x50] ss:$36 sps:$4 sm:$0xff]  }
  0xc4   :  { %v217_v20 = vsel %vm213_vm2, %v194_v17, %v196_v16  ;;  %v11816_v17 = vld [vmem:[%s13599_s0 + $0x50] ss:$8 sps:$4 sm:$0xff]  }
  0xc5   :  { %884 = vrot.lane.b32.xlu1 %v11245_v19, %s11286_s25  ;;  %5644 = vmatpush1.bf16.msra.mxu1 %v217_v20 }
  0xc6   :  { %5645 = vmatprep.subr.bf16.mxu1 %v11280_v0 }
  0xc7   :  { %v474_v21 = vpop.permute.xlu1 %473  ;;  %v472_v22 = vpop.permute.xlu0 %471  ;;  %882 = vrot.lane.b32.xlu0 %v11246_v23, %s11286_s25 }
  0xc8   :  { %v11694_v25 = vsel %vm487_vm1, %v472_v22, %v474_v21  ;;  %v10393_v21 = vld [vmem:[#allocation3 + $0x9c] ss:$36 sps:$4 sm:$0xff]   ;;  %v11827_v22 = vld [vmem:[%s13599_s0 + $0x64] ss:$8 sps:$4 sm:$0xff]  }
  0xc9   :  { %888 = vrot.lane.b32.xlu1 %v11247_v24, %s11286_s25  ;;  %6191 = vmatpush1.bf16.msra.mxu0 %v11694_v25 }
  0xca   :  { %6192 = vmatprep.subr.bf16.mxu0 %v11280_v0 }
  0xcb   :  { %v200_v26 = vpop.permute.xlu1 %199  ;;  %v198_v27 = vpop.permute.xlu0 %197  ;;  %886 = vrot.lane.b32.xlu0 %v11248_v28, %s11286_s25  ;;  %v10396_v28 = vld [vmem:[#allocation3 + $0x94] ss:$36 sps:$4 sm:$0xff]  }
  0xcc   :  { %v218_v30 = vsel %vm213_vm2, %v198_v27, %v200_v26  ;;  %v11837_v26 = vld [vmem:[%s13599_s0 + $0x60] ss:$8 sps:$4 sm:$0xff]  }
  0xcd   :  { %892 = vrot.lane.b32.xlu1 %v11249_v29, %s11286_s25  ;;  %5646 = vmatpush1.bf16.msra.mxu1 %v218_v30  ;;  %v11845_v29 = vld [vmem:[%s13599_s0 + $0x74] ss:$8 sps:$4 sm:$0xff]  }
  0xce   :  { %5647 = vmatprep.subr.bf16.mxu1 %v11280_v0 }
  0xcf   :  { %v478_v32 = vpop.permute.xlu1 %477  ;;  %v476_v35 = vpop.permute.xlu0 %475  ;;  %890 = vrot.lane.b32.xlu0 %v11250_v36, %s11286_s25  ;;  %v10395_v36 = vld [vmem:[#allocation3 + $0x98] ss:$36 sps:$4 sm:$0xff]  }
  0xd0   :  { %v11722_v39 = vsel %vm487_vm1, %v476_v35, %v478_v32  ;;  %v11851_v32 = vld [vmem:[%s13599_s0 + $0x70] ss:$8 sps:$4 sm:$0xff]   ;;  %s11288_s0 = smov 102  }
  0xd1   :  { %896 = vrot.lane.b32.xlu1 %v11251_v38, %s11286_s25  ;;  %6193 = vmatpush1.bf16.msra.mxu0 %v11722_v39  ;;  %v10399_v38 = vld [vmem:[#allocation3 + $0xe4] ss:$36 sps:$4 sm:$0xff]  }
  0xd2   :  { %6194 = vmatprep.subr.bf16.mxu0 %v11280_v0 }
  0xd3   :  { %v204_v41 = vpop.permute.xlu1 %203  ;;  %v202_v44 = vpop.permute.xlu0 %201  ;;  %894 = vrot.lane.b32.xlu0 %v11252_v45, %s11286_s25  ;;  %v10398_v45 = vld [vmem:[#allocation3 + $0x90] ss:$36 sps:$4 sm:$0xff]  }
  0xd4   :  { %v219_v48 = vsel %vm213_vm2, %v202_v44, %v204_v41 }
  0xd5   :  { %1005 = vrot.lane.b32.xlu1 %v11710_v33, %s11287_s6  ;;  %5648 = vmatpush1.bf16.msra.mxu1 %v219_v48 }
  0xd6   :  { %5649 = vmatprep.subr.bf16.mxu1 %v11280_v0 }
  0xd7   :  { %v482_v50 = vpop.permute.xlu1 %481  ;;  %v480_v54 = vpop.permute.xlu0 %479  ;;  %1003 = vrot.lane.b32.xlu0 %v11728_v42, %s11287_s6 }
  0xd8   :  { %v11759_v56 = vsel %vm487_vm1, %v480_v54, %v482_v50  ;;  %v10405_v50 = vld [vmem:[#allocation3 + $0xdc] ss:$36 sps:$4 sm:$0xff]  }
  0xd9   :  { %1009 = vrot.lane.b32.xlu1 %v11740_v47, %s11287_s6  ;;  %6195 = vmatpush1.bf16.msra.mxu0 %v11759_v56 }
  0xda   :  { %6196 = vmatprep.subr.bf16.mxu0 %v11280_v0 }
  0xdb   :  { %v208_v57 = vpop.permute.xlu1 %207  ;;  %v206_v60 = vpop.permute.xlu0 %205  ;;  %1007 = vrot.lane.b32.xlu0 %v11746_v51, %s11287_s6 }
  0xdc   :  { %v220_v62 = vsel %vm213_vm2, %v206_v60, %v208_v57  ;;  %v10401_v57 = vld [vmem:[#allocation3 + $0xe0] ss:$36 sps:$4 sm:$0xff]   ;;  %v10411_v60 = vld [vmem:[#allocation3 + $0x12c] ss:$36 sps:$4 sm:$0xff]  }
  0xdd   :  { %1013 = vrot.lane.b32.xlu1 %v11751_v53, %s11287_s6  ;;  %5650 = vmatpush1.bf16.msra.mxu1 %v220_v62 }
  0xde   :  { %5651 = vmatprep.subr.bf16.mxu1 %v11280_v0 }
  0xdf   :  { %v486_v63 = vpop.permute.xlu1 %485  ;;  %v484_v3 = vpop.permute.xlu0 %483  ;;  %1011 = vrot.lane.b32.xlu0 %v11765_v58, %s11287_s6 }
  0xe0   :  { %v11794_v4 = vsel %vm487_vm1, %v484_v3, %v486_v63  ;;  %v10417_v63 = vld [vmem:[#allocation3 + $0x124] ss:$36 sps:$4 sm:$0xff]  }
  0xe1   :  { %1017 = vrot.lane.b32.xlu1 %v11775_v61, %s11287_s6  ;;  %6197 = vmatpush1.bf16.msra.mxu0 %v11794_v4 }
  0xe2   :  { %6711 = vmatprep.subr.bf16.mxu0 %v11280_v0 }
  0xe3   :  { %v212_v8 = vpop.permute.xlu1 %211  ;;  %v210_v10 = vpop.permute.xlu0 %209  ;;  %1015 = vrot.lane.b32.xlu0 %v11781_v1, %s11287_s6 }
  0xe4   :  { %6199 = vmatmul.mubr.bf16.vlgmr.msra.gmra.mrb[0].mxu0 %v10381_v6  ;;  %v221_v12 = vsel %vm213_vm2, %v210_v10, %v212_v8  ;;  %v10423_v6 = vld [vmem:[#allocation3 + $0x174] ss:$36 sps:$4 sm:$0xff]   ;;  %v10429_v8 = vld [vmem:[#allocation3 + $0x16c] ss:$36 sps:$4 sm:$0xff]  }
  0xe5   :  { %1021 = vrot.lane.b32.xlu1 %v11786_v2, %s11287_s6  ;;  %5652 = vmatpush1.bf16.msra.mxu1 %v221_v12  ;;  %v10435_v12 = vld [vmem:[#allocation3 + $0x1bc] ss:$36 sps:$4 sm:$0xff]  }
  0xe6   :  { %6206 = vmatprep.mubr.bf16.mxu0 %v10387_v7  ;;  %9535 = vmatprep.subr.bf16.mxu1 %v11280_v0 }
  0xe7   :  { %v595_v16 = vpop.permute.xlu1 %594  ;;  %v593_v19 = vpop.permute.xlu0 %592  ;;  %1019 = vrot.lane.b32.xlu0 %v11800_v9, %s11287_s6 }
  0xe8   :  { %v625_v20 = vsel %vm624_vm3, %v593_v19, %v595_v16  ;;  %5654 = vmatmul.mubr.bf16.vlgmr.msra.gmra.mrb[0].mxu1 %v10384_v13 }
  0xe9   :  { %1025 = vrot.lane.b32.xlu1 %v11810_v11, %s11287_s6  ;;  %9551 = vmatpush1.bf16.msra.mxu1 %v11547_v31  ;;  %v10392_v31 = vld [vmem:[#allocation3 + $0x48] ss:$36 sps:$4 sm:$0xff]  }
  0xea   :  { %6712 = vmatpush1.bf16.msra.mxu0 %v625_v20  ;;  %9536 = vmatprep.subr.bf16.mxu1 %v11280_v0 }
  0xeb   :  { %v599_v23 = vpop.permute.xlu1 %598  ;;  %5661 = vmatprep.mubr.bf16.mxu1 %v10390_v14  ;;  %v597_v24 = vpop.permute.xlu0 %596  ;;  %6713 = vmatprep.subr.bf16.mxu0 %v11280_v0  ;;  %v10441_v14 = vld [vmem:[#allocation3 + $0x1b4] ss:$36 sps:$4 sm:$0xff]  }
  0xec   :  { %1023 = vrot.lane.b32.xlu0 %v11816_v17, %s11287_s6  ;;  %6207 = vmatmul.mubr.bf16.gmra.mrb[4].mxu0 %v10389_v18  ;;  %v626_v27 = vsel %vm624_vm3, %v597_v24, %v599_v23  ;;  %v10447_v18 = vld [vmem:[#allocation3 + $0x204] ss:$36 sps:$4 sm:$0xff]   ;;  %v10450_v23 = vld [vmem:[#allocation3 + $0x1fc] ss:$36 sps:$4 sm:$0xff]  }
  0xed   :  { %1029 = vrot.lane.b32.xlu1 %v11827_v22, %s11287_s6  ;;  %9552 = vmatpush1.bf16.msra.mxu1 %v11554_v34  ;;  %v1909_v24 = vld [vmem:[%s13601_s2] sm:$0xff] }
  0xee   :  { %6714 = vmatpush1.bf16.msra.mxu0 %v626_v27  ;;  %9537 = vmatprep.subr.bf16.mxu1 %v11280_v0 }
  0xef   :  { %v603_v30 = vpop.permute.xlu1 %602  ;;  %6214 = vmatprep.mubr.bf16.mxu0 %v10393_v21  ;;  %v601_v35 = vpop.permute.xlu0 %600  ;;  %6715 = vmatprep.subr.bf16.mxu0 %v11280_v0  ;;  %v10443_v21 = vld [vmem:[#allocation3 + $0x1b0] ss:$36 sps:$4 sm:$0xff]  }
  0xf0   :  { %1027 = vrot.lane.b32.xlu0 %v11837_v26, %s11287_s6  ;;  %5662 = vmatmul.mubr.bf16.gmra.mrb[4].mxu1 %v10392_v31  ;;  %v627_v34 = vsel %vm624_vm3, %v601_v35, %v603_v30  ;;  %v10449_v31 = vld [vmem:[#allocation3 + $0x200] ss:$36 sps:$4 sm:$0xff]   ;;  %v1912_v30 = vld [vmem:[%s13601_s2 + $0x18] sm:$0xff] }
  0xf1   :  { %1033 = vrot.lane.b32.xlu1 %v11845_v29, %s11287_s6  ;;  %9553 = vmatpush1.bf16.msra.mxu1 %v11562_v37 }
  0xf2   :  { %5669 = vmatprep.mubr.bf16.mxu1 %v10396_v28  ;;  %9538 = vmatprep.subr.bf16.mxu1 %v11280_v0  ;;  %v10453_v28 = vld [vmem:[#allocation3 + $0x24c] ss:$36 sps:$4 sm:$0xff]  }
  0xf3   :  { %v607_v41 = vpop.permute.xlu1 %606  ;;  %6716 = vmatpush1.bf16.msra.mxu0 %v627_v34  ;;  %v605_v44 = vpop.permute.xlu0 %604 }
  0xf4   :  { %6717 = vmatprep.subr.bf16.mxu0 %v11280_v0  ;;  %1031 = vrot.lane.b32.xlu0 %v11851_v32, %s11287_s6  ;;  %v628_v48 = vsel %vm624_vm3, %v605_v44, %v607_v41  ;;  %v1914_v41 = vld [vmem:[%s13601_s2 + $0x28] sm:$0xff] }
  0xf5   :  { %6215 = vmatmul.mubr.bf16.gmra.mrb[8].mxu0 %v10395_v36  ;;  %1142 = vrot.lane.b32.xlu1 %v11710_v33, %s11288_s0  ;;  %v10452_v36 = vld [vmem:[#allocation3 + $0x1f8] ss:$36 sps:$4 sm:$0xff]  }
  0xf6   :  { %9554 = vmatpush1.bf16.msra.mxu1 %v11571_v40  ;;  %6222 = vmatprep.mubr.bf16.mxu0 %v10399_v38  ;;  %v10456_v38 = vld [vmem:[#allocation3 + $0x244] ss:$36 sps:$4 sm:$0xff]  }
  0xf7   :  { %v611_v37 = vpop.permute.xlu1 %610  ;;  %9539 = vmatprep.subr.bf16.mxu1 %v11280_v0  ;;  %6718 = vmatpush1.bf16.msra.mxu0 %v628_v48  ;;  %v609_v54 = vpop.permute.xlu0 %608  ;;  %v10459_v48 = vld [vmem:[#allocation3 + $0x294] ss:$36 sps:$4 sm:$0xff]  }
  0xf8   :  { %6719 = vmatprep.subr.bf16.mxu0 %v11280_v0  ;;  %1140 = vrot.lane.b32.xlu0 %v11728_v42, %s11288_s0  ;;  %v629_v62 = vsel %vm624_vm3, %v609_v54, %v611_v37  ;;  %v10407_v42 = vld [vmem:[#allocation3 + $0xd8] ss:$36 sps:$4 sm:$0xff]  }
  0xf9   :  { %5670 = vmatmul.mubr.bf16.gmra.mrb[8].mxu1 %v10398_v45  ;;  %1146 = vrot.lane.b32.xlu1 %v11740_v47, %s11288_s0  ;;  %v10455_v45 = vld [vmem:[#allocation3 + $0x248] ss:$36 sps:$4 sm:$0xff]   ;;  %v1916_v37 = vld [vmem:[%s13601_s2 + $0x38] sm:$0xff] }
  0xfa   :  { %9555 = vmatpush1.bf16.msra.mxu1 %v11580_v43  ;;  %5677 = vmatprep.mubr.bf16.mxu1 %v10405_v50 }
  0xfb   :  { %v615_v40 = vpop.permute.xlu1 %614  ;;  %9540 = vmatprep.subr.bf16.mxu1 %v11280_v0  ;;  %6720 = vmatpush1.bf16.msra.mxu0 %v629_v62  ;;  %v613_v33 = vpop.permute.xlu0 %612  ;;  %v10462_v62 = vld [vmem:[#allocation3 + $0x28c] ss:$36 sps:$4 sm:$0xff]  }
  0xfc   :  { %6721 = vmatprep.subr.bf16.mxu0 %v11280_v0  ;;  %1144 = vrot.lane.b32.xlu0 %v11746_v51, %s11288_s0  ;;  %v630_v3 = vsel %vm624_vm3, %v613_v33, %v615_v40  ;;  %v10413_v51 = vld [vmem:[#allocation3 + $0x128] ss:$36 sps:$4 sm:$0xff]  }
  0xfd   :  { %6223 = vmatmul.mubr.bf16.gmra.mrb[12].mxu0 %v10401_v57  ;;  %1150 = vrot.lane.b32.xlu1 %v11751_v53, %s11288_s0  ;;  %v1918_v40 = vld [vmem:[%s13601_s2 + $0x48] sm:$0xff] }
  0xfe   :  { %9556 = vmatpush1.bf16.msra.mxu1 %v11589_v46  ;;  %6230 = vmatprep.mubr.bf16.mxu0 %v10411_v60  ;;  %v10458_v60 = vld [vmem:[#allocation3 + $0x240] ss:$36 sps:$4 sm:$0xff]  }
  0xff   :  { %v619_v43 = vpop.permute.xlu1 %618  ;;  %9541 = vmatprep.subr.bf16.mxu1 %v11280_v0  ;;  %6722 = vmatpush1.bf16.msra.mxu0 %v630_v3 }
 0x100   :  { %v617_v47 = vpop.permute.xlu0 %616  ;;  %6723 = vmatprep.subr.bf16.mxu0 %v11280_v0  ;;  %1148 = vrot.lane.b32.xlu0 %v11765_v58, %s11288_s0  ;;  %v10419_v58 = vld [vmem:[#allocation3 + $0x120] ss:$36 sps:$4 sm:$0xff]  }
 0x101   :  { %5678 = vmatmul.mubr.bf16.gmra.mrb[12].mxu1 %v10407_v42  ;;  %v631_v7 = vsel %vm624_vm3, %v617_v47, %v619_v43  ;;  %1154 = vrot.lane.b32.xlu1 %v11775_v61, %s11288_s0  ;;  %v10465_v43 = vld [vmem:[#allocation3 + $0x2dc] ss:$36 sps:$4 sm:$0xff]  }
 0x102   :  { %9557 = vmatpush1.bf16.msra.mxu1 %v11598_v49  ;;  %5685 = vmatprep.mubr.bf16.mxu1 %v10417_v63  ;;  %v10461_v63 = vld [vmem:[#allocation3 + $0x290] ss:$36 sps:$4 sm:$0xff]   ;;  %v1920_v47 = vld [vmem:[%s13601_s2 + $0x58] sm:$0xff] }
 0x103   :  { %v623_v46 = vpop.permute.xlu1 %622  ;;  %9542 = vmatprep.subr.bf16.mxu1 %v11280_v0  ;;  %6724 = vmatpush1.bf16.msra.mxu0 %v631_v7  ;;  %v1922_v7 = vld [vmem:[%s13601_s2 + $0x68] sm:$0xff] }
 0x104   :  { %v621_v53 = vpop.permute.xlu0 %620  ;;  %6725 = vmatprep.subr.bf16.mxu0 %v11280_v0  ;;  %1152 = vrot.lane.b32.xlu0 %v11781_v1, %s11288_s0  ;;  %v10425_v1 = vld [vmem:[#allocation3 + $0x170] ss:$36 sps:$4 sm:$0xff]  }
 0x105   :  { %6231 = vmatmul.mubr.bf16.gmra.mrb[16].mxu0 %v10413_v51  ;;  %v632_v10 = vsel %vm624_vm3, %v621_v53, %v623_v46  ;;  %1158 = vrot.lane.b32.xlu1 %v11786_v2, %s11288_s0  ;;  %v10464_v51 = vld [vmem:[#allocation3 + $0x288] ss:$36 sps:$4 sm:$0xff]   ;;  %v1923_v46 = vld [vmem:[%s13601_s2 + $0x70] sm:$0xff]  ;;  %v10467_v53 = vld [vmem:[#allocation3 + $0x2d8] ss:$36 sps:$4 sm:$0xff]  }
 0x106   :  { %9558 = vmatpush1.bf16.msra.mxu1 %v11607_v52  ;;  %6238 = vmatprep.mubr.bf16.mxu0 %v10423_v6  ;;  %v10468_v6 = vld [vmem:[#allocation3 + $0x2d4] ss:$36 sps:$4 sm:$0xff]  }
 0x107   :  { %v732_v49 = vpop.permute.xlu1 %731  ;;  %9543 = vmatprep.subr.bf16.mxu1 %v11280_v0  ;;  %6726 = vmatpush1.bf16.msra.mxu0 %v632_v10  ;;  %v1925_v10 = vld [vmem:[%s13601_s2 + $0x80] sm:$0xff] }
 0x108   :  { %v730_v61 = vpop.permute.xlu0 %729  ;;  %6727 = vmatprep.subr.bf16.mxu0 %v11280_v0  ;;  %1156 = vrot.lane.b32.xlu0 %v11800_v9, %s11288_s0  ;;  %v10431_v9 = vld [vmem:[#allocation3 + $0x168] ss:$36 sps:$4 sm:$0xff]  }
 0x109   :  { %5686 = vmatmul.mubr.bf16.gmra.mrb[16].mxu1 %v10419_v58  ;;  %v762_v13 = vsel %vm761_vm4, %v730_v61, %v732_v49  ;;  %1162 = vrot.lane.b32.xlu1 %v11810_v11, %s11288_s0  ;;  %v10437_v11 = vld [vmem:[#allocation3 + $0x1b8] ss:$36 sps:$4 sm:$0xff]   ;;  %v10470_v49 = vld [vmem:[#allocation3 + $0x2d0] ss:$36 sps:$4 sm:$0xff]   ;;  %v1926_v61 = vld [vmem:[%s13601_s2 + $0x88] sm:$0xff] }
 0x10a   :  { %9559 = vmatpush1.bf16.msra.mxu1 %v11616_v55  ;;  %5693 = vmatprep.mubr.bf16.mxu1 %v10429_v8  ;;  %v1924_v58 = vld [vmem:[%s13601_s2 + $0x78] sm:$0xff]  ;;  %v10471_v8 = vld [vmem:[#allocation3 + $0x324] ss:$36 sps:$4 sm:$0xff]  }
 0x10b   :  { %v736_v52 = vpop.permute.xlu1 %735  ;;  %9544 = vmatprep.subr.bf16.mxu1 %v11280_v0  ;;  %6728 = vmatpush1.bf16.msra.mxu0 %v762_v13  ;;  %v10473_v13 = vld [vmem:[#allocation3 + $0x320] ss:$36 sps:$4 sm:$0xff]  }
 0x10c   :  { %v734_v2 = vpop.permute.xlu0 %733  ;;  %6729 = vmatprep.subr.bf16.mxu0 %v11280_v0  ;;  %1160 = vrot.lane.b32.xlu0 %v11816_v17, %s11288_s0 }
 0x10d   :  { %6239 = vmatmul.mubr.bf16.gmra.mrb[20].mxu0 %v10425_v1  ;;  %v763_v16 = vsel %vm761_vm4, %v734_v2, %v736_v52  ;;  %1166 = vrot.lane.b32.xlu1 %v11827_v22, %s11288_s0  ;;  %v10474_v1 = vld [vmem:[#allocation3 + $0x31c] ss:$36 sps:$4 sm:$0xff]   ;;  %v10477_v2 = vld [vmem:[#allocation3 + $0x36c] ss:$36 sps:$4 sm:$0xff]  }
 0x10e   :  { %9560 = vmatpush1.bf16.msra.mxu1 %v11627_v59  ;;  %6246 = vmatprep.mubr.bf16.mxu0 %v10435_v12  ;;  %v1910_v59 = vld [vmem:[%s13601_s2 + $0x8] sm:$0xff]  ;;  %v1927_v12 = vld [vmem:[%s13601_s2 + $0x90] sm:$0xff]  ;;  %v1928_v52 = vld [vmem:[%s13601_s2 + $0x98] sm:$0xff] }
 0x10f   :  { %v740_v55 = vpop.permute.xlu1 %739  ;;  %9545 = vmatprep.subr.bf16.mxu1 %v11280_v0  ;;  %6730 = vmatpush1.bf16.msra.mxu0 %v763_v16  ;;  %v1930_v16 = vld [vmem:[%s13601_s2 + $0xa8] sm:$0xff] }
 0x110   :  { %1164 = vrot.lane.b32.xlu0 %v11837_v26, %s11288_s0  ;;  %v738_v17 = vpop.permute.xlu0 %737  ;;  %6731 = vmatprep.subr.bf16.mxu0 %v11280_v0  ;;  %v1911_v26 = vld [vmem:[%s13601_s2 + $0x10] sm:$0xff] }
 0x111   :  { %5694 = vmatmul.mubr.bf16.gmra.mrb[20].mxu1 %v10431_v9  ;;  %v764_v19 = vsel %vm761_vm4, %v738_v17, %v740_v55  ;;  %1170 = vrot.lane.b32.xlu1 %v11845_v29, %s11288_s0  ;;  %v1929_v9 = vld [vmem:[%s13601_s2 + $0xa0] sm:$0xff]  ;;  %v10479_v17 = vld [vmem:[#allocation3 + $0x368] ss:$36 sps:$4 sm:$0xff]  }
 0x112   :  { %9561 = vmatpush1.bf16.msra.mxu1 %v11648_v5  ;;  %5701 = vmatprep.mubr.bf16.mxu1 %v10441_v14  ;;  %v10476_v14 = vld [vmem:[#allocation3 + $0x318] ss:$36 sps:$4 sm:$0xff]   ;;  %v10480_v55 = vld [vmem:[#allocation3 + $0x364] ss:$36 sps:$4 sm:$0xff]  }
 0x113   :  { %v744_v20 = vpop.permute.xlu1 %743  ;;  %9546 = vmatprep.subr.bf16.mxu1 %v11280_v0  ;;  %6732 = vmatpush1.bf16.msra.mxu0 %v764_v19  ;;  %v10483_v19 = vld [vmem:[#allocation3 + $0x3b4] ss:$36 sps:$4 sm:$0xff]  }
 0x114   :  { %1168 = vrot.lane.b32.xlu0 %v11851_v32, %s11288_s0  ;;  %v742_v22 = vpop.permute.xlu0 %741  ;;  %6733 = vmatprep.subr.bf16.mxu0 %v11280_v0 }
 0x115   :  { %6247 = vmatmul.mubr.bf16.gmra.mrb[24].mxu0 %v10437_v11  ;;  %2044 = vperm.xlu1 %10348, %v1910_v59   ;;  %v765_v5 = vsel %vm761_vm4, %v742_v22, %v744_v20  ;;  %v1931_v11 = vld [vmem:[%s13601_s2 + $0xb0] sm:$0xff]  ;;  %v1933_v59 = vld [vmem:[%s13601_s2 + $0xc0] sm:$0xff] }
 0x116   :  { %9562 = vmatpush1.bf16.msra.mxu1 %v11671_v15  ;;  %6254 = vmatprep.mubr.bf16.mxu0 %v10447_v18  ;;  %v1913_v15 = vld [vmem:[%s13601_s2 + $0x20] sm:$0xff]  ;;  %v1932_v18 = vld [vmem:[%s13601_s2 + $0xb8] sm:$0xff] }
 0x117   :  { %v748_v27 = vpop.permute.xlu1 %747  ;;  %9547 = vmatprep.subr.bf16.mxu1 %v11280_v0  ;;  %6734 = vmatpush1.bf16.msra.mxu0 %v765_v5  ;;  %v10482_v22 = vld [vmem:[#allocation3 + $0x360] ss:$36 sps:$4 sm:$0xff]   ;;  %v1935_v5 = vld [vmem:[%s13601_s2 + $0xd0] sm:$0xff] }
 0x118   :  { %2039 = vperm.xlu0 %10347, %v1909_v24   ;;  %v746_v29 = vpop.permute.xlu0 %745  ;;  %6735 = vmatprep.subr.bf16.mxu0 %v11280_v0  ;;  %v10486_v24 = vld [vmem:[#allocation3 + $0x3ac] ss:$36 sps:$4 sm:$0xff]  }
 0x119   :  { %5702 = vmatmul.mubr.bf16.gmra.mrb[24].mxu1 %v10443_v21  ;;  %2049 = vperm.xlu1 %10348, %v1911_v26   ;;  %v766_v32 = vsel %vm761_vm4, %v746_v29, %v748_v27  ;;  %v10485_v26 = vld [vmem:[#allocation3 + $0x3b0] ss:$36 sps:$4 sm:$0xff]   ;;  %v1936_v27 = vld [vmem:[%s13601_s2 + $0xd8] sm:$0xff] }
 0x11a   :  { %9563 = vmatpush1.bf16.msra.mxu1 %v11694_v25  ;;  %5709 = vmatprep.mubr.bf16.mxu1 %v10450_v23  ;;  %v1915_v25 = vld [vmem:[%s13601_s2 + $0x30] sm:$0xff]  ;;  %v1934_v23 = vld [vmem:[%s13601_s2 + $0xc8] sm:$0xff] }
 0x11b   :  { %v752_v35 = vpop.permute.xlu1 %751  ;;  %9548 = vmatprep.subr.bf16.mxu1 %v11280_v0  ;;  %6736 = vmatpush1.bf16.msra.mxu0 %v766_v32  ;;  %v10488_v32 = vld [vmem:[#allocation3 + $0x3a8] ss:$36 sps:$4 sm:$0xff]  }
 0x11c   :  { %2054 = vperm.xlu0 %10347, %v1912_v30   ;;  %v750_v34 = vpop.permute.xlu0 %749  ;;  %6737 = vmatprep.subr.bf16.mxu0 %v11280_v0  ;;  %v1937_v30 = vld [vmem:[%s13601_s2 + $0xe0] sm:$0xff] }
 0x11d   :  { %6255 = vmatmul.mubr.bf16.gmra.mrb[28].mxu0 %v10449_v31  ;;  %2059 = vperm.xlu1 %10348, %v1913_v15   ;;  %v767_v44 = vsel %vm761_vm4, %v750_v34, %v752_v35  ;;  %v10489_v31 = vld [vmem:[#allocation3 + $0x3fc] ss:$36 sps:$4 sm:$0xff]   ;;  %v1938_v15 = vld [vmem:[%s13601_s2 + $0xe8] sm:$0xff]  ;;  %v10492_v35 = vld [vmem:[#allocation3 + $0x3f4] ss:$36 sps:$4 sm:$0xff]  }
 0x11e   :  { %9564 = vmatpush1.bf16.msra.mxu1 %v11722_v39  ;;  %6262 = vmatprep.mubr.bf16.mxu0 %v10453_v28  ;;  %v1917_v39 = vld [vmem:[%s13601_s2 + $0x40] sm:$0xff] }
 0x11f   :  { %9549 = vmatprep.subr.bf16.mxu1 %v11280_v0  ;;  %6738 = vmatpush1.bf16.msra.mxu0 %v767_v44  ;;  %v756_v50 = vpop.permute.xlu1 %755  ;;  %v1940_v44 = vld [vmem:[%s13601_s2 + $0xf8] sm:$0xff] }
 0x120   :  { %2064 = vperm.xlu0 %10347, %v1914_v41   ;;  %6739 = vmatprep.subr.bf16.mxu0 %v11280_v0  ;;  %v10491_v41 = vld [vmem:[#allocation3 + $0x3f8] ss:$36 sps:$4 sm:$0xff]  }
 0x121   :  { %5710 = vmatmul.mubr.bf16.gmra.mrb[28].mxu1 %v10452_v36  ;;  %2069 = vperm.xlu1 %10348, %v1915_v25   ;;  %v754_v54 = vpop.permute.xlu0 %753  ;;  %v1939_v36 = vld [vmem:[%s13601_s2 + $0xf0] sm:$0xff]  ;;  %v10495_v25 = vld [vmem:[#allocation3 + $0x444] ss:$36 sps:$4 sm:$0xff]  }
 0x122   :  { %9565 = vmatpush1.bf16.msra.mxu1 %v11759_v56  ;;  %5717 = vmatprep.mubr.bf16.mxu1 %v10456_v38  ;;  %v768_v57 = vsel %vm761_vm4, %v754_v54, %v756_v50  ;;  %v1919_v56 = vld [vmem:[%s13601_s2 + $0x50] sm:$0xff] }
 0x123   :  { %9550 = vmatprep.subr.bf16.mxu1 %v11280_v0  ;;  %6740 = vmatpush1.bf16.msra.mxu0 %v768_v57  ;;  %v760_v33 = vpop.permute.xlu1 %759  ;;  %v10503_v54 = vld [vmem:[#allocation3 + $0x14] ss:$36 sps:$4 sm:$0xff]  }
 0x124   :  { %2074 = vperm.xlu0 %10347, %v1916_v37   ;;  %6741 = vmatprep.subr.bf16.mxu0 %v11280_v0 }
 0x125   :  { %6263 = vmatmul.mubr.bf16.gmra.mrb[32].mxu0 %v10455_v45  ;;  %2079 = vperm.xlu1 %10348, %v1917_v39   ;;  %v758_v42 = vpop.permute.xlu0 %757  ;;  %v10494_v45 = vld [vmem:[#allocation3 + $0x3f0] ss:$36 sps:$4 sm:$0xff]   ;;  %v10497_v39 = vld [vmem:[#allocation3 + $0x440] ss:$36 sps:$4 sm:$0xff]  }
 0x126   :  { %9566 = vmatpush1.bf16.msra.mxu1 %v11794_v4  ;;  %6270 = vmatprep.mubr.bf16.mxu0 %v10459_v48  ;;  %v769_v3 = vsel %vm761_vm4, %v758_v42, %v760_v33  ;;  %v1921_v4 = vld [vmem:[%s13601_s2 + $0x60] sm:$0xff] }
 0x127   :  { %6742 = vmatpush1.bf16.msra.mxu0 %v769_v3  ;;  %v869_v20 = vpop.permute.xlu1 %868  ;;  %v10498_v48 = vld [vmem:[#allocation3 + $0x43c] ss:$36 sps:$4 sm:$0xff]  }
 0x128   :  { %2084 = vperm.xlu0 %10347, %v1918_v40   ;;  %7256 = vmatprep.subr.bf16.mxu0 %v11280_v0  ;;  %v10504_v40 = vld [vmem:[#allocation3 + $0x484] ss:$36 sps:$4 sm:$0xff]   ;;  %v10507_v33 = vld [vmem:[#allocation3 + $0x5c] ss:$36 sps:$4 sm:$0xff]  }
 0x129   :  { %5718 = vmatmul.mubr.bf16.gmra.mrb[32].mxu1 %v10458_v60  ;;  %2089 = vperm.xlu1 %10348, %v1919_v56   ;;  %v867_v21 = vpop.permute.xlu0 %866  ;;  %v10501_v56 = vld [vmem:[#allocation3 + $0x10] ss:$36 sps:$4 sm:$0xff]  }
 0x12a   :  { %5725 = vmatprep.mubr.bf16.mxu1 %v10462_v62  ;;  %v10500_v62 = vld [vmem:[#allocation3 + $0x438] ss:$36 sps:$4 sm:$0xff]   ;;  %v899_v3 = vsel %vm898_vm5, %v867_v21, %v869_v20  ;;  %v10528_v20 = vld [vmem:[#allocation3 + $0x5a4] ss:$36 sps:$4 sm:$0xff]  }
 0x12b   :  { %v873_v28 = vpop.permute.xlu1 %872 }
 0x12c   :  { %2094 = vperm.xlu0 %10347, %v1920_v47   ;;  %v10510_v47 = vld [vmem:[#allocation3 + $0x4cc] ss:$36 sps:$4 sm:$0xff]  }
 0x12d   :  { %6271 = vmatmul.mubr.bf16.gmra.mrb[36].mxu0 %v10461_v63  ;;  %2099 = vperm.xlu1 %10348, %v1921_v4   ;;  %v871_v29 = vpop.permute.xlu0 %870 }
 0x12e   :  { %6278 = vmatprep.mubr.bf16.mxu0 %v10465_v43  ;;  %v10506_v43 = vld [vmem:[#allocation3 + $0x480] ss:$36 sps:$4 sm:$0xff]   ;;  %v900_v4 = vsel %vm898_vm5, %v871_v29, %v873_v28  ;;  %v10534_v29 = vld [vmem:[#allocation3 + $0x5ec] ss:$36 sps:$4 sm:$0xff]  }
 0x12f   :  { %v877_v34 = vpop.permute.xlu1 %876 }
 0x130   :  { %2104 = vperm.xlu0 %10347, %v1922_v7   ;;  %v10509_v7 = vld [vmem:[#allocation3 + $0x58] ss:$36 sps:$4 sm:$0xff]  }
 0x131   :  { %5726 = vmatmul.mubr.bf16.gmra.mrb[36].mxu1 %v10464_v51  ;;  %2109 = vperm.xlu1 %10348, %v1923_v46   ;;  %v875_v38 = vpop.permute.xlu0 %874  ;;  %v10513_v46 = vld [vmem:[#allocation3 + $0xa4] ss:$36 sps:$4 sm:$0xff]  }
 0x132   :  { %5733 = vmatprep.mubr.bf16.mxu1 %v10468_v6 }
 0x133   :  { %v881_v50 = vpop.permute.xlu1 %880 }
 0x134   :  { %2114 = vperm.xlu0 %10347, %v1924_v58   ;;  %v10512_v58 = vld [vmem:[#allocation3 + $0x4c8] ss:$36 sps:$4 sm:$0xff]  }
 0x135   :  { %6279 = vmatmul.mubr.bf16.gmra.mrb[40].mxu0 %v10467_v53  ;;  %2119 = vperm.xlu1 %10348, %v1925_v10   ;;  %v879_v37 = vpop.permute.xlu0 %878  ;;  %v901_v53 = vsel %vm898_vm5, %v875_v38, %v877_v34  ;;  %v10536_v38 = vld [vmem:[#allocation3 + $0x5e8] ss:$36 sps:$4 sm:$0xff]  }
 0x136   :  { %6286 = vmatprep.mubr.bf16.mxu0 %v10471_v8  ;;  %v10516_v8 = vld [vmem:[#allocation3 + $0x514] ss:$36 sps:$4 sm:$0xff]  }
 0x137   :  { %v885_v57 = vpop.permute.xlu1 %884 }
 0x138   :  { %2124 = vperm.xlu0 %10347, %v1926_v61   ;;  %v902_v61 = vsel %vm898_vm5, %v879_v37, %v881_v50  ;;  %v10543_v50 = vld [vmem:[#allocation3 + $0x20c] ss:$36 sps:$4 sm:$0xff]  }
 0x139   :  { %5734 = vmatmul.mubr.bf16.gmra.mrb[40].mxu1 %v10470_v49  ;;  %2129 = vperm.xlu1 %10348, %v1927_v12   ;;  %v883_v60 = vpop.permute.xlu0 %882  ;;  %v10519_v12 = vld [vmem:[#allocation3 + $0xec] ss:$36 sps:$4 sm:$0xff]  }
 0x13a   :  { %5741 = vmatprep.mubr.bf16.mxu1 %v10474_v1  ;;  %v10515_v1 = vld [vmem:[#allocation3 + $0xa0] ss:$36 sps:$4 sm:$0xff]  }
 0x13b   :  { %v889_v42 = vpop.permute.xlu1 %888 }
 0x13c   :  { %2134 = vperm.xlu0 %10347, %v1928_v52  }
 0x13d   :  { %6287 = vmatmul.mubr.bf16.gmra.mrb[44].mxu0 %v10473_v13  ;;  %2139 = vperm.xlu1 %10348, %v1929_v9   ;;  %v887_v63 = vpop.permute.xlu0 %886  ;;  %v903_v13 = vsel %vm898_vm5, %v883_v60, %v885_v57  ;;  %v10518_v9 = vld [vmem:[#allocation3 + $0x510] ss:$36 sps:$4 sm:$0xff]  }
 0x13e   :  { %6294 = vmatprep.mubr.bf16.mxu0 %v10477_v2 }
 0x13f   :  { %v893_v51 = vpop.permute.xlu1 %892 }
 0x140   :  { %2144 = vperm.xlu0 %10347, %v1930_v16   ;;  %v904_v16 = vsel %vm898_vm5, %v887_v63, %v889_v42  ;;  %v10548_v42 = vld [vmem:[#allocation3 + $0x678] ss:$36 sps:$4 sm:$0xff]  }
 0x141   :  { %5742 = vmatmul.mubr.bf16.gmra.mrb[44].mxu1 %v10476_v14  ;;  %2149 = vperm.xlu1 %10348, %v1931_v11   ;;  %v891_v6 = vpop.permute.xlu0 %890  ;;  %v10522_v14 = vld [vmem:[#allocation3 + $0x55c] ss:$36 sps:$4 sm:$0xff]  }
 0x142   :  { %5749 = vmatprep.mubr.bf16.mxu1 %v10480_v55  ;;  %v10521_v55 = vld [vmem:[#allocation3 + $0xe8] ss:$36 sps:$4 sm:$0xff]  }
 0x143   :  { %v897_v10 = vpop.permute.xlu1 %896 }
 0x144   :  { %2154 = vperm.xlu0 %10347, %v1932_v18   ;;  %v10525_v18 = vld [vmem:[#allocation3 + $0x134] ss:$36 sps:$4 sm:$0xff]  }
 0x145   :  { %6295 = vmatmul.mubr.bf16.gmra.mrb[48].mxu0 %v10479_v17  ;;  %2159 = vperm.xlu1 %10348, %v1933_v59   ;;  %v895_v49 = vpop.permute.xlu0 %894  ;;  %v10524_v59 = vld [vmem:[#allocation3 + $0x558] ss:$36 sps:$4 sm:$0xff]  }
 0x146   :  { %6302 = vmatprep.mubr.bf16.mxu0 %v10483_v19  ;;  %v905_v19 = vsel %vm898_vm5, %v891_v6, %v893_v51  ;;  %v906_v21 = vsel %vm898_vm5, %v895_v49, %v897_v10  ;;  %v10555_v51 = vld [vmem:[#allocation3 + $0x29c] ss:$36 sps:$4 sm:$0xff]   ;;  %v10566_v49 = vld [vmem:[#allocation3 + $0x750] ss:$36 sps:$4 sm:$0xff]  }
 0x147   :  { %v1006_v52 = vpop.permute.xlu1 %1005  ;;  %v10554_v6 = vld [vmem:[#allocation3 + $0x6c0] ss:$36 sps:$4 sm:$0xff]  }
 0x148   :  { %2164 = vperm.xlu0 %10347, %v1934_v23   ;;  %v10563_v10 = vld [vmem:[#allocation3 + $0x2e0] ss:$36 sps:$4 sm:$0xff]  }
 0x149   :  { %5750 = vmatmul.mubr.bf16.gmra.mrb[48].mxu1 %v10482_v22  ;;  %2169 = vperm.xlu1 %10348, %v1935_v5   ;;  %v1004_v2 = vpop.permute.xlu0 %1003  ;;  %v10531_v5 = vld [vmem:[#allocation3 + $0x17c] ss:$36 sps:$4 sm:$0xff]  }
 0x14a   :  { %5757 = vmatprep.mubr.bf16.mxu1 %v10486_v24  ;;  %v10527_v24 = vld [vmem:[#allocation3 + $0x130] ss:$36 sps:$4 sm:$0xff]  }
 0x14b   :  { %v1010_v11 = vpop.permute.xlu1 %1009 }
 0x14c   :  { %2174 = vperm.xlu0 %10347, %v1936_v27   ;;  %v10530_v27 = vld [vmem:[#allocation3 + $0x5a0] ss:$36 sps:$4 sm:$0xff]  }
 0x14d   :  { %6303 = vmatmul.mubr.bf16.gmra.mrb[52].mxu0 %v10485_v26  ;;  %2179 = vperm.xlu1 %10348, %v1937_v30   ;;  %v1008_v17 = vpop.permute.xlu0 %1007  ;;  %v1036_v26 = vsel %vm1035_vm6, %v1004_v2, %v1006_v52  ;;  %v10572_v2 = vld [vmem:[#allocation3 + $0x798] ss:$36 sps:$4 sm:$0xff]  }
 0x14e   :  { %6310 = vmatprep.mubr.bf16.mxu0 %v10489_v31  ;;  %v1037_v30 = vsel %vm1035_vm6, %v1008_v17, %v1010_v11  ;;  %v10579_v11 = vld [vmem:[#allocation3 + $0x3bc] ss:$36 sps:$4 sm:$0xff]  }
 0x14f   :  { %v1014_v22 = vpop.permute.xlu1 %1013 }
 0x150   :  { %2184 = vperm.xlu0 %10347, %v1938_v15   ;;  %v10537_v15 = vld [vmem:[#allocation3 + $0x1c4] ss:$36 sps:$4 sm:$0xff]  }
 0x151   :  { %5758 = vmatmul.mubr.bf16.gmra.mrb[52].mxu1 %v10488_v32  ;;  %2189 = vperm.xlu1 %10348, %v1939_v36   ;;  %v1012_v23 = vpop.permute.xlu0 %1011  ;;  %v10533_v32 = vld [vmem:[#allocation3 + $0x178] ss:$36 sps:$4 sm:$0xff]  }
 0x152   :  { %5765 = vmatprep.mubr.bf16.mxu1 %v10492_v35  ;;  %v1038_v35 = vsel %vm1035_vm6, %v1012_v23, %v1014_v22  ;;  %v10581_v22 = vld [vmem:[#allocation3 + $0x3b8] ss:$36 sps:$4 sm:$0xff]   ;;  %v10585_v23 = vld [vmem:[#allocation3 + $0x404] ss:$36 sps:$4 sm:$0xff]  }
 0x153   :  { %v1018_v31 = vpop.permute.xlu1 %1017 }
 0x154   :  { %2194 = vperm.xlu0 %10347, %v1940_v44  }
 0x155   :  { %6311 = vmatmul.mubr.bf16.gmra.mrb[56].mxu0 %v10491_v41  ;;  %v1016_v28 = vpop.permute.xlu0 %1015  ;;  %v10540_v41 = vld [vmem:[#allocation3 + $0x634] ss:$36 sps:$4 sm:$0xff]  }
 0x156   :  { %6318 = vmatprep.mubr.bf16.mxu0 %v10495_v25  ;;  %v1039_v44 = vsel %vm1035_vm6, %v1016_v28, %v1018_v31  ;;  %v10539_v25 = vld [vmem:[#allocation3 + $0x1c0] ss:$36 sps:$4 sm:$0xff]   ;;  %v10588_v31 = vld [vmem:[#allocation3 + $0x874] ss:$36 sps:$4 sm:$0xff]  }
 0x157   :  { %v1022_v36 = vpop.permute.xlu1 %1021 }
 0x159   :  { %5766 = vmatmul.mubr.bf16.gmra.mrb[56].mxu1 %v10494_v45  ;;  %v1020_v34 = vpop.permute.xlu0 %1019 }
 0x15a   :  { %5773 = vmatprep.mubr.bf16.mxu1 %v10498_v48  ;;  %v1040_v37 = vsel %vm1035_vm6, %v1020_v34, %v1022_v36  ;;  %v10594_v34 = vld [vmem:[#allocation3 + $0x8bc] ss:$36 sps:$4 sm:$0xff]  }
 0x15b   :  { %v1026_v45 = vpop.permute.xlu1 %1025 }
 0x15d   :  { %6319 = vmatmul.mubr.bf16.gmra.mrb[60].mxu0 %v10497_v39  ;;  %v10542_v39 = vld [vmem:[#allocation3 + $0x630] ss:$36 sps:$4 sm:$0xff]  }
 0x15e   :  { %6743 = vmatprep.mubr.bf16.mxu0 %v10503_v54  ;;  %v1024_v48 = vpop.permute.xlu0 %1023  ;;  %v10546_v54 = vld [vmem:[#allocation3 + $0x67c] ss:$36 sps:$4 sm:$0xff]  }
 0x15f   :  { %v1041_v57 = vsel %vm1035_vm6, %v1024_v48, %v1026_v45  ;;  %v1030_v60 = vpop.permute.xlu1 %1029  ;;  %v10596_v48 = vld [vmem:[#allocation3 + $0x8b8] ss:$36 sps:$4 sm:$0xff]  }
 0x161   :  { %5774 = vmatmul.mubr.bf16.gmra.mrb[60].mxu1 %v10500_v62 }
 0x162   :  { %5781 = vmatprep.mubr.bf16.mxu1 %v10504_v40  ;;  %v1028_v62 = vpop.permute.xlu0 %1027  ;;  %v10545_v40 = vld [vmem:[#allocation3 + $0x208] ss:$36 sps:$4 sm:$0xff]  }
 0x163   :  { %v1034_v63 = vpop.permute.xlu1 %1033 }
 0x165   :  { %6744 = vmatmul.mubr.bf16.vlgmr.msra.gmra.mrb[0].mxu0 %v10501_v56  ;;  %v10549_v56 = vld [vmem:[#allocation3 + $0x254] ss:$36 sps:$4 sm:$0xff]  }
 0x166   :  { %7257 = vmatpush1.bf16.msra.mxu0 %v899_v3  ;;  %6751 = vmatprep.mubr.bf16.mxu0 %v10507_v33  ;;  %v1042_v33 = vsel %vm1035_vm6, %v1028_v62, %v1030_v60  ;;  %v1032_v3 = vpop.permute.xlu0 %1031 }
 0x167   :  { %7258 = vmatprep.subr.bf16.mxu0 %v11280_v0 }
 0x169   :  { %5782 = vmatmul.mubr.bf16.gmra.mrb[64].mxu1 %v10506_v43  ;;  %v10552_v43 = vld [vmem:[#allocation3 + $0x6c4] ss:$36 sps:$4 sm:$0xff]  }
 0x16a   :  { %5789 = vmatprep.mubr.bf16.mxu1 %v10510_v47  ;;  %7259 = vmatpush1.bf16.msra.mxu0 %v900_v4  ;;  %v1043_v47 = vsel %vm1035_vm6, %v1032_v3, %v1034_v63  ;;  %v10551_v4 = vld [vmem:[#allocation3 + $0x250] ss:$36 sps:$4 sm:$0xff]   ;;  %v10605_v63 = vld [vmem:[#allocation3 + $0x4d8] ss:$36 sps:$4 sm:$0xff]   ;;  %v10609_v3 = vld [vmem:[#allocation3 + $0x524] ss:$36 sps:$4 sm:$0xff]  }
 0x16b   :  { %7260 = vmatprep.subr.bf16.mxu0 %v11280_v0 }
 0x16d   :  { %6752 = vmatmul.mubr.bf16.gmra.mrb[4].mxu0 %v10509_v7  ;;  %v10558_v7 = vld [vmem:[#allocation3 + $0x70c] ss:$36 sps:$4 sm:$0xff]  }
 0x16e   :  { %6759 = vmatprep.mubr.bf16.mxu0 %v10513_v46  ;;  %7261 = vmatpush1.bf16.msra.mxu0 %v901_v53  ;;  %v10557_v46 = vld [vmem:[#allocation3 + $0x298] ss:$36 sps:$4 sm:$0xff]   ;;  %v10561_v53 = vld [vmem:[#allocation3 + $0x2e4] ss:$36 sps:$4 sm:$0xff]  }
 0x16f   :  { %7262 = vmatprep.subr.bf16.mxu0 %v11280_v0 }
 0x171   :  { %5790 = vmatmul.mubr.bf16.gmra.mrb[68].mxu1 %v10512_v58  ;;  %v10560_v58 = vld [vmem:[#allocation3 + $0x708] ss:$36 sps:$4 sm:$0xff]  }
 0x172   :  { %5797 = vmatprep.mubr.bf16.mxu1 %v10516_v8  ;;  %7263 = vmatpush1.bf16.msra.mxu0 %v902_v61  ;;  %v10564_v8 = vld [vmem:[#allocation3 + $0x754] ss:$36 sps:$4 sm:$0xff]   ;;  %v10570_v61 = vld [vmem:[#allocation3 + $0x79c] ss:$36 sps:$4 sm:$0xff]  }
 0x173   :  { %7264 = vmatprep.subr.bf16.mxu0 %v11280_v0 }
 0x175   :  { %6760 = vmatmul.mubr.bf16.gmra.mrb[8].mxu0 %v10515_v1  ;;  %v10569_v1 = vld [vmem:[#allocation3 + $0x328] ss:$36 sps:$4 sm:$0xff]  }
 0x176   :  { %6767 = vmatprep.mubr.bf16.mxu0 %v10519_v12  ;;  %7265 = vmatpush1.bf16.msra.mxu0 %v903_v13  ;;  %v10573_v12 = vld [vmem:[#allocation3 + $0x374] ss:$36 sps:$4 sm:$0xff]  }
 0x177   :  { %7266 = vmatprep.subr.bf16.mxu0 %v11280_v0 }
 0x179   :  { %5798 = vmatmul.mubr.bf16.gmra.mrb[72].mxu1 %v10518_v9 }
 0x17a   :  { %5805 = vmatprep.mubr.bf16.mxu1 %v10522_v14  ;;  %7267 = vmatpush1.bf16.msra.mxu0 %v904_v16  ;;  %v10576_v14 = vld [vmem:[#allocation3 + $0x7e4] ss:$36 sps:$4 sm:$0xff]  }
 0x17b   :  { %7268 = vmatprep.subr.bf16.mxu0 %v11280_v0 }
 0x17d   :  { %6768 = vmatmul.mubr.bf16.gmra.mrb[12].mxu0 %v10521_v55  ;;  %v10575_v55 = vld [vmem:[#allocation3 + $0x370] ss:$36 sps:$4 sm:$0xff]  }
 0x17e   :  { %6775 = vmatprep.mubr.bf16.mxu0 %v10525_v18  ;;  %7269 = vmatpush1.bf16.msra.mxu0 %v905_v19  ;;  %v10578_v19 = vld [vmem:[#allocation3 + $0x7e0] ss:$36 sps:$4 sm:$0xff]  }
 0x17f   :  { %7270 = vmatprep.subr.bf16.mxu0 %v11280_v0 }
 0x181   :  { %5806 = vmatmul.mubr.bf16.gmra.mrb[76].mxu1 %v10524_v59 }
 0x182   :  { %5813 = vmatprep.mubr.bf16.mxu1 %v10528_v20  ;;  %7271 = vmatpush1.bf16.msra.mxu0 %v906_v21  ;;  %v10582_v20 = vld [vmem:[#allocation3 + $0x82c] ss:$36 sps:$4 sm:$0xff]  }
 0x183   :  { %7272 = vmatprep.subr.bf16.mxu0 %v11280_v0 }
 0x185   :  { %6776 = vmatmul.mubr.bf16.gmra.mrb[16].mxu0 %v10527_v24 }
 0x186   :  { %6783 = vmatprep.mubr.bf16.mxu0 %v10531_v5  ;;  %7273 = vmatpush1.bf16.msra.mxu0 %v1036_v26  ;;  %v10584_v26 = vld [vmem:[#allocation3 + $0x828] ss:$36 sps:$4 sm:$0xff]  }
 0x187   :  { %7274 = vmatprep.subr.bf16.mxu0 %v11280_v0 }
 0x189   :  { %5814 = vmatmul.mubr.bf16.gmra.mrb[80].mxu1 %v10530_v27 }
 0x18a   :  { %5821 = vmatprep.mubr.bf16.mxu1 %v10534_v29  ;;  %7275 = vmatpush1.bf16.msra.mxu0 %v1037_v30  ;;  %v10587_v29 = vld [vmem:[#allocation3 + $0x400] ss:$36 sps:$4 sm:$0xff]   ;;  %v10591_v30 = vld [vmem:[#allocation3 + $0x44c] ss:$36 sps:$4 sm:$0xff]  }
 0x18b   :  { %7276 = vmatprep.subr.bf16.mxu0 %v11280_v0 }
 0x18d   :  { %6784 = vmatmul.mubr.bf16.gmra.mrb[20].mxu0 %v10533_v32 }
 0x18e   :  { %6791 = vmatprep.mubr.bf16.mxu0 %v10537_v15  ;;  %7277 = vmatpush1.bf16.msra.mxu0 %v1038_v35  ;;  %v10590_v35 = vld [vmem:[#allocation3 + $0x870] ss:$36 sps:$4 sm:$0xff]  }
 0x18f   :  { %7278 = vmatprep.subr.bf16.mxu0 %v11280_v0 }
 0x191   :  { %5822 = vmatmul.mubr.bf16.gmra.mrb[84].mxu1 %v10536_v38 }
 0x192   :  { %5829 = vmatprep.mubr.bf16.mxu1 %v10540_v41  ;;  %7279 = vmatpush1.bf16.msra.mxu0 %v1039_v44  ;;  %v10593_v41 = vld [vmem:[#allocation3 + $0x448] ss:$36 sps:$4 sm:$0xff]   ;;  %v10597_v44 = vld [vmem:[#allocation3 + $0x494] ss:$36 sps:$4 sm:$0xff]  }
 0x193   :  { %7280 = vmatprep.subr.bf16.mxu0 %v11280_v0 }
 0x195   :  { %6792 = vmatmul.mubr.bf16.gmra.mrb[24].mxu0 %v10539_v25 }
 0x196   :  { %6799 = vmatprep.mubr.bf16.mxu0 %v10543_v50  ;;  %7281 = vmatpush1.bf16.msra.mxu0 %v1040_v37  ;;  %v10600_v37 = vld [vmem:[#allocation3 + $0x904] ss:$36 sps:$4 sm:$0xff]  }
 0x197   :  { %7282 = vmatprep.subr.bf16.mxu0 %v11280_v0 }
 0x199   :  { %5830 = vmatmul.mubr.bf16.gmra.mrb[88].mxu1 %v10542_v39 }
 0x19a   :  { %5837 = vmatprep.mubr.bf16.mxu1 %v10546_v54  ;;  %7283 = vmatpush1.bf16.msra.mxu0 %v1041_v57  ;;  %v10599_v54 = vld [vmem:[#allocation3 + $0x490] ss:$36 sps:$4 sm:$0xff]   ;;  %v10603_v57 = vld [vmem:[#allocation3 + $0x4dc] ss:$36 sps:$4 sm:$0xff]  }
 0x19b   :  { %7284 = vmatprep.subr.bf16.mxu0 %v11280_v0 }
 0x19d   :  { %6800 = vmatmul.mubr.bf16.gmra.mrb[28].mxu0 %v10545_v40  ;;  %v10602_v40 = vld [vmem:[#allocation3 + $0x900] ss:$36 sps:$4 sm:$0xff]  }
 0x19e   :  { %6807 = vmatprep.mubr.bf16.mxu0 %v10549_v56  ;;  %7285 = vmatpush1.bf16.msra.mxu0 %v1042_v33  ;;  %v10606_v33 = vld [vmem:[#allocation3 + $0x94c] ss:$36 sps:$4 sm:$0xff]  }
 0x19f   :  { %7286 = vmatprep.subr.bf16.mxu0 %v11280_v0  ;;  %v10567_v0 = vld [vmem:[#allocation3 + $0x32c] ss:$36 sps:$4 sm:$0xff]  }
 0x1a1   :  { %5838 = vmatmul.mubr.bf16.gmra.mrb[92].mxu1 %v10548_v42 }
 0x1a2   :  { %5845 = vmatprep.mubr.bf16.mxu1 %v10552_v43  ;;  %7287 = vmatpush1.bf16.msra.mxu0 %v1043_v47 }
 0x1a5   :  { %6808 = vmatmul.mubr.bf16.gmra.mrb[32].mxu0 %v10551_v4  ;;  %v10608_v4 = vld [vmem:[#allocation3 + $0x948] ss:$36 sps:$4 sm:$0xff]  }
 0x1a6   :  { %6815 = vmatprep.mubr.bf16.mxu0 %v10555_v51 }
 0x1a9   :  { %5846 = vmatmul.mubr.bf16.gmra.mrb[96].mxu1 %v10554_v6  ;;  %v10612_v6 = vld [vmem:[#allocation3 + $0x994] ss:$36 sps:$4 sm:$0xff]  }
 0x1aa   :  { %5853 = vmatprep.mubr.bf16.mxu1 %v10558_v7 }
 0x1ad   :  { %6816 = vmatmul.mubr.bf16.gmra.mrb[36].mxu0 %v10557_v46  ;;  %v10611_v46 = vld [vmem:[#allocation3 + $0x520] ss:$36 sps:$4 sm:$0xff]  }
 0x1ae   :  { %6823 = vmatprep.mubr.bf16.mxu0 %v10561_v53  ;;  %v10615_v53 = vld [vmem:[#allocation3 + $0x56c] ss:$36 sps:$4 sm:$0xff]  }
 0x1b1   :  { %5854 = vmatmul.mubr.bf16.gmra.mrb[100].mxu1 %v10560_v58 }
 0x1b2   :  { %5861 = vmatprep.mubr.bf16.mxu1 %v10564_v8 }
 0x1b5   :  { %6824 = vmatmul.mubr.bf16.gmra.mrb[40].mxu0 %v10563_v10  ;;  %v10614_v10 = vld [vmem:[#allocation3 + $0x990] ss:$36 sps:$4 sm:$0xff]  }
 0x1b6   :  { %6831 = vmatprep.mubr.bf16.mxu0 %v10567_v0 }
 0x1b9   :  { %5862 = vmatmul.mubr.bf16.gmra.mrb[104].mxu1 %v10566_v49  ;;  %v10618_v49 = vld [vmem:[#allocation3 + $0x9dc] ss:$36 sps:$4 sm:$0xff]  }
 0x1ba   :  { %5869 = vmatprep.mubr.bf16.mxu1 %v10570_v61 }
 0x1bb   :  { %v12075_v13 = vpop.f32.mrb[0].mxu1 }
 0x1bc   :  { %v5657_v52 = vpop.f32.mrb[1].mxu1 }
 0x1bd   :  { %6832 = vmatmul.mubr.bf16.gmra.mrb[44].mxu0 %v10569_v1  ;;  %v12077_v9 = vpop.f32.mrb[2].mxu1  ;;  %v10617_v1 = vld [vmem:[#allocation3 + $0x568] ss:$36 sps:$4 sm:$0xff]  }
 0x1be   :  { %6839 = vmatprep.mubr.bf16.mxu0 %v10573_v12  ;;  %v5660_v16 = vpop.f32.mrb[3].mxu1  ;;  %v10621_v12 = vld [vmem:[#allocation3 + $0x5b4] ss:$36 sps:$4 sm:$0xff]  }
 0x1c1   :  { %5870 = vmatmul.mubr.bf16.gmra.mrb[108].mxu1 %v10572_v2 }
 0x1c2   :  { %5877 = vmatprep.mubr.bf16.mxu1 %v10576_v14  ;;  %v10620_v14 = vld [vmem:[#allocation3 + $0x9d8] ss:$36 sps:$4 sm:$0xff]  }
 0x1c3   :  { %v12079_v17 = vpop.f32.mrb[4].mxu1 }
 0x1c4   :  { %v5665_v18 = vpop.f32.mrb[5].mxu1 }
 0x1c5   :  { %6840 = vmatmul.mubr.bf16.gmra.mrb[48].mxu0 %v10575_v55  ;;  %v12081_v59 = vpop.f32.mrb[6].mxu1  ;;  %v10624_v55 = vld [vmem:[#allocation3 + $0xa24] ss:$36 sps:$4 sm:$0xff]   ;;  %v10623_v18 = vld [vmem:[#allocation3 + $0x5b0] ss:$36 sps:$4 sm:$0xff]  }
 0x1c6   :  { %6847 = vmatprep.mubr.bf16.mxu0 %v10579_v11  ;;  %v5668_v21 = vpop.f32.mrb[7].mxu1 }
 0x1c9   :  { %5878 = vmatmul.mubr.bf16.gmra.mrb[112].mxu1 %v10578_v19  ;;  %v10627_v19 = vld [vmem:[#allocation3 + $0x5fc] ss:$36 sps:$4 sm:$0xff]  }
 0x1ca   :  { %5885 = vmatprep.mubr.bf16.mxu1 %v10582_v20 }
 0x1cc   :  { %v12083_v24 = vpop.f32.mrb[8].mxu1 }
 0x1cd   :  { %v5673_v5 = vpop.f32.mrb[9].mxu1  ;;  %6848 = vmatmul.mubr.bf16.gmra.mrb[52].mxu0 %v10581_v22  ;;  %v10626_v22 = vld [vmem:[#allocation3 + $0xa20] ss:$36 sps:$4 sm:$0xff]  }
 0x1ce   :  { %v12085_v27 = vpop.f32.mrb[10].mxu1  ;;  %6855 = vmatprep.mubr.bf16.mxu0 %v10585_v23  ;;  %v10630_v5 = vld [vmem:[#allocation3 + $0xa6c] ss:$36 sps:$4 sm:$0xff]  }
 0x1cf   :  { %v5676_v28 = vpop.f32.mrb[11].mxu1 }
 0x1d0   :  { %v10633_v28 = vld [vmem:[#allocation3 + $0x644] ss:$36 sps:$4 sm:$0xff]  }
 0x1d1   :  { %5886 = vmatmul.mubr.bf16.gmra.mrb[116].mxu1 %v10584_v26 }
 0x1d2   :  { %5893 = vmatprep.mubr.bf16.mxu1 %v10588_v31  ;;  %v10629_v31 = vld [vmem:[#allocation3 + $0x5f8] ss:$36 sps:$4 sm:$0xff]  }
 0x1d4   :  { %v12087_v32 = vpop.f32.mrb[12].mxu1 }
 0x1d5   :  { %v5681_v15 = vpop.f32.mrb[13].mxu1  ;;  %6856 = vmatmul.mubr.bf16.gmra.mrb[56].mxu0 %v10587_v29 }
 0x1d6   :  { %v12089_v36 = vpop.f32.mrb[14].mxu1  ;;  %6863 = vmatprep.mubr.bf16.mxu0 %v10591_v30  ;;  %v10632_v15 = vld [vmem:[#allocation3 + $0xa68] ss:$36 sps:$4 sm:$0xff]  }
 0x1d7   :  { %v5684_v38 = vpop.f32.mrb[15].mxu1 }
 0x1d9   :  { %5894 = vmatmul.mubr.bf16.gmra.mrb[120].mxu1 %v10590_v35 }
 0x1da   :  { %5901 = vmatprep.mubr.bf16.mxu1 %v10594_v34  ;;  %v10636_v34 = vld [vmem:[#allocation3 + $0xab4] ss:$36 sps:$4 sm:$0xff]  }
 0x1dc   :  { %v12091_v25 = vpop.f32.mrb[16].mxu1 }
 0x1dd   :  { %v5689_v45 = vpop.f32.mrb[17].mxu1  ;;  %6864 = vmatmul.mubr.bf16.gmra.mrb[60].mxu0 %v10593_v41  ;;  %v10635_v41 = vld [vmem:[#allocation3 + $0x640] ss:$36 sps:$4 sm:$0xff]  }
 0x1de   :  { %v12093_v50 = vpop.f32.mrb[18].mxu1  ;;  %6871 = vmatprep.mubr.bf16.mxu0 %v10597_v44  ;;  %v10639_v44 = vld [vmem:[#allocation3 + $0x68c] ss:$36 sps:$4 sm:$0xff]  }
 0x1df   :  { %v5692_v39 = vpop.f32.mrb[19].mxu1 }
 0x1e1   :  { %5902 = vmatmul.mubr.bf16.gmra.mrb[124].mxu1 %v10596_v48 }
 0x1e2   :  { %5909 = vmatprep.mubr.bf16.mxu1 %v10600_v37  ;;  %v10638_v37 = vld [vmem:[#allocation3 + $0xab0] ss:$36 sps:$4 sm:$0xff]  }
 0x1e4   :  { %v12095_v60 = vpop.f32.mrb[20].mxu1 }
 0x1e5   :  { %v5697_v62 = vpop.f32.mrb[21].mxu1  ;;  %6872 = vmatmul.mubr.bf16.gmra.mrb[64].mxu0 %v10599_v54  ;;  %v10642_v54 = vld [vmem:[#allocation3 + $0xafc] ss:$36 sps:$4 sm:$0xff]  }
 0x1e6   :  { %v12097_v56 = vpop.f32.mrb[22].mxu1  ;;  %6879 = vmatprep.mubr.bf16.mxu0 %v10603_v57  ;;  %v10641_v62 = vld [vmem:[#allocation3 + $0x688] ss:$36 sps:$4 sm:$0xff]  }
 0x1e7   :  { %v5700_v42 = vpop.f32.mrb[23].mxu1 }
 0x1e9   :  { %5910 = vmatmul.mubr.bf16.gmra.mrb[128].mxu1 %v10602_v40  ;;  %v10645_v40 = vld [vmem:[#allocation3 + $0x6d4] ss:$36 sps:$4 sm:$0xff]  }
 0x1ea   :  { %5917 = vmatprep.mubr.bf16.mxu1 %v10606_v33 }
 0x1ec   :  { %v12099_v43 = vpop.f32.mrb[24].mxu1 }
 0x1ed   :  { %v5705_v47 = vpop.f32.mrb[25].mxu1  ;;  %6880 = vmatmul.mubr.bf16.gmra.mrb[68].mxu0 %v10605_v63  ;;  %v10644_v63 = vld [vmem:[#allocation3 + $0xaf8] ss:$36 sps:$4 sm:$0xff]  }
 0x1ee   :  { %v12101_v51 = vpop.f32.mrb[26].mxu1  ;;  %6887 = vmatprep.mubr.bf16.mxu0 %v10609_v3  ;;  %v10648_v47 = vld [vmem:[#allocation3 + $0xb44] ss:$36 sps:$4 sm:$0xff]  }
 0x1ef   :  { %v5708_v7 = vpop.f32.mrb[27].mxu1 }
 0x1f0   :  { %v10651_v7 = vld [vmem:[#allocation3 + $0x71c] ss:$36 sps:$4 sm:$0xff]  }
 0x1f1   :  { %5918 = vmatmul.mubr.bf16.gmra.mrb[132].mxu1 %v10608_v4 }
 0x1f2   :  { %5925 = vmatprep.mubr.bf16.mxu1 %v10612_v6  ;;  %v10647_v6 = vld [vmem:[#allocation3 + $0x6d0] ss:$36 sps:$4 sm:$0xff]  }
 0x1f4   :  { %v12103_v58 = vpop.f32.mrb[28].mxu1 }
 0x1f5   :  { %v5713_v8 = vpop.f32.mrb[29].mxu1  ;;  %6888 = vmatmul.mubr.bf16.gmra.mrb[72].mxu0 %v10611_v46 }
 0x1f6   :  { %v12105_v0 = vpop.f32.mrb[30].mxu1  ;;  %6895 = vmatprep.mubr.bf16.mxu0 %v10615_v53  ;;  %v10650_v8 = vld [vmem:[#allocation3 + $0xb40] ss:$36 sps:$4 sm:$0xff]  }
 0x1f7   :  { %v5716_v61 = vpop.f32.mrb[31].mxu1 }
 0x1f9   :  { %5926 = vmatmul.mubr.bf16.gmra.mrb[136].mxu1 %v10614_v10 }
 0x1fa   :  { %5933 = vmatprep.mubr.bf16.mxu1 %v10618_v49  ;;  %v10654_v49 = vld [vmem:[#allocation3 + $0xb8c] ss:$36 sps:$4 sm:$0xff]  }
 0x1fc   :  { %v12107_v52 = vpop.f32.mrb[32].mxu1 }
 0x1fd   :  { %v5721_v2 = vpop.f32.mrb[33].mxu1  ;;  %6896 = vmatmul.mubr.bf16.gmra.mrb[76].mxu0 %v10617_v1  ;;  %v10653_v1 = vld [vmem:[#allocation3 + $0x718] ss:$36 sps:$4 sm:$0xff]  }
 0x1fe   :  { %v12109_v16 = vpop.f32.mrb[34].mxu1  ;;  %6903 = vmatprep.mubr.bf16.mxu0 %v10621_v12  ;;  %v10657_v12 = vld [vmem:[#allocation3 + $0x764] ss:$36 sps:$4 sm:$0xff]  }
 0x1ff   :  { %v5724_v11 = vpop.f32.mrb[35].mxu1 }
 0x201   :  { %5934 = vmatmul.mubr.bf16.gmra.mrb[140].mxu1 %v10620_v14 }
 0x202   :  { %5941 = vmatprep.mubr.bf16.mxu1 %v10624_v55  ;;  %v10656_v55 = vld [vmem:[#allocation3 + $0xb88] ss:$36 sps:$4 sm:$0xff]  }
 0x204   :  { %v12111_v20 = vpop.f32.mrb[36].mxu1 }
 0x205   :  { %v5729_v21 = vpop.f32.mrb[37].mxu1  ;;  %6904 = vmatmul.mubr.bf16.gmra.mrb[80].mxu0 %v10623_v18  ;;  %v10660_v18 = vld [vmem:[#allocation3 + $0xbd4] ss:$36 sps:$4 sm:$0xff]  }
 0x206   :  { %v12113_v23 = vpop.f32.mrb[38].mxu1  ;;  %6911 = vmatprep.mubr.bf16.mxu0 %v10627_v19  ;;  %v10659_v21 = vld [vmem:[#allocation3 + $0x760] ss:$36 sps:$4 sm:$0xff]  }
 0x207   :  { %v5732_v26 = vpop.f32.mrb[39].mxu1 }
 0x209   :  { %5942 = vmatmul.mubr.bf16.gmra.mrb[144].mxu1 %v10626_v22  ;;  %v10663_v22 = vld [vmem:[#allocation3 + $0x7ac] ss:$36 sps:$4 sm:$0xff]  }
 0x20a   :  { %5949 = vmatprep.mubr.bf16.mxu1 %v10630_v5 }
 0x20c   :  { %v12115_v29 = vpop.f32.mrb[40].mxu1 }
 0x20d   :  { %v5737_v30 = vpop.f32.mrb[41].mxu1  ;;  %6912 = vmatmul.mubr.bf16.gmra.mrb[84].mxu0 %v10629_v31  ;;  %v10662_v31 = vld [vmem:[#allocation3 + $0xbd0] ss:$36 sps:$4 sm:$0xff]  }
 0x20e   :  { %v12117_v35 = vpop.f32.mrb[42].mxu1  ;;  %6919 = vmatprep.mubr.bf16.mxu0 %v10633_v28  ;;  %v10666_v30 = vld [vmem:[#allocation3 + $0xc1c] ss:$36 sps:$4 sm:$0xff]  }
 0x20f   :  { %v5740_v38 = vpop.f32.mrb[43].mxu1 }
 0x210   :  { %v10669_v38 = vld [vmem:[#allocation3 + $0x7f4] ss:$36 sps:$4 sm:$0xff]  }
 0x211   :  { %5950 = vmatmul.mubr.bf16.gmra.mrb[148].mxu1 %v10632_v15 }
 0x212   :  { %5957 = vmatprep.mubr.bf16.mxu1 %v10636_v34  ;;  %v10665_v34 = vld [vmem:[#allocation3 + $0x7a8] ss:$36 sps:$4 sm:$0xff]  }
 0x214   :  { %v12119_v45 = vpop.f32.mrb[44].mxu1 }
 0x215   :  { %v5745_v48 = vpop.f32.mrb[45].mxu1  ;;  %6920 = vmatmul.mubr.bf16.gmra.mrb[88].mxu0 %v10635_v41  ;;  %v10668_v41 = vld [vmem:[#allocation3 + $0xc18] ss:$36 sps:$4 sm:$0xff]  }
 0x216   :  { %v12121_v39 = vpop.f32.mrb[46].mxu1  ;;  %6927 = vmatprep.mubr.bf16.mxu0 %v10639_v44  ;;  %v10672_v44 = vld [vmem:[#allocation3 + $0xc64] ss:$36 sps:$4 sm:$0xff]   ;;  %v10671_v48 = vld [vmem:[#allocation3 + $0x7f0] ss:$36 sps:$4 sm:$0xff]  }
 0x217   :  { %v5748_v57 = vpop.f32.mrb[47].mxu1 }
 0x218   :  { %v10678_v57 = vld [vmem:[#allocation3 + $0xcac] ss:$36 sps:$4 sm:$0xff]  }
 0x219   :  { %5958 = vmatmul.mubr.bf16.gmra.mrb[152].mxu1 %v10638_v37  ;;  %v10675_v37 = vld [vmem:[#allocation3 + $0x83c] ss:$36 sps:$4 sm:$0xff]  }
 0x21a   :  { %5965 = vmatprep.mubr.bf16.mxu1 %v10642_v54  ;;  %v10674_v54 = vld [vmem:[#allocation3 + $0xc60] ss:$36 sps:$4 sm:$0xff]  }
 0x21c   :  { %v12123_v33 = vpop.f32.mrb[48].mxu1 }
 0x21d   :  { %13603 = vst [vmem:[#allocation6_spill] sm:$0xff] %v12123_v33  ;;  %v5753_v42 = vpop.f32.mrb[49].mxu1  ;;  %6928 = vmatmul.mubr.bf16.gmra.mrb[92].mxu0 %v10641_v62  ;;  %v10677_v62 = vld [vmem:[#allocation3 + $0x838] ss:$36 sps:$4 sm:$0xff]  }
 0x21e   :  { %v12125_v3 = vpop.f32.mrb[50].mxu1  ;;  %6935 = vmatprep.mubr.bf16.mxu0 %v10645_v40  ;;  %v10681_v40 = vld [vmem:[#allocation3 + $0x884] ss:$36 sps:$4 sm:$0xff]  }
 0x21f   :  { %13604 = vst [vmem:[#allocation7_spill] sm:$0xff] %v12125_v3  ;;  %v5756_v4 = vpop.f32.mrb[51].mxu1  ;;  %v10680_v42 = vld [vmem:[#allocation3 + $0xca8] ss:$36 sps:$4 sm:$0xff]  }
 0x220   :  { %v10687_v4 = vld [vmem:[#allocation3 + $0x8cc] ss:$36 sps:$4 sm:$0xff]  }
 0x221   :  { %5966 = vmatmul.mubr.bf16.gmra.mrb[156].mxu1 %v10644_v63  ;;  %v10684_v63 = vld [vmem:[#allocation3 + $0xcf4] ss:$36 sps:$4 sm:$0xff]  }
 0x222   :  { %5973 = vmatprep.mubr.bf16.mxu1 %v10648_v47  ;;  %v10683_v47 = vld [vmem:[#allocation3 + $0x880] ss:$36 sps:$4 sm:$0xff]  }
 0x224   :  { %v12127_v46 = vpop.f32.mrb[52].mxu1 }
 0x225   :  { %13605 = vst [vmem:[#allocation8_spill] sm:$0xff] %v12127_v46  ;;  %v5761_v53 = vpop.f32.mrb[53].mxu1  ;;  %6936 = vmatmul.mubr.bf16.gmra.mrb[96].mxu0 %v10647_v6  ;;  %v10686_v6 = vld [vmem:[#allocation3 + $0xcf0] ss:$36 sps:$4 sm:$0xff]  }
 0x226   :  { %v12129_v10 = vpop.f32.mrb[54].mxu1  ;;  %6943 = vmatprep.mubr.bf16.mxu0 %v10651_v7  ;;  %v10690_v7 = vld [vmem:[#allocation3 + $0xd3c] ss:$36 sps:$4 sm:$0xff]   ;;  %v10689_v53 = vld [vmem:[#allocation3 + $0x8c8] ss:$36 sps:$4 sm:$0xff]  }
 0x227   :  { %13606 = vst [vmem:[#allocation9_spill] sm:$0xff] %v12129_v10  ;;  %v5764_v61 = vpop.f32.mrb[55].mxu1  ;;  %v11041_v10 = vld [vmem:[#allocation3 + $0x76c] ss:$36 sps:$4 sm:$0xff]  }
 0x228   :  { %v10696_v61 = vld [vmem:[#allocation3 + $0xd84] ss:$36 sps:$4 sm:$0xff]  }
 0x229   :  { %5974 = vmatmul.mubr.bf16.gmra.mrb[160].mxu1 %v10650_v8  ;;  %v10693_v8 = vld [vmem:[#allocation3 + $0x914] ss:$36 sps:$4 sm:$0xff]  }
 0x22a   :  { %5981 = vmatprep.mubr.bf16.mxu1 %v10654_v49  ;;  %v10692_v49 = vld [vmem:[#allocation3 + $0xd38] ss:$36 sps:$4 sm:$0xff]  }
 0x22c   :  { %v12131_v2 = vpop.f32.mrb[56].mxu1 }
 0x22d   :  { %13607 = vst [vmem:[#allocation10_spill] sm:$0xff] %v12131_v2  ;;  %v5769_v14 = vpop.f32.mrb[57].mxu1  ;;  %6944 = vmatmul.mubr.bf16.gmra.mrb[100].mxu0 %v10653_v1  ;;  %v10695_v1 = vld [vmem:[#allocation3 + $0x910] ss:$36 sps:$4 sm:$0xff]  }
 0x22e   :  { %v12133_v11 = vpop.f32.mrb[58].mxu1  ;;  %6951 = vmatprep.mubr.bf16.mxu0 %v10657_v12  ;;  %v10699_v12 = vld [vmem:[#allocation3 + $0x95c] ss:$36 sps:$4 sm:$0xff]  }
 0x22f   :  { %13608 = vst [vmem:[#allocation11_spill] sm:$0xff] %v12133_v11  ;;  %v5772_v19 = vpop.f32.mrb[59].mxu1  ;;  %v10698_v14 = vld [vmem:[#allocation3 + $0xd80] ss:$36 sps:$4 sm:$0xff]  }
 0x230   :  { %v1141_v19 = vpop.permute.xlu0 %1140  ;;  %v11035_v11 = vld [vmem:[#allocation3 + $0x724] ss:$36 sps:$4 sm:$0xff]  }
 0x231   :  { %5982 = vmatmul.mubr.bf16.gmra.mrb[164].mxu1 %v10656_v55  ;;  %v10702_v55 = vld [vmem:[#allocation3 + $0xdcc] ss:$36 sps:$4 sm:$0xff]  }
 0x232   :  { %5989 = vmatprep.mubr.bf16.mxu1 %v10660_v18  ;;  %v1143_v18 = vpop.permute.xlu1 %1142 }
 0x234   :  { %v12135_v5 = vpop.f32.mrb[60].mxu1 }
 0x235   :  { %13609 = vst [vmem:[#allocation12_spill] sm:$0xff] %v12135_v5  ;;  %v5777_v26 = vpop.f32.mrb[61].mxu1  ;;  %6952 = vmatmul.mubr.bf16.gmra.mrb[104].mxu0 %v10659_v21  ;;  %v10701_v21 = vld [vmem:[#allocation3 + $0x958] ss:$36 sps:$4 sm:$0xff]  }
 0x236   :  { %v12137_v28 = vpop.f32.mrb[62].mxu1  ;;  %6959 = vmatprep.mubr.bf16.mxu0 %v10663_v22  ;;  %v10705_v22 = vld [vmem:[#allocation3 + $0x9a4] ss:$36 sps:$4 sm:$0xff]   ;;  %v12140_v26 = vsel %vm1172_vm7, %v1141_v19, %v1143_v18  ;;  %v10747_v18 = vld [vmem:[#allocation3 + $0xb9c] ss:$36 sps:$4 sm:$0xff]  }
 0x237   :  { %13610 = vst [vmem:[#allocation13_spill] sm:$0xff] %v12137_v28  ;;  %v5780_v15 = vpop.f32.mrb[63].mxu1  ;;  %9391 = vmatprep.subr.bf16.mxu1 %v12140_v26  ;;  %v10746_v19 = vld [vmem:[#allocation3 + $0xfc0] ss:$36 sps:$4 sm:$0xff]  }
 0x238   :  { %v10707_v15 = vld [vmem:[#allocation3 + $0x9a0] ss:$36 sps:$4 sm:$0xff]  }
 0x239   :  { %5990 = vmatmul.mubr.bf16.gmra.mrb[168].mxu1 %v10662_v31  ;;  %v10704_v31 = vld [vmem:[#allocation3 + $0xdc8] ss:$36 sps:$4 sm:$0xff]   ;;  %v11029_v28 = vld [vmem:[#allocation3 + $0x6dc] ss:$36 sps:$4 sm:$0xff]  }
 0x23a   :  { %5997 = vmatprep.mubr.bf16.mxu1 %v10666_v30  ;;  %v10708_v30 = vld [vmem:[#allocation3 + $0xe14] ss:$36 sps:$4 sm:$0xff]  }
 0x23d   :  { %6960 = vmatmul.mubr.bf16.gmra.mrb[108].mxu0 %v10665_v34  ;;  %v10711_v34 = vld [vmem:[#allocation3 + $0x9ec] ss:$36 sps:$4 sm:$0xff]  }
 0x23e   :  { %6967 = vmatprep.mubr.bf16.mxu0 %v10669_v38  ;;  %v10710_v38 = vld [vmem:[#allocation3 + $0xe10] ss:$36 sps:$4 sm:$0xff]  }
 0x241   :  { %5998 = vmatmul.mubr.bf16.gmra.mrb[172].mxu1 %v10668_v41  ;;  %v10714_v41 = vld [vmem:[#allocation3 + $0xe5c] ss:$36 sps:$4 sm:$0xff]  }
 0x242   :  { %6005 = vmatprep.mubr.bf16.mxu1 %v10672_v44  ;;  %v10713_v44 = vld [vmem:[#allocation3 + $0x9e8] ss:$36 sps:$4 sm:$0xff]  }
 0x245   :  { %6968 = vmatmul.mubr.bf16.gmra.mrb[112].mxu0 %v10671_v48  ;;  %v10717_v48 = vld [vmem:[#allocation3 + $0xa34] ss:$36 sps:$4 sm:$0xff]  }
 0x246   :  { %6975 = vmatprep.mubr.bf16.mxu0 %v10675_v37  ;;  %v10716_v37 = vld [vmem:[#allocation3 + $0xe58] ss:$36 sps:$4 sm:$0xff]  }
 0x249   :  { %6006 = vmatmul.mubr.bf16.gmra.mrb[176].mxu1 %v10674_v54  ;;  %v10720_v54 = vld [vmem:[#allocation3 + $0xea4] ss:$36 sps:$4 sm:$0xff]  }
 0x24a   :  { %6013 = vmatprep.mubr.bf16.mxu1 %v10678_v57  ;;  %v10719_v57 = vld [vmem:[#allocation3 + $0xa30] ss:$36 sps:$4 sm:$0xff]  }
 0x24d   :  { %6976 = vmatmul.mubr.bf16.gmra.mrb[116].mxu0 %v10677_v62  ;;  %v10723_v62 = vld [vmem:[#allocation3 + $0xa7c] ss:$36 sps:$4 sm:$0xff]  }
 0x24e   :  { %6983 = vmatprep.mubr.bf16.mxu0 %v10681_v40  ;;  %v10722_v40 = vld [vmem:[#allocation3 + $0xea0] ss:$36 sps:$4 sm:$0xff]  }
 0x251   :  { %6014 = vmatmul.mubr.bf16.gmra.mrb[180].mxu1 %v10680_v42  ;;  %v10726_v42 = vld [vmem:[#allocation3 + $0xeec] ss:$36 sps:$4 sm:$0xff]  }
 0x252   :  { %6021 = vmatprep.mubr.bf16.mxu1 %v10684_v63  ;;  %v10725_v63 = vld [vmem:[#allocation3 + $0xa78] ss:$36 sps:$4 sm:$0xff]  }
 0x255   :  { %6984 = vmatmul.mubr.bf16.gmra.mrb[120].mxu0 %v10683_v47  ;;  %v10729_v47 = vld [vmem:[#allocation3 + $0xac4] ss:$36 sps:$4 sm:$0xff]  }
 0x256   :  { %6991 = vmatprep.mubr.bf16.mxu0 %v10687_v4  ;;  %v10728_v4 = vld [vmem:[#allocation3 + $0xee8] ss:$36 sps:$4 sm:$0xff]  }
 0x259   :  { %6022 = vmatmul.mubr.bf16.gmra.mrb[184].mxu1 %v10686_v6  ;;  %v10732_v6 = vld [vmem:[#allocation3 + $0xf34] ss:$36 sps:$4 sm:$0xff]  }
 0x25a   :  { %6029 = vmatprep.mubr.bf16.mxu1 %v10690_v7  ;;  %v10731_v7 = vld [vmem:[#allocation3 + $0xac0] ss:$36 sps:$4 sm:$0xff]  }
 0x25d   :  { %6992 = vmatmul.mubr.bf16.gmra.mrb[124].mxu0 %v10689_v53  ;;  %v10735_v53 = vld [vmem:[#allocation3 + $0xb0c] ss:$36 sps:$4 sm:$0xff]  }
 0x25e   :  { %6999 = vmatprep.mubr.bf16.mxu0 %v10693_v8  ;;  %v10734_v8 = vld [vmem:[#allocation3 + $0xf30] ss:$36 sps:$4 sm:$0xff]  }
 0x261   :  { %6030 = vmatmul.mubr.bf16.gmra.mrb[188].mxu1 %v10692_v49  ;;  %v10738_v49 = vld [vmem:[#allocation3 + $0xf7c] ss:$36 sps:$4 sm:$0xff]  }
 0x262   :  { %6037 = vmatprep.mubr.bf16.mxu1 %v10696_v61  ;;  %v10737_v61 = vld [vmem:[#allocation3 + $0xb08] ss:$36 sps:$4 sm:$0xff]  }
 0x265   :  { %7000 = vmatmul.mubr.bf16.gmra.mrb[128].mxu0 %v10695_v1  ;;  %v10741_v1 = vld [vmem:[#allocation3 + $0xb54] ss:$36 sps:$4 sm:$0xff]  }
 0x266   :  { %7007 = vmatprep.mubr.bf16.mxu0 %v10699_v12  ;;  %v10740_v12 = vld [vmem:[#allocation3 + $0xf78] ss:$36 sps:$4 sm:$0xff]  }
 0x269   :  { %6038 = vmatmul.mubr.bf16.gmra.mrb[192].mxu1 %v10698_v14  ;;  %v10744_v14 = vld [vmem:[#allocation3 + $0xfc4] ss:$36 sps:$4 sm:$0xff]  }
 0x26a   :  { %6045 = vmatprep.mubr.bf16.mxu1 %v10702_v55  ;;  %v10743_v55 = vld [vmem:[#allocation3 + $0xb50] ss:$36 sps:$4 sm:$0xff]  }
 0x26d   :  { %7008 = vmatmul.mubr.bf16.gmra.mrb[132].mxu0 %v10701_v21  ;;  %v10750_v21 = vld [vmem:[#allocation3 + $0x100c] ss:$36 sps:$4 sm:$0xff]  }
 0x26e   :  { %7015 = vmatprep.mubr.bf16.mxu0 %v10705_v22  ;;  %v10749_v22 = vld [vmem:[#allocation3 + $0xb98] ss:$36 sps:$4 sm:$0xff]  }
 0x271   :  { %6046 = vmatmul.mubr.bf16.gmra.mrb[196].mxu1 %v10704_v31  ;;  %v10753_v31 = vld [vmem:[#allocation3 + $0xbe4] ss:$36 sps:$4 sm:$0xff]  }
 0x272   :  { %6053 = vmatprep.mubr.bf16.mxu1 %v10708_v30  ;;  %v10752_v30 = vld [vmem:[#allocation3 + $0x1008] ss:$36 sps:$4 sm:$0xff]  }
 0x275   :  { %7016 = vmatmul.mubr.bf16.gmra.mrb[136].mxu0 %v10707_v15  ;;  %v10756_v15 = vld [vmem:[#allocation3 + $0x1054] ss:$36 sps:$4 sm:$0xff]  }
 0x276   :  { %7023 = vmatprep.mubr.bf16.mxu0 %v10711_v34  ;;  %v10755_v34 = vld [vmem:[#allocation3 + $0xbe0] ss:$36 sps:$4 sm:$0xff]  }
 0x279   :  { %6054 = vmatmul.mubr.bf16.gmra.mrb[200].mxu1 %v10710_v38  ;;  %v10759_v38 = vld [vmem:[#allocation3 + $0xc2c] ss:$36 sps:$4 sm:$0xff]  }
 0x27a   :  { %6061 = vmatprep.mubr.bf16.mxu1 %v10714_v41  ;;  %v10758_v41 = vld [vmem:[#allocation3 + $0x1050] ss:$36 sps:$4 sm:$0xff]  }
 0x27d   :  { %7024 = vmatmul.mubr.bf16.gmra.mrb[140].mxu0 %v10713_v44  ;;  %v10762_v44 = vld [vmem:[#allocation3 + $0x109c] ss:$36 sps:$4 sm:$0xff]  }
 0x27e   :  { %7031 = vmatprep.mubr.bf16.mxu0 %v10717_v48  ;;  %v10761_v48 = vld [vmem:[#allocation3 + $0xc28] ss:$36 sps:$4 sm:$0xff]  }
 0x281   :  { %6062 = vmatmul.mubr.bf16.gmra.mrb[204].mxu1 %v10716_v37  ;;  %v1941_v37 = vld [vmem:[%s13601_s2 + $0x100] sm:$0xff] }
 0x282   :  { %6069 = vmatprep.mubr.bf16.mxu1 %v10720_v54  ;;  %v10765_v54 = vld [vmem:[#allocation3 + $0xc74] ss:$36 sps:$4 sm:$0xff]   ;;  %2199 = vperm.xlu1 %10348, %v1941_v37   ;;  %v10795_v37 = vld [vmem:[#allocation3 + $0xddc] ss:$36 sps:$4 sm:$0xff]  }
 0x285   :  { %7032 = vmatmul.mubr.bf16.gmra.mrb[144].mxu0 %v10719_v57  ;;  %v10764_v57 = vld [vmem:[#allocation3 + $0x1098] ss:$36 sps:$4 sm:$0xff]  }
 0x286   :  { %7039 = vmatprep.mubr.bf16.mxu0 %v10723_v62  ;;  %v1942_v62 = vld [vmem:[%s13601_s2 + $0x108] sm:$0xff] }
 0x287   :  { %2204 = vperm.xlu0 %10347, %v1942_v62   ;;  %v10792_v62 = vld [vmem:[#allocation3 + $0x488] ss:$36 sps:$4 sm:$0xff]  }
 0x289   :  { %6070 = vmatmul.mubr.bf16.gmra.mrb[208].mxu1 %v10722_v40  ;;  %v10768_v40 = vld [vmem:[#allocation3 + $0x10e4] ss:$36 sps:$4 sm:$0xff]  }
 0x28a   :  { %6077 = vmatprep.mubr.bf16.mxu1 %v10726_v42  ;;  %v10767_v42 = vld [vmem:[#allocation3 + $0xc70] ss:$36 sps:$4 sm:$0xff]  }
 0x28d   :  { %7040 = vmatmul.mubr.bf16.gmra.mrb[148].mxu0 %v10725_v63  ;;  %v1943_v63 = vld [vmem:[%s13601_s2 + $0x110] sm:$0xff] }
 0x28e   :  { %7047 = vmatprep.mubr.bf16.mxu0 %v10729_v47  ;;  %v10771_v47 = vld [vmem:[#allocation3 + $0xcbc] ss:$36 sps:$4 sm:$0xff]   ;;  %2209 = vperm.xlu1 %10348, %v1943_v63  }
 0x291   :  { %6078 = vmatmul.mubr.bf16.gmra.mrb[212].mxu1 %v10728_v4  ;;  %v10770_v4 = vld [vmem:[#allocation3 + $0x10e0] ss:$36 sps:$4 sm:$0xff]  }
 0x292   :  { %6085 = vmatprep.mubr.bf16.mxu1 %v10732_v6  ;;  %v1944_v6 = vld [vmem:[%s13601_s2 + $0x118] sm:$0xff] }
 0x293   :  { %2214 = vperm.xlu0 %10347, %v1944_v6   ;;  %v10801_v6 = vld [vmem:[#allocation3 + $0xe24] ss:$36 sps:$4 sm:$0xff]  }
 0x295   :  { %7048 = vmatmul.mubr.bf16.gmra.mrb[152].mxu0 %v10731_v7  ;;  %v10774_v7 = vld [vmem:[#allocation3 + $0x112c] ss:$36 sps:$4 sm:$0xff]  }
 0x296   :  { %7055 = vmatprep.mubr.bf16.mxu0 %v10735_v53  ;;  %v10773_v53 = vld [vmem:[#allocation3 + $0xcb8] ss:$36 sps:$4 sm:$0xff]  }
 0x299   :  { %6086 = vmatmul.mubr.bf16.gmra.mrb[216].mxu1 %v10734_v8  ;;  %v1945_v8 = vld [vmem:[%s13601_s2 + $0x120] sm:$0xff] }
 0x29a   :  { %6093 = vmatprep.mubr.bf16.mxu1 %v10738_v49  ;;  %v10777_v49 = vld [vmem:[#allocation3 + $0xd04] ss:$36 sps:$4 sm:$0xff]   ;;  %2219 = vperm.xlu1 %10348, %v1945_v8  }
 0x29d   :  { %7056 = vmatmul.mubr.bf16.gmra.mrb[156].mxu0 %v10737_v61  ;;  %v10776_v61 = vld [vmem:[#allocation3 + $0x1128] ss:$36 sps:$4 sm:$0xff]  }
 0x29e   :  { %7063 = vmatprep.mubr.bf16.mxu0 %v10741_v1  ;;  %v1946_v1 = vld [vmem:[%s13601_s2 + $0x128] sm:$0xff] }
 0x29f   :  { %2224 = vperm.xlu0 %10347, %v1946_v1   ;;  %v10804_v1 = vld [vmem:[#allocation3 + $0x51c] ss:$36 sps:$4 sm:$0xff]  }
 0x2a1   :  { %6094 = vmatmul.mubr.bf16.gmra.mrb[220].mxu1 %v10740_v12  ;;  %v10780_v12 = vld [vmem:[#allocation3 + $0x1174] ss:$36 sps:$4 sm:$0xff]  }
 0x2a2   :  { %6101 = vmatprep.mubr.bf16.mxu1 %v10744_v14  ;;  %v10779_v14 = vld [vmem:[#allocation3 + $0xd00] ss:$36 sps:$4 sm:$0xff]  }
 0x2a5   :  { %7064 = vmatmul.mubr.bf16.gmra.mrb[160].mxu0 %v10743_v55  ;;  %v1947_v55 = vld [vmem:[%s13601_s2 + $0x130] sm:$0xff] }
 0x2a6   :  { %7071 = vmatprep.mubr.bf16.mxu0 %v10747_v18  ;;  %v10783_v18 = vld [vmem:[#allocation3 + $0xd4c] ss:$36 sps:$4 sm:$0xff]   ;;  %2229 = vperm.xlu1 %10348, %v1947_v55   ;;  %v10806_v55 = vld [vmem:[#allocation3 + $0x518] ss:$36 sps:$4 sm:$0xff]  }
 0x2a9   :  { %6102 = vmatmul.mubr.bf16.gmra.mrb[224].mxu1 %v10746_v19  ;;  %v10782_v19 = vld [vmem:[#allocation3 + $0x1170] ss:$36 sps:$4 sm:$0xff]  }
 0x2aa   :  { %6109 = vmatprep.mubr.bf16.mxu1 %v10750_v21  ;;  %v1948_v21 = vld [vmem:[%s13601_s2 + $0x138] sm:$0xff] }
 0x2ab   :  { %2234 = vperm.xlu0 %10347, %v1948_v21  }
 0x2ad   :  { %7072 = vmatmul.mubr.bf16.gmra.mrb[164].mxu0 %v10749_v22  ;;  %v10786_v22 = vld [vmem:[#allocation3 + $0x11bc] ss:$36 sps:$4 sm:$0xff]  }
 0x2ae   :  { %7079 = vmatprep.mubr.bf16.mxu0 %v10753_v31  ;;  %v10785_v31 = vld [vmem:[#allocation3 + $0xd48] ss:$36 sps:$4 sm:$0xff]  }
 0x2b1   :  { %6110 = vmatmul.mubr.bf16.gmra.mrb[228].mxu1 %v10752_v30  ;;  %v1949_v30 = vld [vmem:[%s13601_s2 + $0x140] sm:$0xff] }
 0x2b2   :  { %6117 = vmatprep.mubr.bf16.mxu1 %v10756_v15  ;;  %v10789_v15 = vld [vmem:[#allocation3 + $0xd94] ss:$36 sps:$4 sm:$0xff]   ;;  %2239 = vperm.xlu1 %10348, %v1949_v30  }
 0x2b5   :  { %7080 = vmatmul.mubr.bf16.gmra.mrb[168].mxu0 %v10755_v34  ;;  %v10788_v34 = vld [vmem:[#allocation3 + $0x11b8] ss:$36 sps:$4 sm:$0xff]  }
 0x2b6   :  { %7087 = vmatprep.mubr.bf16.mxu0 %v10759_v38  ;;  %v1950_v38 = vld [vmem:[%s13601_s2 + $0x148] sm:$0xff] }
 0x2b7   :  { %2244 = vperm.xlu0 %10347, %v1950_v38   ;;  %v10812_v38 = vld [vmem:[#allocation3 + $0x560] ss:$36 sps:$4 sm:$0xff]  }
 0x2b9   :  { %6118 = vmatmul.mubr.bf16.gmra.mrb[232].mxu1 %v10758_v41  ;;  %v10794_v41 = vld [vmem:[#allocation3 + $0x48c] ss:$36 sps:$4 sm:$0xff]  }
 0x2ba   :  { %6125 = vmatprep.mubr.bf16.mxu1 %v10762_v44  ;;  %v10791_v44 = vld [vmem:[#allocation3 + $0xd90] ss:$36 sps:$4 sm:$0xff]  }
 0x2bd   :  { %7088 = vmatmul.mubr.bf16.gmra.mrb[172].mxu0 %v10761_v48  ;;  %v1951_v48 = vld [vmem:[%s13601_s2 + $0x150] sm:$0xff] }
 0x2be   :  { %7095 = vmatprep.mubr.bf16.mxu0 %v10765_v54  ;;  %2249 = vperm.xlu1 %10348, %v1951_v48   ;;  %v1147_v54 = vpop.permute.xlu1 %1146  ;;  %v10815_v48 = vld [vmem:[#allocation3 + $0xeb0] ss:$36 sps:$4 sm:$0xff]  }
 0x2c1   :  { %6126 = vmatmul.mubr.bf16.gmra.mrb[236].mxu1 %v10764_v57  ;;  %v1145_v57 = vpop.permute.xlu0 %1144 }
 0x2c2   :  { %6133 = vmatprep.mubr.bf16.mxu1 %v10768_v40  ;;  %v1952_v40 = vld [vmem:[%s13601_s2 + $0x158] sm:$0xff]  ;;  %v1174_v63 = vsel %vm1172_vm7, %v1145_v57, %v1147_v54  ;;  %v10818_v57 = vld [vmem:[#allocation3 + $0x5a8] ss:$36 sps:$4 sm:$0xff]  }
 0x2c3   :  { %2254 = vperm.xlu0 %10347, %v1952_v40   ;;  %v10819_v54 = vld [vmem:[#allocation3 + $0xefc] ss:$36 sps:$4 sm:$0xff]   ;;  %v10822_v40 = vld [vmem:[#allocation3 + $0x5f4] ss:$36 sps:$4 sm:$0xff]  }
 0x2c5   :  { %7096 = vmatmul.mubr.bf16.gmra.mrb[176].mxu0 %v10767_v42  ;;  %v10798_v42 = vld [vmem:[#allocation3 + $0x4d4] ss:$36 sps:$4 sm:$0xff]  }
 0x2c6   :  { %7103 = vmatprep.mubr.bf16.mxu0 %v10771_v47  ;;  %v10797_v47 = vld [vmem:[#allocation3 + $0xdd8] ss:$36 sps:$4 sm:$0xff]  }
 0x2c9   :  { %6134 = vmatmul.mubr.bf16.gmra.mrb[240].mxu1 %v10770_v4  ;;  %v1953_v4 = vld [vmem:[%s13601_s2 + $0x160] sm:$0xff] }
 0x2ca   :  { %6141 = vmatprep.mubr.bf16.mxu1 %v10774_v7  ;;  %v1151_v7 = vpop.permute.xlu1 %1150  ;;  %2259 = vperm.xlu1 %10348, %v1953_v4   ;;  %v10824_v4 = vld [vmem:[#allocation3 + $0x5f0] ss:$36 sps:$4 sm:$0xff]  }
 0x2cd   :  { %7104 = vmatmul.mubr.bf16.gmra.mrb[180].mxu0 %v10773_v53  ;;  %v1149_v53 = vpop.permute.xlu0 %1148 }
 0x2ce   :  { %7111 = vmatprep.mubr.bf16.mxu0 %v10777_v49  ;;  %v1175_v8 = vsel %vm1172_vm7, %v1149_v53, %v1151_v7  ;;  %v10800_v49 = vld [vmem:[#allocation3 + $0x4d0] ss:$36 sps:$4 sm:$0xff]   ;;  %v1155_v21 = vpop.permute.xlu1 %1154  ;;  %v10828_v7 = vld [vmem:[#allocation3 + $0x63c] ss:$36 sps:$4 sm:$0xff]  }
 0x2cf   :  { %v10827_v53 = vld [vmem:[#allocation3 + $0xf40] ss:$36 sps:$4 sm:$0xff]  }
 0x2d1   :  { %6142 = vmatmul.mubr.bf16.gmra.mrb[244].mxu1 %v10776_v61  ;;  %v1954_v61 = vld [vmem:[%s13601_s2 + $0x168] sm:$0xff] }
 0x2d2   :  { %6149 = vmatprep.mubr.bf16.mxu1 %v10780_v12  ;;  %2264 = vperm.xlu0 %10347, %v1954_v61   ;;  %v1955_v12 = vld [vmem:[%s13601_s2 + $0x170] sm:$0xff]  ;;  %v10830_v61 = vld [vmem:[#allocation3 + $0x638] ss:$36 sps:$4 sm:$0xff]  }
 0x2d3   :  { %2269 = vperm.xlu1 %10348, %v1955_v12   ;;  %v10833_v12 = vld [vmem:[#allocation3 + $0xf88] ss:$36 sps:$4 sm:$0xff]  }
 0x2d5   :  { %7112 = vmatmul.mubr.bf16.gmra.mrb[184].mxu0 %v10779_v14  ;;  %v10807_v14 = vld [vmem:[#allocation3 + $0xe6c] ss:$36 sps:$4 sm:$0xff]  }
 0x2d6   :  { %7119 = vmatprep.mubr.bf16.mxu0 %v10783_v18  ;;  %v1956_v18 = vld [vmem:[%s13601_s2 + $0x178] sm:$0xff] }
 0x2d7   :  { %2274 = vperm.xlu0 %10347, %v1956_v18   ;;  %v10836_v18 = vld [vmem:[#allocation3 + $0x680] ss:$36 sps:$4 sm:$0xff]  }
 0x2d9   :  { %6150 = vmatmul.mubr.bf16.gmra.mrb[248].mxu1 %v10782_v19  ;;  %v10810_v19 = vld [vmem:[#allocation3 + $0x564] ss:$36 sps:$4 sm:$0xff]  }
 0x2da   :  { %6157 = vmatprep.mubr.bf16.mxu1 %v10786_v22  ;;  %v1153_v22 = vpop.permute.xlu0 %1152 }
 0x2db   :  { %v1176_v30 = vsel %vm1172_vm7, %v1153_v22, %v1155_v21  ;;  %v10840_v21 = vld [vmem:[#allocation3 + $0x6cc] ss:$36 sps:$4 sm:$0xff]  }
 0x2dc   :  { %v10839_v22 = vld [vmem:[#allocation3 + $0xfd0] ss:$36 sps:$4 sm:$0xff]  }
 0x2dd   :  { %7120 = vmatmul.mubr.bf16.gmra.mrb[188].mxu0 %v10785_v31  ;;  %v10809_v31 = vld [vmem:[#allocation3 + $0xe68] ss:$36 sps:$4 sm:$0xff]  }
 0x2de   :  { %7127 = vmatprep.mubr.bf16.mxu0 %v10789_v15  ;;  %v1957_v15 = vld [vmem:[%s13601_s2 + $0x180] sm:$0xff] }
 0x2df   :  { %2279 = vperm.xlu1 %10348, %v1957_v15   ;;  %v10842_v15 = vld [vmem:[#allocation3 + $0x6c8] ss:$36 sps:$4 sm:$0xff]  }
 0x2e1   :  { %6158 = vmatmul.mubr.bf16.gmra.mrb[252].mxu1 %v10788_v34  ;;  %v10813_v34 = vld [vmem:[#allocation3 + $0xeb4] ss:$36 sps:$4 sm:$0xff]  }
 0x2e2   :  { %6326 = vmatprep.mubr.bf16.mxu1 %v10794_v41  ;;  %v1958_v41 = vld [vmem:[%s13601_s2 + $0x188] sm:$0xff] }
 0x2e3   :  { %2284 = vperm.xlu0 %10347, %v1958_v41   ;;  %v1159_v41 = vpop.permute.xlu1 %1158 }
 0x2e5   :  { %7128 = vmatmul.mubr.bf16.gmra.mrb[192].mxu0 %v10791_v44  ;;  %v10816_v44 = vld [vmem:[#allocation3 + $0x5ac] ss:$36 sps:$4 sm:$0xff]  }
 0x2e6   :  { %7135 = vmatprep.mubr.bf16.mxu0 %v10795_v37  ;;  %v1959_v37 = vld [vmem:[%s13601_s2 + $0x190] sm:$0xff] }
 0x2e7   :  { %2289 = vperm.xlu1 %10348, %v1959_v37  }
 0x2e9   :  { %6327 = vmatmul.mubr.bf16.vlgmr.msra.gmra.mrb[64].mxu1 %v10792_v62  ;;  %v1960_v62 = vld [vmem:[%s13601_s2 + $0x198] sm:$0xff] }
 0x2ea   :  { %9392 = vmatpush3.bf16.msra.mxu1 %v12140_v26  ;;  %6334 = vmatprep.mubr.bf16.mxu1 %v10798_v42  ;;  %v10803_v26 = vld [vmem:[#allocation3 + $0xe20] ss:$36 sps:$4 sm:$0xff]   ;;  %v10821_v42 = vld [vmem:[#allocation3 + $0xef8] ss:$36 sps:$4 sm:$0xff]  }
 0x2eb   :  { %9393 = vmatprep.subr.bf16.mxu1 %v1174_v63  ;;  %2294 = vperm.xlu0 %10347, %v1960_v62   ;;  %v10848_v62 = vld [vmem:[#allocation3 + $0x710] ss:$36 sps:$4 sm:$0xff]  }
 0x2ed   :  { %7136 = vmatmul.mubr.bf16.gmra.mrb[196].mxu0 %v10797_v47  ;;  %v10825_v47 = vld [vmem:[#allocation3 + $0xf44] ss:$36 sps:$4 sm:$0xff]  }
 0x2ee   :  { %7143 = vmatprep.mubr.bf16.mxu0 %v10801_v6  ;;  %9394 = vmatpush3.bf16.msra.mxu1 %v1174_v63  ;;  %v1961_v63 = vld [vmem:[%s13601_s2 + $0x1a0] sm:$0xff]  ;;  %v1962_v6 = vld [vmem:[%s13601_s2 + $0x1a8] sm:$0xff] }
 0x2ef   :  { %9395 = vmatprep.subr.bf16.mxu1 %v1175_v8  ;;  %2299 = vperm.xlu1 %10348, %v1961_v63   ;;  %v10851_v63 = vld [vmem:[#allocation3 + $0x1060] ss:$36 sps:$4 sm:$0xff]  }
 0x2f0   :  { %2304 = vperm.xlu0 %10347, %v1962_v6   ;;  %v10854_v6 = vld [vmem:[#allocation3 + $0x758] ss:$36 sps:$4 sm:$0xff]  }
 0x2f1   :  { %6335 = vmatmul.mubr.bf16.gmra.mrb[68].mxu1 %v10800_v49  ;;  %v10831_v49 = vld [vmem:[#allocation3 + $0xf8c] ss:$36 sps:$4 sm:$0xff]  }
 0x2f2   :  { %6342 = vmatprep.mubr.bf16.mxu1 %v10804_v1  ;;  %9396 = vmatpush3.bf16.msra.mxu1 %v1175_v8  ;;  %v1963_v8 = vld [vmem:[%s13601_s2 + $0x1b0] sm:$0xff]  ;;  %v1964_v1 = vld [vmem:[%s13601_s2 + $0x1b8] sm:$0xff] }
 0x2f3   :  { %9397 = vmatprep.subr.bf16.mxu1 %v1176_v30  ;;  %2309 = vperm.xlu1 %10348, %v1963_v8   ;;  %v10857_v8 = vld [vmem:[#allocation3 + $0x10a8] ss:$36 sps:$4 sm:$0xff]  }
 0x2f4   :  { %2314 = vperm.xlu0 %10347, %v1964_v1   ;;  %v10860_v1 = vld [vmem:[#allocation3 + $0x7a0] ss:$36 sps:$4 sm:$0xff]  }
 0x2f5   :  { %7144 = vmatmul.mubr.bf16.gmra.mrb[200].mxu0 %v10803_v26  ;;  %v10834_v26 = vld [vmem:[#allocation3 + $0x684] ss:$36 sps:$4 sm:$0xff]  }
 0x2f6   :  { %7151 = vmatprep.mubr.bf16.mxu0 %v10807_v14  ;;  %9398 = vmatpush3.bf16.msra.mxu1 %v1176_v30  ;;  %v1965_v14 = vld [vmem:[%s13601_s2 + $0x1c0] sm:$0xff] }
 0x2f7   :  { %2319 = vperm.xlu1 %10348, %v1965_v14   ;;  %v10843_v30 = vld [vmem:[#allocation3 + $0x101c] ss:$36 sps:$4 sm:$0xff]   ;;  %v10863_v14 = vld [vmem:[#allocation3 + $0x10f0] ss:$36 sps:$4 sm:$0xff]  }
 0x2f9   :  { %6343 = vmatmul.mubr.bf16.gmra.mrb[72].mxu1 %v10806_v55  ;;  %v10837_v55 = vld [vmem:[#allocation3 + $0xfd4] ss:$36 sps:$4 sm:$0xff]  }
 0x2fa   :  { %6350 = vmatprep.mubr.bf16.mxu1 %v10810_v19  ;;  %v1966_v19 = vld [vmem:[%s13601_s2 + $0x1c8] sm:$0xff] }
 0x2fb   :  { %2324 = vperm.xlu0 %10347, %v1966_v19   ;;  %v10866_v19 = vld [vmem:[#allocation3 + $0x7e8] ss:$36 sps:$4 sm:$0xff]  }
 0x2fd   :  { %7152 = vmatmul.mubr.bf16.gmra.mrb[204].mxu0 %v10809_v31  ;;  %v1967_v31 = vld [vmem:[%s13601_s2 + $0x1d0] sm:$0xff] }
 0x2fe   :  { %7159 = vmatprep.mubr.bf16.mxu0 %v10813_v34  ;;  %2329 = vperm.xlu1 %10348, %v1967_v31   ;;  %v1968_v34 = vld [vmem:[%s13601_s2 + $0x1d8] sm:$0xff] }
 0x2ff   :  { %2334 = vperm.xlu0 %10347, %v1968_v34   ;;  %v10869_v31 = vld [vmem:[#allocation3 + $0x1138] ss:$36 sps:$4 sm:$0xff]   ;;  %v10872_v34 = vld [vmem:[#allocation3 + $0x830] ss:$36 sps:$4 sm:$0xff]  }
 0x301   :  { %6351 = vmatmul.mubr.bf16.gmra.mrb[76].mxu1 %v10812_v38  ;;  %v10846_v38 = vld [vmem:[#allocation3 + $0x714] ss:$36 sps:$4 sm:$0xff]  }
 0x302   :  { %6358 = vmatprep.mubr.bf16.mxu1 %v10816_v44  ;;  %v1157_v44 = vpop.permute.xlu0 %1156 }
 0x303   :  { %v1177_v37 = vsel %vm1172_vm7, %v1157_v44, %v1159_v41  ;;  %v1978_v41 = vld [vmem:[%s13601_s2 + $0x228] sm:$0xff]  ;;  %v10875_v44 = vld [vmem:[#allocation3 + $0x1180] ss:$36 sps:$4 sm:$0xff]  }
 0x304   :  { %9399 = vmatprep.subr.bf16.mxu1 %v1177_v37 }
 0x305   :  { %7160 = vmatmul.mubr.bf16.gmra.mrb[208].mxu0 %v10815_v48  ;;  %v10845_v48 = vld [vmem:[#allocation3 + $0x1018] ss:$36 sps:$4 sm:$0xff]   ;;  %9400 = vmatpush3.bf16.msra.mxu1 %v1177_v37  ;;  %v1979_v37 = vld [vmem:[%s13601_s2 + $0x230] sm:$0xff] }
 0x306   :  { %7167 = vmatprep.mubr.bf16.mxu0 %v10819_v54  ;;  %v1969_v54 = vld [vmem:[%s13601_s2 + $0x1e0] sm:$0xff] }
 0x307   :  { %2339 = vperm.xlu1 %10348, %v1969_v54   ;;  %v10878_v54 = vld [vmem:[#allocation3 + $0x878] ss:$36 sps:$4 sm:$0xff]  }
 0x309   :  { %6359 = vmatmul.mubr.bf16.gmra.mrb[80].mxu1 %v10818_v57  ;;  %v10849_v57 = vld [vmem:[#allocation3 + $0x1064] ss:$36 sps:$4 sm:$0xff]  }
 0x30a   :  { %6366 = vmatprep.mubr.bf16.mxu1 %v10822_v40  ;;  %v1970_v40 = vld [vmem:[%s13601_s2 + $0x1e8] sm:$0xff] }
 0x30b   :  { %2344 = vperm.xlu0 %10347, %v1970_v40   ;;  %v1163_v40 = vpop.permute.xlu1 %1162 }
 0x30d   :  { %7168 = vmatmul.mubr.bf16.gmra.mrb[212].mxu0 %v10821_v42  ;;  %v10852_v42 = vld [vmem:[#allocation3 + $0x75c] ss:$36 sps:$4 sm:$0xff]  }
 0x30e   :  { %7175 = vmatprep.mubr.bf16.mxu0 %v10825_v47  ;;  %v1971_v47 = vld [vmem:[%s13601_s2 + $0x1f0] sm:$0xff] }
 0x30f   :  { %2349 = vperm.xlu1 %10348, %v1971_v47  }
 0x311   :  { %6367 = vmatmul.mubr.bf16.gmra.mrb[84].mxu1 %v10824_v4  ;;  %v10855_v4 = vld [vmem:[#allocation3 + $0x10ac] ss:$36 sps:$4 sm:$0xff]  }
 0x312   :  { %6374 = vmatprep.mubr.bf16.mxu1 %v10828_v7  ;;  %v1972_v7 = vld [vmem:[%s13601_s2 + $0x1f8] sm:$0xff] }
 0x313   :  { %2354 = vperm.xlu0 %10347, %v1972_v7   ;;  %v10884_v7 = vld [vmem:[#allocation3 + $0x8c0] ss:$36 sps:$4 sm:$0xff]  }
 0x315   :  { %7176 = vmatmul.mubr.bf16.gmra.mrb[216].mxu0 %v10827_v53  ;;  %v10858_v53 = vld [vmem:[#allocation3 + $0x7a4] ss:$36 sps:$4 sm:$0xff]  }
 0x316   :  { %7183 = vmatprep.mubr.bf16.mxu0 %v10831_v49  ;;  %v10861_v49 = vld [vmem:[#allocation3 + $0x10f4] ss:$36 sps:$4 sm:$0xff]  }
 0x319   :  { %6375 = vmatmul.mubr.bf16.gmra.mrb[88].mxu1 %v10830_v61  ;;  %v1973_v61 = vld [vmem:[%s13601_s2 + $0x200] sm:$0xff] }
 0x31a   :  { %6382 = vmatprep.mubr.bf16.mxu1 %v10834_v26  ;;  %2359 = vperm.xlu1 %10348, %v1973_v61   ;;  %v10864_v26 = vld [vmem:[#allocation3 + $0x7ec] ss:$36 sps:$4 sm:$0xff]   ;;  %v10891_v61 = vld [vmem:[#allocation3 + $0x64] ss:$36 sps:$4 sm:$0xff]  }
 0x31d   :  { %7184 = vmatmul.mubr.bf16.gmra.mrb[220].mxu0 %v10833_v12  ;;  %v1974_v12 = vld [vmem:[%s13601_s2 + $0x208] sm:$0xff] }
 0x31e   :  { %7191 = vmatprep.mubr.bf16.mxu0 %v10837_v55  ;;  %2364 = vperm.xlu0 %10347, %v1974_v12   ;;  %v10867_v55 = vld [vmem:[#allocation3 + $0x113c] ss:$36 sps:$4 sm:$0xff]   ;;  %v10894_v12 = vld [vmem:[#allocation3 + $0x954] ss:$36 sps:$4 sm:$0xff]  }
 0x321   :  { %6383 = vmatmul.mubr.bf16.gmra.mrb[92].mxu1 %v10836_v18  ;;  %v1975_v18 = vld [vmem:[%s13601_s2 + $0x210] sm:$0xff] }
 0x322   :  { %6390 = vmatprep.mubr.bf16.mxu1 %v10840_v21  ;;  %2369 = vperm.xlu1 %10348, %v1975_v18   ;;  %v10870_v21 = vld [vmem:[#allocation3 + $0x834] ss:$36 sps:$4 sm:$0xff]   ;;  %v10897_v18 = vld [vmem:[#allocation3 + $0xac] ss:$36 sps:$4 sm:$0xff]  }
 0x325   :  { %7192 = vmatmul.mubr.bf16.gmra.mrb[224].mxu0 %v10839_v22  ;;  %v1976_v22 = vld [vmem:[%s13601_s2 + $0x218] sm:$0xff] }
 0x326   :  { %7199 = vmatprep.mubr.bf16.mxu0 %v10843_v30  ;;  %2374 = vperm.xlu0 %10347, %v1976_v22   ;;  %v10873_v30 = vld [vmem:[#allocation3 + $0x1184] ss:$36 sps:$4 sm:$0xff]   ;;  %v10900_v22 = vld [vmem:[#allocation3 + $0x99c] ss:$36 sps:$4 sm:$0xff]  }
 0x329   :  { %6391 = vmatmul.mubr.bf16.gmra.mrb[96].mxu1 %v10842_v15  ;;  %v1977_v15 = vld [vmem:[%s13601_s2 + $0x220] sm:$0xff] }
 0x32a   :  { %6398 = vmatprep.mubr.bf16.mxu1 %v10846_v38  ;;  %2379 = vperm.xlu1 %10348, %v1977_v15   ;;  %v10876_v38 = vld [vmem:[#allocation3 + $0x87c] ss:$36 sps:$4 sm:$0xff]   ;;  %v10903_v15 = vld [vmem:[#allocation3 + $0xf4] ss:$36 sps:$4 sm:$0xff]  }
 0x32b   :  { %2384 = vperm.xlu0 %10347, %v1978_v41   ;;  %v10906_v41 = vld [vmem:[#allocation3 + $0x9e4] ss:$36 sps:$4 sm:$0xff]  }
 0x32d   :  { %7200 = vmatmul.mubr.bf16.gmra.mrb[228].mxu0 %v10845_v48  ;;  %v10879_v48 = vld [vmem:[#allocation3 + $0x11cc] ss:$36 sps:$4 sm:$0xff]  }
 0x32e   :  { %7207 = vmatprep.mubr.bf16.mxu0 %v10849_v57  ;;  %2389 = vperm.xlu1 %10348, %v1979_v37   ;;  %v10882_v57 = vld [vmem:[#allocation3 + $0x8c4] ss:$36 sps:$4 sm:$0xff]   ;;  %v10909_v37 = vld [vmem:[#allocation3 + $0x13c] ss:$36 sps:$4 sm:$0xff]  }
 0x331   :  { %6399 = vmatmul.mubr.bf16.gmra.mrb[100].mxu1 %v10848_v62  ;;  %v1980_v62 = vld [vmem:[%s13601_s2 + $0x238] sm:$0xff] }
 0x332   :  { %6406 = vmatprep.mubr.bf16.mxu1 %v10852_v42  ;;  %2394 = vperm.xlu0 %10347, %v1980_v62   ;;  %v1161_v42 = vpop.permute.xlu0 %1160  ;;  %v10912_v62 = vld [vmem:[#allocation3 + $0xa2c] ss:$36 sps:$4 sm:$0xff]  }
 0x333   :  { %v1178_v47 = vsel %vm1172_vm7, %v1161_v42, %v1163_v40  ;;  %v1990_v40 = vld [vmem:[%s13601_s2 + $0x288] sm:$0xff]  ;;  %v10911_v42 = vld [vmem:[#allocation3 + $0x138] ss:$36 sps:$4 sm:$0xff]  }
 0x334   :  { %9401 = vmatprep.subr.bf16.mxu1 %v1178_v47 }
 0x335   :  { %7208 = vmatmul.mubr.bf16.gmra.mrb[232].mxu0 %v10851_v63  ;;  %v10881_v63 = vld [vmem:[#allocation3 + $0x11c8] ss:$36 sps:$4 sm:$0xff]   ;;  %9402 = vmatpush3.bf16.msra.mxu1 %v1178_v47  ;;  %v1991_v47 = vld [vmem:[%s13601_s2 + $0x290] sm:$0xff] }
 0x336   :  { %7215 = vmatprep.mubr.bf16.mxu0 %v10855_v4  ;;  %v10887_v4 = vld [vmem:[#allocation3 + $0x1c] ss:$36 sps:$4 sm:$0xff]  }
 0x339   :  { %6407 = vmatmul.mubr.bf16.gmra.mrb[104].mxu1 %v10854_v6  ;;  %v1981_v6 = vld [vmem:[%s13601_s2 + $0x240] sm:$0xff] }
 0x33a   :  { %6414 = vmatprep.mubr.bf16.mxu1 %v10858_v53  ;;  %2399 = vperm.xlu1 %10348, %v1981_v6   ;;  %v10888_v53 = vld [vmem:[#allocation3 + $0x90c] ss:$36 sps:$4 sm:$0xff]   ;;  %v10918_v6 = vld [vmem:[#allocation3 + $0xa74] ss:$36 sps:$4 sm:$0xff]  }
 0x33d   :  { %7216 = vmatmul.mubr.bf16.gmra.mrb[236].mxu0 %v10857_v8  ;;  %v1982_v8 = vld [vmem:[%s13601_s2 + $0x248] sm:$0xff] }
 0x33e   :  { %7223 = vmatprep.mubr.bf16.mxu0 %v10861_v49  ;;  %2404 = vperm.xlu0 %10347, %v1982_v8   ;;  %v10885_v49 = vld [vmem:[#allocation3 + $0x18] ss:$36 sps:$4 sm:$0xff]   ;;  %v1165_v8 = vpop.permute.xlu0 %1164 }
 0x341   :  { %6415 = vmatmul.mubr.bf16.gmra.mrb[108].mxu1 %v10860_v1  ;;  %v1983_v1 = vld [vmem:[%s13601_s2 + $0x250] sm:$0xff] }
 0x342   :  { %6422 = vmatprep.mubr.bf16.mxu1 %v10864_v26  ;;  %v10890_v26 = vld [vmem:[#allocation3 + $0x908] ss:$36 sps:$4 sm:$0xff]   ;;  %2409 = vperm.xlu1 %10348, %v1983_v1  }
 0x343   :  { %v10921_v1 = vld [vmem:[#allocation3 + $0x1cc] ss:$36 sps:$4 sm:$0xff]  }
 0x345   :  { %7224 = vmatmul.mubr.bf16.gmra.mrb[240].mxu0 %v10863_v14  ;;  %v1984_v14 = vld [vmem:[%s13601_s2 + $0x258] sm:$0xff] }
 0x346   :  { %7231 = vmatprep.mubr.bf16.mxu0 %v10867_v55  ;;  %2414 = vperm.xlu0 %10347, %v1984_v14   ;;  %v10893_v55 = vld [vmem:[#allocation3 + $0x60] ss:$36 sps:$4 sm:$0xff]  }
 0x347   :  { %v10924_v14 = vld [vmem:[#allocation3 + $0xabc] ss:$36 sps:$4 sm:$0xff]  }
 0x349   :  { %6423 = vmatmul.mubr.bf16.gmra.mrb[112].mxu1 %v10866_v19  ;;  %v1985_v19 = vld [vmem:[%s13601_s2 + $0x260] sm:$0xff] }
 0x34a   :  { %6430 = vmatprep.mubr.bf16.mxu1 %v10870_v21  ;;  %v10896_v21 = vld [vmem:[#allocation3 + $0x950] ss:$36 sps:$4 sm:$0xff]   ;;  %2419 = vperm.xlu1 %10348, %v1985_v19  }
 0x34b   :  { %v10927_v19 = vld [vmem:[#allocation3 + $0x214] ss:$36 sps:$4 sm:$0xff]  }
 0x34d   :  { %7232 = vmatmul.mubr.bf16.gmra.mrb[244].mxu0 %v10869_v31  ;;  %v1986_v31 = vld [vmem:[%s13601_s2 + $0x268] sm:$0xff] }
 0x34e   :  { %7239 = vmatprep.mubr.bf16.mxu0 %v10873_v30  ;;  %2424 = vperm.xlu0 %10347, %v1986_v31   ;;  %v10899_v30 = vld [vmem:[#allocation3 + $0xa8] ss:$36 sps:$4 sm:$0xff]  }
 0x34f   :  { %v10930_v31 = vld [vmem:[#allocation3 + $0xb04] ss:$36 sps:$4 sm:$0xff]  }
 0x351   :  { %6431 = vmatmul.mubr.bf16.gmra.mrb[116].mxu1 %v10872_v34  ;;  %v1987_v34 = vld [vmem:[%s13601_s2 + $0x270] sm:$0xff] }
 0x352   :  { %6438 = vmatprep.mubr.bf16.mxu1 %v10876_v38  ;;  %v10902_v38 = vld [vmem:[#allocation3 + $0x998] ss:$36 sps:$4 sm:$0xff]   ;;  %2429 = vperm.xlu1 %10348, %v1987_v34  }
 0x353   :  { %v10933_v34 = vld [vmem:[#allocation3 + $0x25c] ss:$36 sps:$4 sm:$0xff]  }
 0x355   :  { %7240 = vmatmul.mubr.bf16.gmra.mrb[248].mxu0 %v10875_v44  ;;  %v1988_v44 = vld [vmem:[%s13601_s2 + $0x278] sm:$0xff] }
 0x356   :  { %7247 = vmatprep.mubr.bf16.mxu0 %v10879_v48  ;;  %2434 = vperm.xlu0 %10347, %v1988_v44   ;;  %v10905_v48 = vld [vmem:[#allocation3 + $0xf0] ss:$36 sps:$4 sm:$0xff]  }
 0x357   :  { %v10936_v44 = vld [vmem:[#allocation3 + $0xb4c] ss:$36 sps:$4 sm:$0xff]  }
 0x359   :  { %6439 = vmatmul.mubr.bf16.gmra.mrb[120].mxu1 %v10878_v54  ;;  %v1989_v54 = vld [vmem:[%s13601_s2 + $0x280] sm:$0xff] }
 0x35a   :  { %6446 = vmatprep.mubr.bf16.mxu1 %v10882_v57  ;;  %v10908_v57 = vld [vmem:[#allocation3 + $0x9e0] ss:$36 sps:$4 sm:$0xff]   ;;  %2439 = vperm.xlu1 %10348, %v1989_v54  }
 0x35b   :  { %2444 = vperm.xlu0 %10347, %v1990_v40   ;;  %v10939_v54 = vld [vmem:[#allocation3 + $0x2a4] ss:$36 sps:$4 sm:$0xff]   ;;  %v10942_v40 = vld [vmem:[#allocation3 + $0xb94] ss:$36 sps:$4 sm:$0xff]  }
 0x35d   :  { %7248 = vmatmul.mubr.bf16.gmra.mrb[252].mxu0 %v10881_v63  ;;  %v10915_v63 = vld [vmem:[#allocation3 + $0x184] ss:$36 sps:$4 sm:$0xff]  }
 0x35e   :  { %7288 = vmatprep.mubr.bf16.mxu0 %v10887_v4  ;;  %v10914_v4 = vld [vmem:[#allocation3 + $0xa28] ss:$36 sps:$4 sm:$0xff]   ;;  %2449 = vperm.xlu1 %10348, %v1991_v47  }
 0x35f   :  { %v10945_v47 = vld [vmem:[#allocation3 + $0x2ec] ss:$36 sps:$4 sm:$0xff]  }
 0x361   :  { %6447 = vmatmul.mubr.bf16.gmra.mrb[124].mxu1 %v10884_v7  ;;  %v1992_v7 = vld [vmem:[%s13601_s2 + $0x298] sm:$0xff] }
 0x362   :  { %6454 = vmatprep.mubr.bf16.mxu1 %v10888_v53  ;;  %2454 = vperm.xlu0 %10347, %v1992_v7   ;;  %v1167_v53 = vpop.permute.xlu1 %1166  ;;  %v10948_v7 = vld [vmem:[#allocation3 + $0xbdc] ss:$36 sps:$4 sm:$0xff]  }
 0x365   :  { %7289 = vmatmul.mubr.bf16.vlgmr.msra.gmra.mrb[0].mxu0 %v10885_v49  ;;  %v10917_v49 = vld [vmem:[#allocation3 + $0x180] ss:$36 sps:$4 sm:$0xff]  }
 0x366   :  { %7296 = vmatprep.mubr.bf16.mxu0 %v10891_v61  ;;  %v1179_v61 = vsel %vm1172_vm7, %v1165_v8, %v1167_v53  ;;  %v2002_v53 = vld [vmem:[%s13601_s2 + $0x2e8] sm:$0xff] }
 0x367   :  { %9403 = vmatprep.subr.bf16.mxu1 %v1179_v61  ;;  %v10947_v8 = vld [vmem:[#allocation3 + $0x2e8] ss:$36 sps:$4 sm:$0xff]  }
 0x368   :  { %9404 = vmatpush3.bf16.msra.mxu1 %v1179_v61  ;;  %v2003_v61 = vld [vmem:[%s13601_s2 + $0x2f0] sm:$0xff] }
 0x369   :  { %6455 = vmatmul.mubr.bf16.gmra.mrb[128].mxu1 %v10890_v26  ;;  %v1993_v26 = vld [vmem:[%s13601_s2 + $0x2a0] sm:$0xff] }
 0x36a   :  { %6462 = vmatprep.mubr.bf16.mxu1 %v10894_v12  ;;  %v10920_v12 = vld [vmem:[#allocation3 + $0xa70] ss:$36 sps:$4 sm:$0xff]   ;;  %2459 = vperm.xlu1 %10348, %v1993_v26   ;;  %v10954_v26 = vld [vmem:[#allocation3 + $0xc24] ss:$36 sps:$4 sm:$0xff]  }
 0x36d   :  { %7297 = vmatmul.mubr.bf16.gmra.mrb[4].mxu0 %v10893_v55  ;;  %v1994_v55 = vld [vmem:[%s13601_s2 + $0x2a8] sm:$0xff] }
 0x36e   :  { %7304 = vmatprep.mubr.bf16.mxu0 %v10897_v18  ;;  %2464 = vperm.xlu0 %10347, %v1994_v55   ;;  %v10923_v18 = vld [vmem:[#allocation3 + $0x1c8] ss:$36 sps:$4 sm:$0xff]   ;;  %v1169_v55 = vpop.permute.xlu0 %1168 }
 0x371   :  { %6463 = vmatmul.mubr.bf16.gmra.mrb[132].mxu1 %v10896_v21  ;;  %v1995_v21 = vld [vmem:[%s13601_s2 + $0x2b0] sm:$0xff] }
 0x372   :  { %6470 = vmatprep.mubr.bf16.mxu1 %v10900_v22  ;;  %v10926_v22 = vld [vmem:[#allocation3 + $0xab8] ss:$36 sps:$4 sm:$0xff]   ;;  %2469 = vperm.xlu1 %10348, %v1995_v21  }
 0x373   :  { %v10957_v21 = vld [vmem:[#allocation3 + $0x37c] ss:$36 sps:$4 sm:$0xff]  }
 0x375   :  { %7305 = vmatmul.mubr.bf16.gmra.mrb[8].mxu0 %v10899_v30  ;;  %v1996_v30 = vld [vmem:[%s13601_s2 + $0x2b8] sm:$0xff] }
 0x376   :  { %7312 = vmatprep.mubr.bf16.mxu0 %v10903_v15  ;;  %2474 = vperm.xlu0 %10347, %v1996_v30   ;;  %v10929_v15 = vld [vmem:[#allocation3 + $0x210] ss:$36 sps:$4 sm:$0xff]  }
 0x379   :  { %6471 = vmatmul.mubr.bf16.gmra.mrb[136].mxu1 %v10902_v38  ;;  %v1997_v38 = vld [vmem:[%s13601_s2 + $0x2c0] sm:$0xff] }
 0x37a   :  { %6478 = vmatprep.mubr.bf16.mxu1 %v10906_v41  ;;  %v10932_v41 = vld [vmem:[#allocation3 + $0xb00] ss:$36 sps:$4 sm:$0xff]   ;;  %2479 = vperm.xlu1 %10348, %v1997_v38   ;;  %v10960_v38 = vld [vmem:[#allocation3 + $0xc6c] ss:$36 sps:$4 sm:$0xff]  }
 0x37d   :  { %7313 = vmatmul.mubr.bf16.gmra.mrb[12].mxu0 %v10905_v48  ;;  %v1998_v48 = vld [vmem:[%s13601_s2 + $0x2c8] sm:$0xff] }
 0x37e   :  { %7320 = vmatprep.mubr.bf16.mxu0 %v10909_v37  ;;  %2484 = vperm.xlu0 %10347, %v1998_v48   ;;  %v10935_v37 = vld [vmem:[#allocation3 + $0x258] ss:$36 sps:$4 sm:$0xff]  }
 0x37f   :  { %v10959_v48 = vld [vmem:[#allocation3 + $0x378] ss:$36 sps:$4 sm:$0xff]  }
 0x381   :  { %6479 = vmatmul.mubr.bf16.gmra.mrb[140].mxu1 %v10908_v57  ;;  %v1999_v57 = vld [vmem:[%s13601_s2 + $0x2d0] sm:$0xff] }
 0x382   :  { %6486 = vmatprep.mubr.bf16.mxu1 %v10912_v62  ;;  %v10938_v62 = vld [vmem:[#allocation3 + $0xb48] ss:$36 sps:$4 sm:$0xff]   ;;  %2489 = vperm.xlu1 %10348, %v1999_v57   ;;  %v2007_v57 = vld [vmem:[%s13601_s2 + $0x310] sm:$0xff] }
 0x385   :  { %7321 = vmatmul.mubr.bf16.gmra.mrb[16].mxu0 %v10911_v42  ;;  %v2000_v42 = vld [vmem:[%s13601_s2 + $0x2d8] sm:$0xff] }
 0x386   :  { %7328 = vmatprep.mubr.bf16.mxu0 %v10915_v63  ;;  %2494 = vperm.xlu0 %10347, %v2000_v42   ;;  %v10941_v63 = vld [vmem:[#allocation3 + $0x2a0] ss:$36 sps:$4 sm:$0xff]   ;;  %v10962_v42 = vld [vmem:[#allocation3 + $0xc68] ss:$36 sps:$4 sm:$0xff]  }
 0x389   :  { %6487 = vmatmul.mubr.bf16.gmra.mrb[144].mxu1 %v10914_v4  ;;  %v2001_v4 = vld [vmem:[%s13601_s2 + $0x2e0] sm:$0xff] }
 0x38a   :  { %6494 = vmatprep.mubr.bf16.mxu1 %v10918_v6  ;;  %v10944_v6 = vld [vmem:[#allocation3 + $0xb90] ss:$36 sps:$4 sm:$0xff]   ;;  %2499 = vperm.xlu1 %10348, %v2001_v4   ;;  %v2008_v4 = vld [vmem:[%s13601_s2 + $0x318] sm:$0xff] }
 0x38b   :  { %2504 = vperm.xlu0 %10347, %v2002_v53   ;;  %v10965_v53 = vld [vmem:[#allocation3 + $0x3c0] ss:$36 sps:$4 sm:$0xff]  }
 0x38d   :  { %7329 = vmatmul.mubr.bf16.gmra.mrb[20].mxu0 %v10917_v49  ;;  %v10951_v49 = vld [vmem:[#allocation3 + $0x334] ss:$36 sps:$4 sm:$0xff]  }
 0x38e   :  { %7336 = vmatprep.mubr.bf16.mxu0 %v10921_v1  ;;  %v10950_v1 = vld [vmem:[#allocation3 + $0xbd8] ss:$36 sps:$4 sm:$0xff]   ;;  %2509 = vperm.xlu1 %10348, %v2003_v61   ;;  %v2009_v61 = vld [vmem:[%s13601_s2 + $0x320] sm:$0xff] }
 0x391   :  { %6495 = vmatmul.mubr.bf16.gmra.mrb[148].mxu1 %v10920_v12  ;;  %v2004_v12 = vld [vmem:[%s13601_s2 + $0x2f8] sm:$0xff] }
 0x392   :  { %6502 = vmatprep.mubr.bf16.mxu1 %v10924_v14  ;;  %2514 = vperm.xlu0 %10347, %v2004_v12   ;;  %v1171_v14 = vpop.permute.xlu1 %1170  ;;  %v10968_v12 = vld [vmem:[#allocation3 + $0xcb0] ss:$36 sps:$4 sm:$0xff]  }
 0x395   :  { %7337 = vmatmul.mubr.bf16.gmra.mrb[24].mxu0 %v10923_v18  ;;  %v10953_v18 = vld [vmem:[#allocation3 + $0x330] ss:$36 sps:$4 sm:$0xff]  }
 0x396   :  { %7344 = vmatprep.mubr.bf16.mxu0 %v10927_v19  ;;  %v1180_v19 = vsel %vm1172_vm7, %v1169_v55, %v1171_v14  ;;  %v10972_v55 = vld [vmem:[#allocation3 + $0xcfc] ss:$36 sps:$4 sm:$0xff]  }
 0x397   :  { %9405 = vmatprep.subr.bf16.mxu1 %v1180_v19 }
 0x398   :  { %9406 = vmatpush3.bf16.msra.mxu1 %v1180_v19 }
 0x399   :  { %6503 = vmatmul.mubr.bf16.gmra.mrb[152].mxu1 %v10926_v22 }
 0x39a   :  { %6510 = vmatprep.mubr.bf16.mxu1 %v10930_v31  ;;  %v2005_v31 = vld [vmem:[%s13601_s2 + $0x300] sm:$0xff] }
 0x39b   :  { %2519 = vperm.xlu1 %10348, %v2005_v31   ;;  %v10971_v31 = vld [vmem:[#allocation3 + $0x408] ss:$36 sps:$4 sm:$0xff]  }
 0x39d   :  { %7345 = vmatmul.mubr.bf16.gmra.mrb[28].mxu0 %v10929_v15  ;;  %v10956_v15 = vld [vmem:[#allocation3 + $0xc20] ss:$36 sps:$4 sm:$0xff]  }
 0x39e   :  { %7352 = vmatprep.mubr.bf16.mxu0 %v10933_v34 }
 0x3a1   :  { %6511 = vmatmul.mubr.bf16.gmra.mrb[156].mxu1 %v10932_v41  ;;  %v2006_v41 = vld [vmem:[%s13601_s2 + $0x308] sm:$0xff] }
 0x3a2   :  { %6518 = vmatprep.mubr.bf16.mxu1 %v10936_v44  ;;  %2524 = vperm.xlu0 %10347, %v2006_v41  }
 0x3a5   :  { %7353 = vmatmul.mubr.bf16.gmra.mrb[32].mxu0 %v10935_v37  ;;  %v10963_v37 = vld [vmem:[#allocation3 + $0x3c4] ss:$36 sps:$4 sm:$0xff]  }
 0x3a6   :  { %7360 = vmatprep.mubr.bf16.mxu0 %v10939_v54 }
 0x3a9   :  { %6519 = vmatmul.mubr.bf16.gmra.mrb[160].mxu1 %v10938_v62  ;;  %v12358_v62 = vpop.permute.xlu1 %2044  ;;  %2529 = vperm.xlu1 %10348, %v2007_v57   ;;  %v10978_v57 = vld [vmem:[#allocation3 + $0xd44] ss:$36 sps:$4 sm:$0xff]  }
 0x3aa   :  { %6526 = vmatprep.mubr.bf16.mxu1 %v10942_v40 }
 0x3ad   :  { %7361 = vmatmul.mubr.bf16.gmra.mrb[36].mxu0 %v10941_v63 }
 0x3ae   :  { %7368 = vmatprep.mubr.bf16.mxu0 %v10945_v47  ;;  %v10966_v47 = vld [vmem:[#allocation3 + $0xcb4] ss:$36 sps:$4 sm:$0xff]  }
 0x3b1   :  { %6527 = vmatmul.mubr.bf16.gmra.mrb[164].mxu1 %v10944_v6  ;;  %v12365_v6 = vpop.permute.xlu0 %2039  ;;  %2534 = vperm.xlu0 %10347, %v2008_v4   ;;  %v10977_v4 = vld [vmem:[#allocation3 + $0x450] ss:$36 sps:$4 sm:$0xff]  }
 0x3b2   :  { %6534 = vmatprep.mubr.bf16.mxu1 %v10948_v7 }
 0x3b5   :  { %7369 = vmatmul.mubr.bf16.gmra.mrb[40].mxu0 %v10947_v8  ;;  %v10969_v8 = vld [vmem:[#allocation3 + $0x40c] ss:$36 sps:$4 sm:$0xff]   ;;  %v12379_v19 = vpop.permute.xlu0 %2054 }
 0x3b6   :  { %7376 = vmatprep.mubr.bf16.mxu0 %v10951_v49 }
 0x3b9   :  { %6535 = vmatmul.mubr.bf16.gmra.mrb[168].mxu1 %v10950_v1  ;;  %v12372_v1 = vpop.permute.xlu1 %2049  ;;  %2539 = vperm.xlu1 %10348, %v2009_v61  }
 0x3ba   :  { %6542 = vmatprep.mubr.bf16.mxu1 %v10954_v26 }
 0x3bc   :  { %v12343_v22 = vpop.f32.mrb[64].mxu1 }
 0x3bd   :  { %13611 = vst [vmem:[#allocation14_spill] sm:$0xff] %v12343_v22  ;;  %v6330_v30 = vpop.f32.mrb[65].mxu1  ;;  %7377 = vmatmul.mubr.bf16.gmra.mrb[44].mxu0 %v10953_v18  ;;  %v2010_v18 = vld [vmem:[%s13601_s2 + $0x328] sm:$0xff]  ;;  %v12386_v41 = vpop.permute.xlu1 %2059 }
 0x3be   :  { %v12348_v34 = vpop.f32.mrb[66].mxu1  ;;  %7384 = vmatprep.mubr.bf16.mxu0 %v10957_v21  ;;  %2544 = vperm.xlu0 %10347, %v2010_v18   ;;  %v10975_v30 = vld [vmem:[#allocation3 + $0x454] ss:$36 sps:$4 sm:$0xff]   ;;  %v10984_v18 = vld [vmem:[#allocation3 + $0xd8c] ss:$36 sps:$4 sm:$0xff]  }
 0x3bf   :  { %13612 = vst [vmem:[#allocation15_spill] sm:$0xff] %v12348_v34  ;;  %v6333_v44 = vpop.f32.mrb[67].mxu1  ;;  %v11023_v34 = vld [vmem:[#allocation3 + $0x694] ss:$36 sps:$4 sm:$0xff]  }
 0x3c1   :  { %6543 = vmatmul.mubr.bf16.gmra.mrb[172].mxu1 %v10956_v15  ;;  %v12400_v61 = vpop.permute.xlu1 %2069 }
 0x3c2   :  { %6550 = vmatprep.mubr.bf16.mxu1 %v10960_v38  ;;  %v2011_v38 = vld [vmem:[%s13601_s2 + $0x330] sm:$0xff] }
 0x3c3   :  { %2549 = vperm.xlu1 %10348, %v2011_v38   ;;  %v10983_v38 = vld [vmem:[#allocation3 + $0x498] ss:$36 sps:$4 sm:$0xff]  }
 0x3c4   :  { %v12353_v54 = vpop.f32.mrb[68].mxu1 }
 0x3c5   :  { %13613 = vst [vmem:[#allocation16_spill] sm:$0xff] %v12353_v54  ;;  %v6338_v40 = vpop.f32.mrb[69].mxu1  ;;  %7385 = vmatmul.mubr.bf16.gmra.mrb[48].mxu0 %v10959_v48  ;;  %v10974_v48 = vld [vmem:[#allocation3 + $0xcf8] ss:$36 sps:$4 sm:$0xff]  }
 0x3c6   :  { %v12360_v63 = vpop.f32.mrb[70].mxu1  ;;  %7392 = vmatprep.mubr.bf16.mxu0 %v10963_v37  ;;  %v2012_v40 = vld [vmem:[%s13601_s2 + $0x338] sm:$0xff] }
 0x3c7   :  { %13614 = vst [vmem:[#allocation17_spill] sm:$0xff] %v12360_v63  ;;  %v6341_v7 = vpop.f32.mrb[71].mxu1  ;;  %v11017_v63 = vld [vmem:[#allocation3 + $0x64c] ss:$36 sps:$4 sm:$0xff]  }
 0x3c8   :  { %v10981_v7 = vld [vmem:[#allocation3 + $0x49c] ss:$36 sps:$4 sm:$0xff]  }
 0x3c9   :  { %6551 = vmatmul.mubr.bf16.gmra.mrb[176].mxu1 %v10962_v42  ;;  %v12393_v42 = vpop.permute.xlu0 %2064  ;;  %2554 = vperm.xlu0 %10347, %v2012_v40   ;;  %v12414_v40 = vpop.permute.xlu1 %2079 }
 0x3ca   :  { %6558 = vmatprep.mubr.bf16.mxu1 %v10966_v47 }
 0x3cc   :  { %v12367_v49 = vpop.f32.mrb[72].mxu1 }
 0x3cd   :  { %13615 = vst [vmem:[#allocation18_spill] sm:$0xff] %v12367_v49  ;;  %v6346_v26 = vpop.f32.mrb[73].mxu1  ;;  %7393 = vmatmul.mubr.bf16.gmra.mrb[52].mxu0 %v10965_v53 }
 0x3ce   :  { %v12374_v14 = vpop.f32.mrb[74].mxu1  ;;  %7400 = vmatprep.mubr.bf16.mxu0 %v10969_v8  ;;  %v2013_v8 = vld [vmem:[%s13601_s2 + $0x340] sm:$0xff] }
 0x3cf   :  { %13616 = vst [vmem:[#allocation19_spill] sm:$0xff] %v12374_v14  ;;  %v6349_v21 = vpop.f32.mrb[75].mxu1  ;;  %2559 = vperm.xlu1 %10348, %v2013_v8   ;;  %v10990_v8 = vld [vmem:[#allocation3 + $0xdd4] ss:$36 sps:$4 sm:$0xff]   ;;  %v11011_v14 = vld [vmem:[#allocation3 + $0x604] ss:$36 sps:$4 sm:$0xff]  }
 0x3d0   :  { %v2014_v21 = vld [vmem:[%s13601_s2 + $0x348] sm:$0xff] }
 0x3d1   :  { %6559 = vmatmul.mubr.bf16.gmra.mrb[180].mxu1 %v10968_v12  ;;  %v10980_v12 = vld [vmem:[#allocation3 + $0xd40] ss:$36 sps:$4 sm:$0xff]  }
 0x3d2   :  { %6566 = vmatprep.mubr.bf16.mxu1 %v10972_v55 }
 0x3d4   :  { %v12381_v15 = vpop.f32.mrb[76].mxu1 }
 0x3d5   :  { %13617 = vst [vmem:[#allocation20_spill] sm:$0xff] %v12381_v15  ;;  %v6354_v44 = vpop.f32.mrb[77].mxu1  ;;  %7401 = vmatmul.mubr.bf16.gmra.mrb[56].mxu0 %v10971_v31  ;;  %v12407_v31 = vpop.permute.xlu0 %2074  ;;  %2564 = vperm.xlu0 %10347, %v2014_v21   ;;  %v10989_v21 = vld [vmem:[#allocation3 + $0x4e0] ss:$36 sps:$4 sm:$0xff]  }
 0x3d6   :  { %v12388_v37 = vpop.f32.mrb[78].mxu1  ;;  %7408 = vmatprep.mubr.bf16.mxu0 %v10975_v30  ;;  %v10987_v44 = vld [vmem:[#allocation3 + $0x4e4] ss:$36 sps:$4 sm:$0xff]  }
 0x3d7   :  { %13618 = vst [vmem:[#allocation21_spill] sm:$0xff] %v12388_v37  ;;  %v6357_v47 = vpop.f32.mrb[79].mxu1  ;;  %v11005_v37 = vld [vmem:[#allocation3 + $0x5bc] ss:$36 sps:$4 sm:$0xff]  }
 0x3d9   :  { %6567 = vmatmul.mubr.bf16.gmra.mrb[184].mxu1 %v10974_v48 }
 0x3da   :  { %6574 = vmatprep.mubr.bf16.mxu1 %v10978_v57  ;;  %v2015_v57 = vld [vmem:[%s13601_s2 + $0x350] sm:$0xff] }
 0x3db   :  { %2569 = vperm.xlu1 %10348, %v2015_v57  }
 0x3dc   :  { %v12395_v53 = vpop.f32.mrb[80].mxu1 }
 0x3dd   :  { %13619 = vst [vmem:[#allocation22_spill] sm:$0xff] %v12395_v53  ;;  %v6362_v26 = vpop.f32.mrb[81].mxu1  ;;  %7409 = vmatmul.mubr.bf16.gmra.mrb[60].mxu0 %v10977_v4  ;;  %v10986_v4 = vld [vmem:[#allocation3 + $0xd88] ss:$36 sps:$4 sm:$0xff]  }
 0x3de   :  { %v12402_v55 = vpop.f32.mrb[82].mxu1  ;;  %7416 = vmatprep.mubr.bf16.mxu0 %v10981_v7  ;;  %v2016_v26 = vld [vmem:[%s13601_s2 + $0x358] sm:$0xff] }
 0x3df   :  { %13620 = vst [vmem:[#allocation23_spill] sm:$0xff] %v12402_v55  ;;  %v6365_v30 = vpop.f32.mrb[83].mxu1  ;;  %v10999_v55 = vld [vmem:[#allocation3 + $0x574] ss:$36 sps:$4 sm:$0xff]  }
 0x3e0   :  { %v10993_v30 = vld [vmem:[#allocation3 + $0x52c] ss:$36 sps:$4 sm:$0xff]  }
 0x3e1   :  { %6575 = vmatmul.mubr.bf16.gmra.mrb[188].mxu1 %v10980_v12  ;;  %v12421_v12 = vpop.permute.xlu0 %2084  ;;  %2574 = vperm.xlu0 %10347, %v2016_v26   ;;  %v10996_v26 = vld [vmem:[#allocation3 + $0xe1c] ss:$36 sps:$4 sm:$0xff]  }
 0x3e2   :  { %6582 = vmatprep.mubr.bf16.mxu1 %v10984_v18 }
 0x3e4   :  { %v12409_v48 = vpop.f32.mrb[84].mxu1 }
 0x3e5   :  { %13621 = vst [vmem:[#allocation24_spill] sm:$0xff] %v12409_v48  ;;  %v6370_v47 = vpop.f32.mrb[85].mxu1  ;;  %7417 = vmatmul.mubr.bf16.gmra.mrb[64].mxu0 %v10983_v38  ;;  %v2017_v38 = vld [vmem:[%s13601_s2 + $0x360] sm:$0xff] }
 0x3e6   :  { %v12416_v7 = vpop.f32.mrb[86].mxu1  ;;  %7424 = vmatprep.mubr.bf16.mxu0 %v10987_v44  ;;  %v12428_v44 = vpop.permute.xlu1 %2089  ;;  %2579 = vperm.xlu1 %10348, %v2017_v38  }
 0x3e7   :  { %13622 = vst [vmem:[#allocation25_spill] sm:$0xff] %v12416_v7  ;;  %v6373_v18 = vpop.f32.mrb[87].mxu1  ;;  %v10992_v7 = vld [vmem:[#allocation3 + $0xdd0] ss:$36 sps:$4 sm:$0xff]  }
 0x3e9   :  { %6583 = vmatmul.mubr.bf16.gmra.mrb[192].mxu1 %v10986_v4  ;;  %v2018_v4 = vld [vmem:[%s13601_s2 + $0x368] sm:$0xff] }
 0x3ea   :  { %6590 = vmatprep.mubr.bf16.mxu1 %v10990_v8  ;;  %v12435_v8 = vpop.permute.xlu0 %2094  ;;  %2584 = vperm.xlu0 %10347, %v2018_v4   ;;  %v11002_v4 = vld [vmem:[#allocation3 + $0xe64] ss:$36 sps:$4 sm:$0xff]  }
 0x3ec   :  { %v12423_v47 = vpop.f32.mrb[88].mxu1 }
 0x3ed   :  { %13623 = vst [vmem:[#allocation26_spill] sm:$0xff] %v12423_v47  ;;  %v6378_v57 = vpop.f32.mrb[89].mxu1  ;;  %7425 = vmatmul.mubr.bf16.gmra.mrb[68].mxu0 %v10989_v21  ;;  %v10995_v47 = vld [vmem:[#allocation3 + $0x528] ss:$36 sps:$4 sm:$0xff]   ;;  %v2019_v21 = vld [vmem:[%s13601_s2 + $0x370] sm:$0xff] }
 0x3ee   :  { %v12430_v48 = vpop.f32.mrb[90].mxu1  ;;  %7432 = vmatprep.mubr.bf16.mxu0 %v10993_v30  ;;  %v12442_v30 = vpop.permute.xlu1 %2099  ;;  %2589 = vperm.xlu1 %10348, %v2019_v21  }
 0x3ef   :  { %13624 = vst [vmem:[#allocation27_spill] sm:$0xff] %v12430_v48  ;;  %v6381_v18 = vpop.f32.mrb[91].mxu1  ;;  %v10998_v48 = vld [vmem:[#allocation3 + $0xe18] ss:$36 sps:$4 sm:$0xff]  }
 0x3f1   :  { %6591 = vmatmul.mubr.bf16.gmra.mrb[196].mxu1 %v10992_v7  ;;  %v2020_v7 = vld [vmem:[%s13601_s2 + $0x378] sm:$0xff] }
 0x3f2   :  { %6598 = vmatprep.mubr.bf16.mxu1 %v10996_v26  ;;  %v12449_v26 = vpop.permute.xlu0 %2104  ;;  %2594 = vperm.xlu0 %10347, %v2020_v7   ;;  %v11008_v7 = vld [vmem:[#allocation3 + $0xeac] ss:$36 sps:$4 sm:$0xff]  }
 0x3f4   :  { %v12437_v57 = vpop.f32.mrb[92].mxu1 }
 0x3f5   :  { %13625 = vst [vmem:[#allocation28_spill] sm:$0xff] %v12437_v57  ;;  %v6386_v38 = vpop.f32.mrb[93].mxu1  ;;  %7433 = vmatmul.mubr.bf16.gmra.mrb[72].mxu0 %v10995_v47  ;;  %v11001_v57 = vld [vmem:[#allocation3 + $0x570] ss:$36 sps:$4 sm:$0xff]   ;;  %v2021_v47 = vld [vmem:[%s13601_s2 + $0x380] sm:$0xff] }
 0x3f6   :  { %v12444_v53 = vpop.f32.mrb[94].mxu1  ;;  %7440 = vmatprep.mubr.bf16.mxu0 %v10999_v55  ;;  %v12456_v55 = vpop.permute.xlu1 %2109  ;;  %2599 = vperm.xlu1 %10348, %v2021_v47  }
 0x3f7   :  { %13626 = vst [vmem:[#allocation29_spill] sm:$0xff] %v12444_v53  ;;  %v6389_v18 = vpop.f32.mrb[95].mxu1  ;;  %v11004_v53 = vld [vmem:[#allocation3 + $0xe60] ss:$36 sps:$4 sm:$0xff]  }
 0x3f9   :  { %6599 = vmatmul.mubr.bf16.gmra.mrb[200].mxu1 %v10998_v48  ;;  %v2022_v48 = vld [vmem:[%s13601_s2 + $0x388] sm:$0xff] }
 0x3fa   :  { %6606 = vmatprep.mubr.bf16.mxu1 %v11002_v4  ;;  %v12463_v4 = vpop.permute.xlu0 %2114  ;;  %2604 = vperm.xlu0 %10347, %v2022_v48   ;;  %v11014_v48 = vld [vmem:[#allocation3 + $0xef4] ss:$36 sps:$4 sm:$0xff]  }
 0x3fc   :  { %v12451_v38 = vpop.f32.mrb[96].mxu1 }
 0x3fd   :  { %13627 = vst [vmem:[#allocation30_spill] sm:$0xff] %v12451_v38  ;;  %v6394_v21 = vpop.f32.mrb[97].mxu1  ;;  %7441 = vmatmul.mubr.bf16.gmra.mrb[76].mxu0 %v11001_v57  ;;  %v11007_v38 = vld [vmem:[#allocation3 + $0x5b8] ss:$36 sps:$4 sm:$0xff]   ;;  %v2023_v57 = vld [vmem:[%s13601_s2 + $0x390] sm:$0xff] }
 0x3fe   :  { %v12458_v15 = vpop.f32.mrb[98].mxu1  ;;  %7448 = vmatprep.mubr.bf16.mxu0 %v11005_v37  ;;  %v12470_v37 = vpop.permute.xlu1 %2119  ;;  %2609 = vperm.xlu1 %10348, %v2023_v57  }
 0x3ff   :  { %13628 = vst [vmem:[#allocation31_spill] sm:$0xff] %v12458_v15  ;;  %v6397_v18 = vpop.f32.mrb[99].mxu1  ;;  %v11010_v15 = vld [vmem:[#allocation3 + $0xea8] ss:$36 sps:$4 sm:$0xff]  }
 0x401   :  { %6607 = vmatmul.mubr.bf16.gmra.mrb[204].mxu1 %v11004_v53  ;;  %v2024_v53 = vld [vmem:[%s13601_s2 + $0x398] sm:$0xff] }
 0x402   :  { %6614 = vmatprep.mubr.bf16.mxu1 %v11008_v7  ;;  %v12477_v7 = vpop.permute.xlu0 %2124  ;;  %2614 = vperm.xlu0 %10347, %v2024_v53   ;;  %v11020_v53 = vld [vmem:[#allocation3 + $0xf3c] ss:$36 sps:$4 sm:$0xff]  }
 0x404   :  { %v12465_v21 = vpop.f32.mrb[100].mxu1 }
 0x405   :  { %13629 = vst [vmem:[#allocation32_spill] sm:$0xff] %v12465_v21  ;;  %v6402_v47 = vpop.f32.mrb[101].mxu1  ;;  %7449 = vmatmul.mubr.bf16.gmra.mrb[80].mxu0 %v11007_v38  ;;  %v11013_v21 = vld [vmem:[#allocation3 + $0x600] ss:$36 sps:$4 sm:$0xff]  }
 0x406   :  { %v12472_v49 = vpop.f32.mrb[102].mxu1  ;;  %7456 = vmatprep.mubr.bf16.mxu0 %v11011_v14  ;;  %v2025_v38 = vld [vmem:[%s13601_s2 + $0x3a0] sm:$0xff]  ;;  %v12484_v14 = vpop.permute.xlu1 %2129 }
 0x407   :  { %13630 = vst [vmem:[#allocation33_spill] sm:$0xff] %v12472_v49  ;;  %v6405_v18 = vpop.f32.mrb[103].mxu1  ;;  %v11016_v49 = vld [vmem:[#allocation3 + $0xef0] ss:$36 sps:$4 sm:$0xff]   ;;  %2619 = vperm.xlu1 %10348, %v2025_v38  }
 0x409   :  { %6615 = vmatmul.mubr.bf16.gmra.mrb[208].mxu1 %v11010_v15  ;;  %v2026_v15 = vld [vmem:[%s13601_s2 + $0x3a8] sm:$0xff] }
 0x40a   :  { %6622 = vmatprep.mubr.bf16.mxu1 %v11014_v48  ;;  %v12491_v48 = vpop.permute.xlu0 %2134  ;;  %2624 = vperm.xlu0 %10347, %v2026_v15   ;;  %v11026_v15 = vld [vmem:[#allocation3 + $0xf84] ss:$36 sps:$4 sm:$0xff]  }
 0x40c   :  { %v12479_v47 = vpop.f32.mrb[104].mxu1 }
 0x40d   :  { %13631 = vst [vmem:[#allocation34_spill] sm:$0xff] %v12479_v47  ;;  %v6410_v57 = vpop.f32.mrb[105].mxu1  ;;  %7457 = vmatmul.mubr.bf16.gmra.mrb[84].mxu0 %v11013_v21  ;;  %v11019_v47 = vld [vmem:[#allocation3 + $0x648] ss:$36 sps:$4 sm:$0xff]   ;;  %v2027_v21 = vld [vmem:[%s13601_s2 + $0x3b0] sm:$0xff] }
 0x40e   :  { %v12486_v54 = vpop.f32.mrb[106].mxu1  ;;  %7464 = vmatprep.mubr.bf16.mxu0 %v11017_v63  ;;  %v12498_v63 = vpop.permute.xlu1 %2139  ;;  %2629 = vperm.xlu1 %10348, %v2027_v21  }
 0x40f   :  { %13632 = vst [vmem:[#allocation35_spill] sm:$0xff] %v12486_v54  ;;  %v6413_v18 = vpop.f32.mrb[107].mxu1  ;;  %v11022_v54 = vld [vmem:[#allocation3 + $0xf38] ss:$36 sps:$4 sm:$0xff]  }
 0x411   :  { %6623 = vmatmul.mubr.bf16.gmra.mrb[212].mxu1 %v11016_v49  ;;  %v2028_v49 = vld [vmem:[%s13601_s2 + $0x3b8] sm:$0xff] }
 0x412   :  { %6630 = vmatprep.mubr.bf16.mxu1 %v11020_v53  ;;  %v12505_v53 = vpop.permute.xlu0 %2144  ;;  %2634 = vperm.xlu0 %10347, %v2028_v49   ;;  %v11032_v49 = vld [vmem:[#allocation3 + $0xfcc] ss:$36 sps:$4 sm:$0xff]  }
 0x414   :  { %v12493_v57 = vpop.f32.mrb[108].mxu1 }
 0x415   :  { %13633 = vst [vmem:[#allocation36_spill] sm:$0xff] %v12493_v57  ;;  %v6418_v38 = vpop.f32.mrb[109].mxu1  ;;  %7465 = vmatmul.mubr.bf16.gmra.mrb[88].mxu0 %v11019_v47  ;;  %v11025_v57 = vld [vmem:[#allocation3 + $0x690] ss:$36 sps:$4 sm:$0xff]   ;;  %v2029_v47 = vld [vmem:[%s13601_s2 + $0x3c0] sm:$0xff] }
 0x416   :  { %v12500_v22 = vpop.f32.mrb[110].mxu1  ;;  %7472 = vmatprep.mubr.bf16.mxu0 %v11023_v34  ;;  %v12512_v34 = vpop.permute.xlu1 %2149  ;;  %2639 = vperm.xlu1 %10348, %v2029_v47  }
 0x417   :  { %13634 = vst [vmem:[#allocation37_spill] sm:$0xff] %v12500_v22  ;;  %v6421_v18 = vpop.f32.mrb[111].mxu1  ;;  %v11028_v22 = vld [vmem:[#allocation3 + $0xf80] ss:$36 sps:$4 sm:$0xff]  }
 0x419   :  { %6631 = vmatmul.mubr.bf16.gmra.mrb[216].mxu1 %v11022_v54  ;;  %v2030_v54 = vld [vmem:[%s13601_s2 + $0x3c8] sm:$0xff] }
 0x41a   :  { %6638 = vmatprep.mubr.bf16.mxu1 %v11026_v15  ;;  %v12519_v15 = vpop.permute.xlu0 %2154  ;;  %2644 = vperm.xlu0 %10347, %v2030_v54   ;;  %v11038_v54 = vld [vmem:[#allocation3 + $0x1014] ss:$36 sps:$4 sm:$0xff]  }
 0x41c   :  { %v12507_v38 = vpop.f32.mrb[112].mxu1 }
 0x41d   :  { %13635 = vst [vmem:[#allocation38_spill] sm:$0xff] %v12507_v38  ;;  %v6426_v21 = vpop.f32.mrb[113].mxu1  ;;  %7473 = vmatmul.mubr.bf16.gmra.mrb[92].mxu0 %v11025_v57  ;;  %v11031_v38 = vld [vmem:[#allocation3 + $0x6d8] ss:$36 sps:$4 sm:$0xff]   ;;  %v2031_v57 = vld [vmem:[%s13601_s2 + $0x3d0] sm:$0xff] }
 0x41e   :  { %v12514_v5 = vpop.f32.mrb[114].mxu1  ;;  %7480 = vmatprep.mubr.bf16.mxu0 %v11029_v28  ;;  %v12526_v28 = vpop.permute.xlu1 %2159  ;;  %2649 = vperm.xlu1 %10348, %v2031_v57  }
 0x41f   :  { %13636 = vst [vmem:[#allocation39_spill] sm:$0xff] %v12514_v5  ;;  %v6429_v18 = vpop.f32.mrb[115].mxu1  ;;  %v11034_v5 = vld [vmem:[#allocation3 + $0xfc8] ss:$36 sps:$4 sm:$0xff]  }
 0x421   :  { %6639 = vmatmul.mubr.bf16.gmra.mrb[220].mxu1 %v11028_v22  ;;  %v2032_v22 = vld [vmem:[%s13601_s2 + $0x3d8] sm:$0xff] }
 0x422   :  { %6646 = vmatprep.mubr.bf16.mxu1 %v11032_v49  ;;  %v12533_v49 = vpop.permute.xlu0 %2164  ;;  %2654 = vperm.xlu0 %10347, %v2032_v22   ;;  %v11044_v22 = vld [vmem:[#allocation3 + $0x105c] ss:$36 sps:$4 sm:$0xff]  }
 0x423   :  { %13639 = vst [vmem:[#allocation42_spill] sm:$0xff] %v12533_v49 }
 0x424   :  { %v12521_v21 = vpop.f32.mrb[116].mxu1 }
 0x425   :  { %13637 = vst [vmem:[#allocation40_spill] sm:$0xff] %v12521_v21  ;;  %v6434_v47 = vpop.f32.mrb[117].mxu1  ;;  %7481 = vmatmul.mubr.bf16.gmra.mrb[96].mxu0 %v11031_v38  ;;  %v11037_v21 = vld [vmem:[#allocation3 + $0x720] ss:$36 sps:$4 sm:$0xff]  }
 0x426   :  { %v12528_v2 = vpop.f32.mrb[118].mxu1  ;;  %7488 = vmatprep.mubr.bf16.mxu0 %v11035_v11  ;;  %v2033_v38 = vld [vmem:[%s13601_s2 + $0x3e0] sm:$0xff]  ;;  %v12540_v11 = vpop.permute.xlu1 %2169 }
 0x427   :  { %13638 = vst [vmem:[#allocation41_spill] sm:$0xff] %v12528_v2  ;;  %v6437_v18 = vpop.f32.mrb[119].mxu1  ;;  %13641 = vst [vmem:[#allocation44_spill] sm:$0xff] %v12540_v11  ;;  %v11040_v2 = vld [vmem:[#allocation3 + $0x1010] ss:$36 sps:$4 sm:$0xff]   ;;  %2659 = vperm.xlu1 %10348, %v2033_v38  }
 0x428   :  { %v11047_v11 = vld [vmem:[#allocation3 + $0x7b4] ss:$36 sps:$4 sm:$0xff]  }
 0x429   :  { %6647 = vmatmul.mubr.bf16.gmra.mrb[224].mxu1 %v11034_v5  ;;  %v2034_v5 = vld [vmem:[%s13601_s2 + $0x3e8] sm:$0xff] }
 0x42a   :  { %6654 = vmatprep.mubr.bf16.mxu1 %v11038_v54  ;;  %v12547_v54 = vpop.permute.xlu0 %2174  ;;  %2664 = vperm.xlu0 %10347, %v2034_v5   ;;  %v11050_v5 = vld [vmem:[#allocation3 + $0x10a4] ss:$36 sps:$4 sm:$0xff]  }
 0x42b   :  { %13643 = vst [vmem:[#allocation46_spill] sm:$0xff] %v12547_v54  ;;  %v11053_v54 = vld [vmem:[#allocation3 + $0x7fc] ss:$36 sps:$4 sm:$0xff]  }
 0x42c   :  { %v12535_v47 = vpop.f32.mrb[120].mxu1 }
 0x42d   :  { %13640 = vst [vmem:[#allocation43_spill] sm:$0xff] %v12535_v47  ;;  %v6442_v57 = vpop.f32.mrb[121].mxu1  ;;  %7489 = vmatmul.mubr.bf16.gmra.mrb[100].mxu0 %v11037_v21  ;;  %v11043_v47 = vld [vmem:[#allocation3 + $0x768] ss:$36 sps:$4 sm:$0xff]   ;;  %v2035_v21 = vld [vmem:[%s13601_s2 + $0x3f0] sm:$0xff] }
 0x42e   :  { %v12542_v46 = vpop.f32.mrb[122].mxu1  ;;  %7496 = vmatprep.mubr.bf16.mxu0 %v11041_v10  ;;  %v12554_v10 = vpop.permute.xlu1 %2179  ;;  %2669 = vperm.xlu1 %10348, %v2035_v21   ;;  %v11049_v21 = vld [vmem:[#allocation3 + $0x7b0] ss:$36 sps:$4 sm:$0xff]  }
 0x42f   :  { %13642 = vst [vmem:[#allocation45_spill] sm:$0xff] %v12542_v46  ;;  %v6445_v18 = vpop.f32.mrb[123].mxu1  ;;  %13645 = vst [vmem:[#allocation48_spill] sm:$0xff] %v12554_v10  ;;  %v11046_v46 = vld [vmem:[#allocation3 + $0x1058] ss:$36 sps:$4 sm:$0xff]  }
 0x430   :  { %v12563_v18 = vpop.permute.xlu0 %2184 }
 0x431   :  { %6655 = vmatmul.mubr.bf16.gmra.mrb[228].mxu1 %v11040_v2  ;;  %v2036_v2 = vld [vmem:[%s13601_s2 + $0x3f8] sm:$0xff] }
 0x432   :  { %6662 = vmatprep.mubr.bf16.mxu1 %v11044_v22  ;;  %v5656_v22 = vadd.f32 %v12075_v13, %v12365_v6  ;;  %2674 = vperm.xlu0 %10347, %v2036_v2  }
 0x434   :  { %v12549_v57 = vpop.f32.mrb[124].mxu1 }
 0x435   :  { %13644 = vst [vmem:[#allocation47_spill] sm:$0xff] %v12549_v57  ;;  %v6450_v38 = vpop.f32.mrb[125].mxu1  ;;  %7497 = vmatmul.mubr.bf16.gmra.mrb[104].mxu0 %v11043_v47 }
 0x436   :  { %v12556_v3 = vpop.f32.mrb[126].mxu1  ;;  %7504 = vmatprep.mubr.bf16.mxu0 %v11047_v11  ;;  %v5659_v11 = vadd.f32 %v12077_v9, %v12358_v62 }
 0x437   :  { %13646 = vst [vmem:[#allocation49_spill] sm:$0xff] %v12556_v3  ;;  %v6453_v57 = vpop.f32.mrb[127].mxu1 }
 0x438   :  { %v7290_v10 = vpop.f32.mrb[0].mxu0  ;;  %v11052_v57 = vld [vmem:[#allocation3 + $0x10a0] ss:$36 sps:$4 sm:$0xff]  }
 0x439   :  { %v12565_v38 = vadd.f32 %v7290_v10, %v5656_v22  ;;  %6663 = vmatmul.mubr.bf16.gmra.mrb[232].mxu1 %v11046_v46  ;;  %v7292_v47 = vpop.f32.mrb[1].mxu0  ;;  %v11056_v46 = vld [vmem:[#allocation3 + $0x10ec] ss:$36 sps:$4 sm:$0xff]   ;;  %v5664_v10 = vadd.f32 %v12079_v17, %v12372_v1 }
 0x43a   :  { %v7293_v3 = vpop.f32.mrb[2].mxu0  ;;  %6670 = vmatprep.mubr.bf16.mxu1 %v11050_v5  ;;  %v11055_v5 = vld [vmem:[#allocation3 + $0x7f8] ss:$36 sps:$4 sm:$0xff]   ;;  %v11058_v17 = vld [vmem:[#allocation3 + $0x10e8] ss:$36 sps:$4 sm:$0xff]  }
 0x43b   :  { %v12569_v49 = vadd.f32 %v7293_v3, %v5659_v11  ;;  %v7295_v33 = vpop.f32.mrb[3].mxu0  ;;  %v11059_v11 = vld [vmem:[#allocation3 + $0x844] ss:$36 sps:$4 sm:$0xff]  }
 0x43c   :  { %v12571_v13 = vpop.f32.mrb[128].mxu1  ;;  %v5667_v33 = vadd.f32 %v12081_v59, %v12379_v19 }
 0x43d   :  { %13647 = vst [vmem:[#allocation50_spill] sm:$0xff] %v12569_v49  ;;  %v6458_v6 = vpop.f32.mrb[129].mxu1  ;;  %7505 = vmatmul.mubr.bf16.gmra.mrb[108].mxu0 %v11049_v21 }
 0x43e   :  { %v12573_v2 = vpop.f32.mrb[130].mxu1  ;;  %7512 = vmatprep.mubr.bf16.mxu0 %v11053_v54 }
 0x43f   :  { %v6461_v9 = vpop.f32.mrb[131].mxu1 }
 0x440   :  { %v7298_v62 = vpop.f32.mrb[4].mxu0 }
 0x441   :  { %v12577_v22 = vadd.f32 %v7298_v62, %v5664_v10  ;;  %6671 = vmatmul.mubr.bf16.gmra.mrb[236].mxu1 %v11052_v57  ;;  %v7300_v3 = vpop.f32.mrb[5].mxu0  ;;  %v11062_v57 = vld [vmem:[#allocation3 + $0x1134] ss:$36 sps:$4 sm:$0xff]   ;;  %v5672_v10 = vadd.f32 %v12083_v24, %v12386_v41  ;;  %v5675_v62 = vadd.f32 %v12085_v27, %v12393_v42 }
 0x442   :  { %v7301_v47 = vpop.f32.mrb[6].mxu0  ;;  %6678 = vmatprep.mubr.bf16.mxu1 %v11056_v46  ;;  %v11061_v3 = vld [vmem:[#allocation3 + $0x840] ss:$36 sps:$4 sm:$0xff]   ;;  %v11064_v24 = vld [vmem:[#allocation3 + $0x1130] ss:$36 sps:$4 sm:$0xff]  }
 0x443   :  { %v12581_v21 = vadd.f32 %v7301_v47, %v5667_v33  ;;  %v7303_v54 = vpop.f32.mrb[7].mxu0  ;;  %v11065_v33 = vld [vmem:[#allocation3 + $0x88c] ss:$36 sps:$4 sm:$0xff]  }
 0x444   :  { %v12583_v6 = vpop.f32.mrb[132].mxu1 }
 0x445   :  { %v6466_v49 = vpop.f32.mrb[133].mxu1  ;;  %7513 = vmatmul.mubr.bf16.gmra.mrb[112].mxu0 %v11055_v5 }
 0x446   :  { %v12585_v1 = vpop.f32.mrb[134].mxu1  ;;  %7520 = vmatprep.mubr.bf16.mxu0 %v11059_v11 }
 0x447   :  { %v6469_v59 = vpop.f32.mrb[135].mxu1 }
 0x448   :  { %v7306_v19 = vpop.f32.mrb[8].mxu0 }
 0x449   :  { %v12589_v9 = vadd.f32 %v7306_v19, %v5672_v10  ;;  %6679 = vmatmul.mubr.bf16.gmra.mrb[240].mxu1 %v11058_v17  ;;  %v7308_v46 = vpop.f32.mrb[9].mxu0  ;;  %v11068_v17 = vld [vmem:[#allocation3 + $0x117c] ss:$36 sps:$4 sm:$0xff]   ;;  %v5680_v10 = vadd.f32 %v12087_v32, %v12400_v61  ;;  %v5683_v19 = vadd.f32 %v12089_v36, %v12407_v31 }
 0x44a   :  { %v7309_v49 = vpop.f32.mrb[10].mxu0  ;;  %6686 = vmatprep.mubr.bf16.mxu1 %v11062_v57  ;;  %v11067_v46 = vld [vmem:[#allocation3 + $0x888] ss:$36 sps:$4 sm:$0xff]   ;;  %v11070_v32 = vld [vmem:[#allocation3 + $0x1178] ss:$36 sps:$4 sm:$0xff]  }
 0x44b   :  { %v12593_v5 = vadd.f32 %v7309_v49, %v5675_v62  ;;  %v7311_v47 = vpop.f32.mrb[11].mxu0 }
 0x44c   :  { %v12595_v11 = vpop.f32.mrb[136].mxu1 }
 0x44d   :  { %v6474_v54 = vpop.f32.mrb[137].mxu1  ;;  %7521 = vmatmul.mubr.bf16.gmra.mrb[116].mxu0 %v11061_v3  ;;  %v11071_v3 = vld [vmem:[#allocation3 + $0x8d4] ss:$36 sps:$4 sm:$0xff]  }
 0x44e   :  { %v12597_v41 = vpop.f32.mrb[138].mxu1  ;;  %7528 = vmatprep.mubr.bf16.mxu0 %v11065_v33 }
 0x44f   :  { %v6477_v27 = vpop.f32.mrb[139].mxu1 }
 0x450   :  { %v7314_v42 = vpop.f32.mrb[12].mxu0 }
 0x451   :  { %v12601_v59 = vadd.f32 %v7314_v42, %v5680_v10  ;;  %6687 = vmatmul.mubr.bf16.gmra.mrb[244].mxu1 %v11064_v24  ;;  %v7316_v57 = vpop.f32.mrb[13].mxu0  ;;  %v11074_v24 = vld [vmem:[#allocation3 + $0x11c4] ss:$36 sps:$4 sm:$0xff]   ;;  %v5688_v10 = vadd.f32 %v12091_v25, %v12414_v40  ;;  %v5691_v42 = vadd.f32 %v12093_v50, %v12421_v12 }
 0x452   :  { %v7317_v62 = vpop.f32.mrb[14].mxu0  ;;  %6694 = vmatprep.mubr.bf16.mxu1 %v11068_v17  ;;  %v11073_v57 = vld [vmem:[#allocation3 + $0x8d0] ss:$36 sps:$4 sm:$0xff]   ;;  %v11076_v25 = vld [vmem:[#allocation3 + $0x11c0] ss:$36 sps:$4 sm:$0xff]  }
 0x453   :  { %v12605_v49 = vadd.f32 %v7317_v62, %v5683_v19  ;;  %v7319_v33 = vpop.f32.mrb[15].mxu0 }
 0x454   :  { %v12607_v47 = vpop.f32.mrb[140].mxu1 }
 0x455   :  { %v6482_v54 = vpop.f32.mrb[141].mxu1  ;;  %7529 = vmatmul.mubr.bf16.gmra.mrb[120].mxu0 %v11067_v46  ;;  %v11077_v46 = vld [vmem:[#allocation3 + $0x91c] ss:$36 sps:$4 sm:$0xff]  }
 0x456   :  { %v12609_v61 = vpop.f32.mrb[142].mxu1  ;;  %7536 = vmatprep.mubr.bf16.mxu0 %v11071_v3 }
 0x457   :  { %v6485_v36 = vpop.f32.mrb[143].mxu1 }
 0x458   :  { %v7322_v31 = vpop.f32.mrb[16].mxu0 }
 0x459   :  { %v12613_v27 = vadd.f32 %v7322_v31, %v5688_v10  ;;  %6695 = vmatmul.mubr.bf16.gmra.mrb[248].mxu1 %v11070_v32  ;;  %v7324_v17 = vpop.f32.mrb[17].mxu0  ;;  %v11080_v32 = vld [vmem:[#allocation3 + $0x20] ss:$36 sps:$4 sm:$0xff]   ;;  %v5696_v10 = vadd.f32 %v12095_v60, %v12428_v44  ;;  %v5699_v31 = vadd.f32 %v12097_v56, %v12435_v8  ;;  %v11081_v60 = vld [vmem:[#allocation3 + $0x68] ss:$36 sps:$4 sm:$0xff]  }
 0x45a   :  { %v7325_v19 = vpop.f32.mrb[18].mxu0  ;;  %6702 = vmatprep.mubr.bf16.mxu1 %v11074_v24  ;;  %v11079_v17 = vld [vmem:[#allocation3 + $0x918] ss:$36 sps:$4 sm:$0xff]  }
 0x45b   :  { %v12617_v62 = vadd.f32 %v7325_v19, %v5691_v42  ;;  %v7327_v3 = vpop.f32.mrb[19].mxu0 }
 0x45c   :  { %v12619_v33 = vpop.f32.mrb[144].mxu1 }
 0x45d   :  { %v6490_v54 = vpop.f32.mrb[145].mxu1  ;;  %7537 = vmatmul.mubr.bf16.gmra.mrb[124].mxu0 %v11073_v57  ;;  %v11082_v57 = vld [vmem:[#allocation3 + $0x964] ss:$36 sps:$4 sm:$0xff]  }
 0x45e   :  { %v12621_v40 = vpop.f32.mrb[146].mxu1  ;;  %7544 = vmatprep.mubr.bf16.mxu0 %v11077_v46 }
 0x45f   :  { %v6493_v50 = vpop.f32.mrb[147].mxu1 }
 0x460   :  { %v7330_v12 = vpop.f32.mrb[20].mxu0 }
 0x461   :  { %v12625_v36 = vadd.f32 %v7330_v12, %v5696_v10  ;;  %6703 = vmatmul.mubr.bf16.gmra.mrb[252].mxu1 %v11076_v25  ;;  %v7332_v24 = vpop.f32.mrb[21].mxu0  ;;  %v11085_v25 = vld [vmem:[#allocation3 + $0xb0] ss:$36 sps:$4 sm:$0xff]   ;;  %v5704_v10 = vadd.f32 %v12099_v43, %v12442_v30  ;;  %v5707_v12 = vadd.f32 %v12101_v51, %v12449_v26  ;;  %v11086_v43 = vld [vmem:[#allocation3 + $0xf8] ss:$36 sps:$4 sm:$0xff]  }
 0x462   :  { %v7333_v42 = vpop.f32.mrb[22].mxu0  ;;  %9407 = vmatprep.mubr.bf16.mxu1 %v11080_v32  ;;  %v11084_v24 = vld [vmem:[#allocation3 + $0x960] ss:$36 sps:$4 sm:$0xff]  }
 0x463   :  { %v12629_v19 = vadd.f32 %v7333_v42, %v5699_v31  ;;  %v7335_v46 = vpop.f32.mrb[23].mxu0 }
 0x464   :  { %v12631_v3 = vpop.f32.mrb[148].mxu1 }
 0x465   :  { %v6498_v54 = vpop.f32.mrb[149].mxu1  ;;  %7545 = vmatmul.mubr.bf16.gmra.mrb[128].mxu0 %v11079_v17  ;;  %v11087_v17 = vld [vmem:[#allocation3 + $0x9ac] ss:$36 sps:$4 sm:$0xff]  }
 0x466   :  { %v12633_v44 = vpop.f32.mrb[150].mxu1  ;;  %7552 = vmatprep.mubr.bf16.mxu0 %v11082_v57 }
 0x467   :  { %v6501_v56 = vpop.f32.mrb[151].mxu1 }
 0x468   :  { %v7338_v8 = vpop.f32.mrb[24].mxu0 }
 0x469   :  { %v12637_v50 = vadd.f32 %v7338_v8, %v5704_v10  ;;  %v7340_v32 = vpop.f32.mrb[25].mxu0  ;;  %9408 = vmatmul.mubr.bf16.vlgmr.msra.gmra.mrb[0].mxu1 %v11081_v60  ;;  %v11090_v10 = vld [vmem:[#allocation3 + $0x140] ss:$36 sps:$4 sm:$0xff]   ;;  %v5712_v60 = vadd.f32 %v12103_v58, %v12456_v55  ;;  %v5715_v8 = vadd.f32 %v12105_v0, %v12463_v4  ;;  %v11091_v58 = vld [vmem:[#allocation3 + $0x188] ss:$36 sps:$4 sm:$0xff]  }
 0x46a   :  { %v7341_v31 = vpop.f32.mrb[26].mxu0  ;;  %9411 = vmatprep.mubr.bf16.mxu1 %v11085_v25  ;;  %v11089_v32 = vld [vmem:[#allocation3 + $0x9a8] ss:$36 sps:$4 sm:$0xff]  }
 0x46b   :  { %v12641_v42 = vadd.f32 %v7341_v31, %v5707_v12  ;;  %v7343_v57 = vpop.f32.mrb[27].mxu0 }
 0x46c   :  { %v12643_v46 = vpop.f32.mrb[152].mxu1 }
 0x46d   :  { %v6506_v54 = vpop.f32.mrb[153].mxu1  ;;  %7553 = vmatmul.mubr.bf16.gmra.mrb[132].mxu0 %v11084_v24  ;;  %v11092_v24 = vld [vmem:[#allocation3 + $0x9f4] ss:$36 sps:$4 sm:$0xff]  }
 0x46e   :  { %v12645_v30 = vpop.f32.mrb[154].mxu1  ;;  %7560 = vmatprep.mubr.bf16.mxu0 %v11087_v17 }
 0x46f   :  { %v6509_v51 = vpop.f32.mrb[155].mxu1 }
 0x470   :  { %v7346_v26 = vpop.f32.mrb[28].mxu0 }
 0x471   :  { %v12649_v56 = vadd.f32 %v7346_v26, %v5712_v60  ;;  %v7348_v25 = vpop.f32.mrb[29].mxu0  ;;  %9412 = vmatmul.mubr.bf16.gmra.mrb[4].mxu1 %v11086_v43  ;;  %v11095_v60 = vld [vmem:[#allocation3 + $0x1d0] ss:$36 sps:$4 sm:$0xff]   ;;  %v5720_v43 = vadd.f32 %v12107_v52, %v12470_v37  ;;  %v5723_v26 = vadd.f32 %v12109_v16, %v12477_v7  ;;  %v11096_v52 = vld [vmem:[#allocation3 + $0x218] ss:$36 sps:$4 sm:$0xff]  }
 0x472   :  { %v7349_v12 = vpop.f32.mrb[30].mxu0  ;;  %9415 = vmatprep.mubr.bf16.mxu1 %v11090_v10  ;;  %v11094_v25 = vld [vmem:[#allocation3 + $0x9f0] ss:$36 sps:$4 sm:$0xff]  }
 0x473   :  { %v12653_v31 = vadd.f32 %v7349_v12, %v5715_v8  ;;  %v7351_v17 = vpop.f32.mrb[31].mxu0 }
 0x474   :  { %v12655_v57 = vpop.f32.mrb[156].mxu1 }
 0x475   :  { %v6514_v54 = vpop.f32.mrb[157].mxu1  ;;  %7561 = vmatmul.mubr.bf16.gmra.mrb[136].mxu0 %v11089_v32  ;;  %v11097_v32 = vld [vmem:[#allocation3 + $0xa3c] ss:$36 sps:$4 sm:$0xff]  }
 0x476   :  { %v12657_v55 = vpop.f32.mrb[158].mxu1  ;;  %7568 = vmatprep.mubr.bf16.mxu0 %v11092_v24 }
 0x477   :  { %v6517_v0 = vpop.f32.mrb[159].mxu1 }
 0x478   :  { %v7354_v4 = vpop.f32.mrb[32].mxu0 }
 0x479   :  { %v12661_v51 = vadd.f32 %v7354_v4, %v5720_v43  ;;  %v7356_v10 = vpop.f32.mrb[33].mxu0  ;;  %9416 = vmatmul.mubr.bf16.gmra.mrb[8].mxu1 %v11091_v58  ;;  %v11100_v43 = vld [vmem:[#allocation3 + $0x260] ss:$36 sps:$4 sm:$0xff]   ;;  %v5728_v58 = vadd.f32 %v12111_v20, %v12484_v14  ;;  %v5731_v4 = vadd.f32 %v12113_v23, %v12491_v48  ;;  %v11101_v20 = vld [vmem:[#allocation3 + $0x2a8] ss:$36 sps:$4 sm:$0xff]  }
 0x47a   :  { %v7357_v8 = vpop.f32.mrb[34].mxu0  ;;  %9419 = vmatprep.mubr.bf16.mxu1 %v11095_v60  ;;  %v11099_v10 = vld [vmem:[#allocation3 + $0xa38] ss:$36 sps:$4 sm:$0xff]  }
 0x47b   :  { %v12665_v12 = vadd.f32 %v7357_v8, %v5723_v26  ;;  %v7359_v24 = vpop.f32.mrb[35].mxu0 }
 0x47c   :  { %v12667_v17 = vpop.f32.mrb[160].mxu1 }
 0x47d   :  { %13648 = vst [vmem:[#allocation51_spill] sm:$0xff] %v12667_v17  ;;  %v6522_v54 = vpop.f32.mrb[161].mxu1  ;;  %7569 = vmatmul.mubr.bf16.gmra.mrb[140].mxu0 %v11094_v25  ;;  %v11102_v25 = vld [vmem:[#allocation3 + $0xa84] ss:$36 sps:$4 sm:$0xff]  }
 0x47e   :  { %v12669_v37 = vpop.f32.mrb[162].mxu1  ;;  %7576 = vmatprep.mubr.bf16.mxu0 %v11097_v32 }
 0x47f   :  { %13649 = vst [vmem:[#allocation52_spill] sm:$0xff] %v12669_v37  ;;  %v6525_v16 = vpop.f32.mrb[163].mxu1  ;;  %v11129_v37 = vld [vmem:[#allocation3 + $0xbe8] ss:$36 sps:$4 sm:$0xff]  }
 0x480   :  { %v7362_v7 = vpop.f32.mrb[36].mxu0 }
 0x481   :  { %v12673_v0 = vadd.f32 %v7362_v7, %v5728_v58  ;;  %v7364_v60 = vpop.f32.mrb[37].mxu0  ;;  %9420 = vmatmul.mubr.bf16.gmra.mrb[12].mxu1 %v11096_v52  ;;  %v11105_v58 = vld [vmem:[#allocation3 + $0x2f0] ss:$36 sps:$4 sm:$0xff]   ;;  %v5736_v52 = vadd.f32 %v12115_v29, %v12498_v63  ;;  %v5739_v7 = vadd.f32 %v12117_v35, %v12505_v53  ;;  %v11106_v29 = vld [vmem:[#allocation3 + $0x338] ss:$36 sps:$4 sm:$0xff]  }
 0x482   :  { %v7365_v26 = vpop.f32.mrb[38].mxu0  ;;  %9423 = vmatprep.mubr.bf16.mxu1 %v11100_v43  ;;  %v11104_v60 = vld [vmem:[#allocation3 + $0xa80] ss:$36 sps:$4 sm:$0xff]  }
 0x483   :  { %v12677_v8 = vadd.f32 %v7365_v26, %v5731_v4  ;;  %v7367_v32 = vpop.f32.mrb[39].mxu0 }
 0x484   :  { %v12679_v24 = vpop.f32.mrb[164].mxu1 }
 0x485   :  { %13650 = vst [vmem:[#allocation53_spill] sm:$0xff] %v12679_v24  ;;  %v6530_v54 = vpop.f32.mrb[165].mxu1  ;;  %7577 = vmatmul.mubr.bf16.gmra.mrb[144].mxu0 %v11099_v10  ;;  %v11107_v10 = vld [vmem:[#allocation3 + $0xacc] ss:$36 sps:$4 sm:$0xff]  }
 0x486   :  { %v12681_v14 = vpop.f32.mrb[166].mxu1  ;;  %7584 = vmatprep.mubr.bf16.mxu0 %v11102_v25 }
 0x487   :  { %13651 = vst [vmem:[#allocation54_spill] sm:$0xff] %v12681_v14  ;;  %v6533_v23 = vpop.f32.mrb[167].mxu1 }
 0x488   :  { %v7370_v48 = vpop.f32.mrb[40].mxu0 }
 0x489   :  { %v12685_v16 = vadd.f32 %v7370_v48, %v5736_v52  ;;  %v7372_v43 = vpop.f32.mrb[41].mxu0  ;;  %9424 = vmatmul.mubr.bf16.gmra.mrb[16].mxu1 %v11101_v20  ;;  %v11110_v52 = vld [vmem:[#allocation3 + $0x380] ss:$36 sps:$4 sm:$0xff]   ;;  %v5744_v20 = vadd.f32 %v12119_v45, %v12512_v34  ;;  %v5747_v48 = vadd.f32 %v12121_v39, %v12519_v15  ;;  %v11111_v45 = vld [vmem:[#allocation3 + $0x3c8] ss:$36 sps:$4 sm:$0xff]  }
 0x48a   :  { %v7373_v4 = vpop.f32.mrb[42].mxu0  ;;  %9427 = vmatprep.mubr.bf16.mxu1 %v11105_v58  ;;  %v11109_v43 = vld [vmem:[#allocation3 + $0xac8] ss:$36 sps:$4 sm:$0xff]  }
 0x48b   :  { %v12689_v26 = vadd.f32 %v7373_v4, %v5739_v7  ;;  %v7375_v25 = vpop.f32.mrb[43].mxu0 }
 0x48c   :  { %v12691_v32 = vpop.f32.mrb[168].mxu1 }
 0x48d   :  { %13652 = vst [vmem:[#allocation55_spill] sm:$0xff] %v12691_v32  ;;  %v6538_v54 = vpop.f32.mrb[169].mxu1  ;;  %7585 = vmatmul.mubr.bf16.gmra.mrb[148].mxu0 %v11104_v60  ;;  %v11112_v60 = vld [vmem:[#allocation3 + $0xb14] ss:$36 sps:$4 sm:$0xff]  }
 0x48e   :  { %v12693_v63 = vpop.f32.mrb[170].mxu1  ;;  %7592 = vmatprep.mubr.bf16.mxu0 %v11107_v10 }
 0x48f   :  { %13653 = vst [vmem:[#allocation56_spill] sm:$0xff] %v12693_v63  ;;  %v6541_v35 = vpop.f32.mrb[171].mxu1 }
 0x490   :  { %v7378_v53 = vpop.f32.mrb[44].mxu0 }
 0x491   :  { %v12697_v23 = vadd.f32 %v7378_v53, %v5744_v20  ;;  %v7380_v58 = vpop.f32.mrb[45].mxu0  ;;  %9428 = vmatmul.mubr.bf16.gmra.mrb[20].mxu1 %v11106_v29  ;;  %v11115_v20 = vld [vmem:[#allocation3 + $0x410] ss:$36 sps:$4 sm:$0xff]   ;;  %v13656_v29 = vld [vmem:[#allocation6_spill] sm:$0xff] }
 0x492   :  { %v7381_v7 = vpop.f32.mrb[46].mxu0  ;;  %9431 = vmatprep.mubr.bf16.mxu1 %v11110_v52  ;;  %v5752_v35 = vadd.f32 %v13656_v29, %v12526_v28  ;;  %v13657_v58 = vld [vmem:[#allocation42_spill] sm:$0xff]  ;;  %v11116_v28 = vld [vmem:[#allocation3 + $0x458] ss:$36 sps:$4 sm:$0xff]  }
 0x493   :  { %v12701_v4 = vadd.f32 %v7381_v7, %v5747_v48  ;;  %v7383_v10 = vpop.f32.mrb[47].mxu0  ;;  %v13658_v48 = vld [vmem:[#allocation7_spill] sm:$0xff] }
 0x494   :  { %v12703_v25 = vpop.f32.mrb[172].mxu1  ;;  %v5755_v7 = vadd.f32 %v13658_v48, %v13657_v58  ;;  %v11114_v10 = vld [vmem:[#allocation3 + $0xb10] ss:$36 sps:$4 sm:$0xff]  }
 0x495   :  { %13654 = vst [vmem:[#allocation57_spill] sm:$0xff] %v12703_v25  ;;  %v6546_v54 = vpop.f32.mrb[173].mxu1  ;;  %7593 = vmatmul.mubr.bf16.gmra.mrb[152].mxu0 %v11109_v43  ;;  %v11117_v43 = vld [vmem:[#allocation3 + $0xb5c] ss:$36 sps:$4 sm:$0xff]  }
 0x496   :  { %v12705_v34 = vpop.f32.mrb[174].mxu1  ;;  %7600 = vmatprep.mubr.bf16.mxu0 %v11112_v60 }
 0x497   :  { %13655 = vst [vmem:[#allocation58_spill] sm:$0xff] %v12705_v34  ;;  %v6549_v39 = vpop.f32.mrb[175].mxu1 }
 0x498   :  { %v7386_v15 = vpop.f32.mrb[48].mxu0  ;;  %v13662_v39 = vld [vmem:[#allocation8_spill] sm:$0xff] }
 0x499   :  { %v12709_v53 = vadd.f32 %v7386_v15, %v5752_v35  ;;  %v7388_v52 = vpop.f32.mrb[49].mxu0  ;;  %9432 = vmatmul.mubr.bf16.gmra.mrb[24].mxu1 %v11111_v45  ;;  %v11120_v35 = vld [vmem:[#allocation3 + $0x4a0] ss:$36 sps:$4 sm:$0xff]   ;;  %v13661_v45 = vld [vmem:[#allocation44_spill] sm:$0xff] }
 0x49a   :  { %v7389_v54 = vpop.f32.mrb[50].mxu0  ;;  %9435 = vmatprep.mubr.bf16.mxu1 %v11115_v20  ;;  %v5760_v15 = vadd.f32 %v13662_v39, %v13661_v45  ;;  %v11121_v45 = vld [vmem:[#allocation3 + $0x4e8] ss:$36 sps:$4 sm:$0xff]  }
 0x49b   :  { %v12713_v25 = vadd.f32 %v7389_v54, %v5755_v7  ;;  %v7391_v60 = vpop.f32.mrb[51].mxu0  ;;  %v13663_v7 = vld [vmem:[#allocation46_spill] sm:$0xff]  ;;  %v13664_v54 = vld [vmem:[#allocation9_spill] sm:$0xff] }
 0x49c   :  { %v12715_v34 = vpop.f32.mrb[176].mxu1  ;;  %v5763_v60 = vadd.f32 %v13664_v54, %v13663_v7 }
 0x49d   :  { %13659 = vst [vmem:[#allocation6_spill] sm:$0xff] %v12715_v34  ;;  %v6554_v63 = vpop.f32.mrb[177].mxu1  ;;  %7601 = vmatmul.mubr.bf16.gmra.mrb[156].mxu0 %v11114_v10  ;;  %v11119_v34 = vld [vmem:[#allocation3 + $0xb58] ss:$36 sps:$4 sm:$0xff]   ;;  %v11122_v10 = vld [vmem:[#allocation3 + $0xba4] ss:$36 sps:$4 sm:$0xff]  }
 0x49e   :  { %v12717_v29 = vpop.f32.mrb[178].mxu1  ;;  %7608 = vmatprep.mubr.bf16.mxu0 %v11117_v43 }
 0x49f   :  { %13660 = vst [vmem:[#allocation42_spill] sm:$0xff] %v12717_v29  ;;  %v6557_v52 = vpop.f32.mrb[179].mxu1 }
 0x4a0   :  { %v7394_v58 = vpop.f32.mrb[52].mxu0  ;;  %v13668_v52 = vld [vmem:[#allocation10_spill] sm:$0xff] }
 0x4a1   :  { %v12721_v48 = vadd.f32 %v7394_v58, %v5760_v15  ;;  %v7396_v20 = vpop.f32.mrb[53].mxu0  ;;  %9436 = vmatmul.mubr.bf16.gmra.mrb[28].mxu1 %v11116_v28  ;;  %v11125_v15 = vld [vmem:[#allocation3 + $0x530] ss:$36 sps:$4 sm:$0xff]  }
 0x4a2   :  { %v7397_v63 = vpop.f32.mrb[54].mxu0  ;;  %9439 = vmatprep.mubr.bf16.mxu1 %v11120_v35  ;;  %v13667_v28 = vld [vmem:[#allocation48_spill] sm:$0xff] }
 0x4a3   :  { %v12725_v32 = vadd.f32 %v7397_v63, %v5763_v60  ;;  %v7399_v43 = vpop.f32.mrb[55].mxu0  ;;  %v5768_v58 = vadd.f32 %v13668_v52, %v13667_v28  ;;  %v13669_v60 = vld [vmem:[#allocation11_spill] sm:$0xff]  ;;  %v11126_v52 = vld [vmem:[#allocation3 + $0x578] ss:$36 sps:$4 sm:$0xff]  }
 0x4a4   :  { %v12727_v29 = vpop.f32.mrb[180].mxu1  ;;  %v5771_v63 = vadd.f32 %v13669_v60, %v12563_v18  ;;  %v11124_v43 = vld [vmem:[#allocation3 + $0xba0] ss:$36 sps:$4 sm:$0xff]  }
 0x4a5   :  { %13665 = vst [vmem:[#allocation7_spill] sm:$0xff] %v12727_v29  ;;  %v6562_v14 = vpop.f32.mrb[181].mxu1  ;;  %7609 = vmatmul.mubr.bf16.gmra.mrb[160].mxu0 %v11119_v34  ;;  %v11127_v34 = vld [vmem:[#allocation3 + $0xbec] ss:$36 sps:$4 sm:$0xff]  }
 0x4a6   :  { %v12729_v39 = vpop.f32.mrb[182].mxu1  ;;  %7616 = vmatprep.mubr.bf16.mxu0 %v11122_v10 }
 0x4a7   :  { %13666 = vst [vmem:[#allocation44_spill] sm:$0xff] %v12729_v39  ;;  %v6565_v20 = vpop.f32.mrb[183].mxu1  ;;  %v2190_v39 = vpop.permute.xlu1 %2189 }
 0x4a8   :  { %v7402_v7 = vpop.f32.mrb[56].mxu0 }
 0x4a9   :  { %v12733_v54 = vadd.f32 %v7402_v7, %v5768_v58  ;;  %v7404_v35 = vpop.f32.mrb[57].mxu0  ;;  %9440 = vmatmul.mubr.bf16.gmra.mrb[32].mxu1 %v11121_v45  ;;  %v2195_v58 = vpop.permute.xlu0 %2194  ;;  %v11130_v45 = vld [vmem:[#allocation3 + $0x5c0] ss:$36 sps:$4 sm:$0xff]   ;;  %v13673_v7 = vld [vmem:[#allocation12_spill] sm:$0xff] }
 0x4aa   :  { %v7405_v14 = vpop.f32.mrb[58].mxu0  ;;  %9443 = vmatprep.mubr.bf16.mxu1 %v11125_v15  ;;  %v5776_v18 = vadd.f32 %v13673_v7, %v2190_v39  ;;  %v11131_v39 = vld [vmem:[#allocation3 + $0x608] ss:$36 sps:$4 sm:$0xff]  }
 0x4ab   :  { %v12737_v29 = vadd.f32 %v7405_v14, %v5771_v63  ;;  %v7407_v10 = vpop.f32.mrb[59].mxu0  ;;  %v13674_v14 = vld [vmem:[#allocation13_spill] sm:$0xff] }
 0x4ac   :  { %v12739_v24 = vpop.f32.mrb[184].mxu1  ;;  %v5779_v10 = vadd.f32 %v13674_v14, %v2195_v58  ;;  %v13678_v58 = vld [vmem:[#allocation14_spill] sm:$0xff] }
 0x4ad   :  { %13670 = vst [vmem:[#allocation8_spill] sm:$0xff] %v12737_v29  ;;  %13671 = vst [vmem:[#allocation46_spill] sm:$0xff] %v12739_v24  ;;  %v6570_v28 = vpop.f32.mrb[185].mxu1  ;;  %7617 = vmatmul.mubr.bf16.gmra.mrb[164].mxu0 %v11124_v43  ;;  %v11132_v43 = vld [vmem:[#allocation3 + $0xc34] ss:$36 sps:$4 sm:$0xff]   ;;  %v2205_v7 = vpop.permute.xlu0 %2204 }
 0x4ae   :  { %v12741_v20 = vpop.f32.mrb[186].mxu1  ;;  %7624 = vmatprep.mubr.bf16.mxu0 %v11127_v34 }
 0x4af   :  { %13672 = vst [vmem:[#allocation9_spill] sm:$0xff] %v12741_v20  ;;  %v6573_v35 = vpop.f32.mrb[187].mxu1  ;;  %v2200_v20 = vpop.permute.xlu1 %2199 }
 0x4b0   :  { %v7410_v60 = vpop.f32.mrb[60].mxu0 }
 0x4b1   :  { %v12744_v15 = vadd.f32 %v7410_v60, %v5776_v18  ;;  %v7412_v63 = vpop.f32.mrb[61].mxu0  ;;  %9444 = vmatmul.mubr.bf16.gmra.mrb[36].mxu1 %v11126_v52  ;;  %v11135_v52 = vld [vmem:[#allocation3 + $0x650] ss:$36 sps:$4 sm:$0xff]   ;;  %v9631_v60 = vadd.f32 %v13678_v58, %v2200_v20  ;;  %v11136_v20 = vld [vmem:[#allocation3 + $0x698] ss:$36 sps:$4 sm:$0xff]   ;;  %v2215_v58 = vpop.permute.xlu0 %2214 }
 0x4b2   :  { %v7413_v24 = vpop.f32.mrb[62].mxu0  ;;  %9447 = vmatprep.mubr.bf16.mxu1 %v11130_v45 }
 0x4b3   :  { %v12747_v28 = vadd.f32 %v7413_v24, %v5779_v10  ;;  %v7415_v29 = vpop.f32.mrb[63].mxu0  ;;  %v11134_v10 = vld [vmem:[#allocation3 + $0xc30] ss:$36 sps:$4 sm:$0xff]  }
 0x4b4   :  { %v12749_v34 = vpop.f32.mrb[188].mxu1  ;;  %v13680_v29 = vld [vmem:[#allocation15_spill] sm:$0xff] }
 0x4b5   :  { %13675 = vst [vmem:[#allocation48_spill] sm:$0xff] %v12747_v28  ;;  %13676 = vst [vmem:[#allocation10_spill] sm:$0xff] %v12749_v34  ;;  %v6578_v17 = vpop.f32.mrb[189].mxu1  ;;  %7625 = vmatmul.mubr.bf16.gmra.mrb[168].mxu0 %v11129_v37  ;;  %v9633_v14 = vadd.f32 %v13680_v29, %v2205_v7  ;;  %v13684_v7 = vld [vmem:[#allocation16_spill] sm:$0xff] }
 0x4b6   :  { %v12751_v18 = vpop.f32.mrb[190].mxu1  ;;  %7632 = vmatprep.mubr.bf16.mxu0 %v11132_v43  ;;  %v11137_v17 = vld [vmem:[#allocation3 + $0xc7c] ss:$36 sps:$4 sm:$0xff]  }
 0x4b7   :  { %13677 = vst [vmem:[#allocation11_spill] sm:$0xff] %v12751_v18  ;;  %v6581_v35 = vpop.f32.mrb[191].mxu1  ;;  %v2210_v18 = vpop.permute.xlu1 %2209 }
 0x4b8   :  { %v7418_v63 = vpop.f32.mrb[64].mxu0 }
 0x4b9   :  { %v12754_v45 = vadd.f32 %v9631_v60, %v7418_v63  ;;  %v7420_v24 = vpop.f32.mrb[65].mxu0  ;;  %9448 = vmatmul.mubr.bf16.gmra.mrb[40].mxu1 %v11131_v39  ;;  %v11140_v39 = vld [vmem:[#allocation3 + $0x6e0] ss:$36 sps:$4 sm:$0xff]  }
 0x4ba   :  { %v7421_v34 = vpop.f32.mrb[66].mxu0  ;;  %9451 = vmatprep.mubr.bf16.mxu1 %v11135_v52  ;;  %v9635_v24 = vadd.f32 %v13684_v7, %v2210_v18  ;;  %v11141_v18 = vld [vmem:[#allocation3 + $0x728] ss:$36 sps:$4 sm:$0xff]   ;;  %v2225_v7 = vpop.permute.xlu0 %2224 }
 0x4bb   :  { %13679 = vst [vmem:[#allocation12_spill] sm:$0xff] %v12754_v45  ;;  %v12757_v37 = vadd.f32 %v9633_v14, %v7421_v34  ;;  %v7423_v28 = vpop.f32.mrb[67].mxu0 }
 0x4bc   :  { %v12759_v43 = vpop.f32.mrb[192].mxu1  ;;  %v13686_v28 = vld [vmem:[#allocation17_spill] sm:$0xff] }
 0x4bd   :  { %13681 = vst [vmem:[#allocation13_spill] sm:$0xff] %v12757_v37  ;;  %13682 = vst [vmem:[#allocation14_spill] sm:$0xff] %v12759_v43  ;;  %v6586_v35 = vpop.f32.mrb[193].mxu1  ;;  %7633 = vmatmul.mubr.bf16.gmra.mrb[172].mxu0 %v11134_v10  ;;  %v9637_v14 = vadd.f32 %v13686_v28, %v2215_v58  ;;  %v11139_v37 = vld [vmem:[#allocation3 + $0xc78] ss:$36 sps:$4 sm:$0xff]   ;;  %v13690_v58 = vld [vmem:[#allocation18_spill] sm:$0xff] }
 0x4be   :  { %v12761_v60 = vpop.f32.mrb[194].mxu1  ;;  %7640 = vmatprep.mubr.bf16.mxu0 %v11137_v17  ;;  %v11142_v10 = vld [vmem:[#allocation3 + $0xcc4] ss:$36 sps:$4 sm:$0xff]  }
 0x4bf   :  { %13683 = vst [vmem:[#allocation15_spill] sm:$0xff] %v12761_v60  ;;  %v6589_v63 = vpop.f32.mrb[195].mxu1  ;;  %v2220_v60 = vpop.permute.xlu1 %2219 }
 0x4c0   :  { %v7426_v29 = vpop.f32.mrb[68].mxu0 }
 0x4c1   :  { %v12764_v52 = vadd.f32 %v9635_v24, %v7426_v29  ;;  %v7428_v34 = vpop.f32.mrb[69].mxu0  ;;  %9452 = vmatmul.mubr.bf16.gmra.mrb[44].mxu1 %v11136_v20  ;;  %v11145_v20 = vld [vmem:[#allocation3 + $0x770] ss:$36 sps:$4 sm:$0xff]  }
 0x4c2   :  { %v7429_v43 = vpop.f32.mrb[70].mxu0  ;;  %9455 = vmatprep.mubr.bf16.mxu1 %v11140_v39  ;;  %v9639_v34 = vadd.f32 %v13690_v58, %v2220_v60  ;;  %v11146_v60 = vld [vmem:[#allocation3 + $0x7b8] ss:$36 sps:$4 sm:$0xff]   ;;  %v2235_v58 = vpop.permute.xlu0 %2234 }
 0x4c3   :  { %13685 = vst [vmem:[#allocation16_spill] sm:$0xff] %v12764_v52  ;;  %v12767_v35 = vadd.f32 %v9637_v14, %v7429_v43  ;;  %v7431_v45 = vpop.f32.mrb[71].mxu0 }
 0x4c4   :  { %v12769_v17 = vpop.f32.mrb[196].mxu1  ;;  %v13692_v45 = vld [vmem:[#allocation19_spill] sm:$0xff] }
 0x4c5   :  { %13687 = vst [vmem:[#allocation17_spill] sm:$0xff] %v12767_v35  ;;  %13688 = vst [vmem:[#allocation59_spill] sm:$0xff] %v12769_v17  ;;  %v6594_v63 = vpop.f32.mrb[197].mxu1  ;;  %7641 = vmatmul.mubr.bf16.gmra.mrb[176].mxu0 %v11139_v37  ;;  %v9641_v14 = vadd.f32 %v13692_v45, %v2225_v7  ;;  %v11144_v35 = vld [vmem:[#allocation3 + $0xcc0] ss:$36 sps:$4 sm:$0xff]   ;;  %v13696_v7 = vld [vmem:[#allocation20_spill] sm:$0xff] }
 0x4c6   :  { %v12771_v24 = vpop.f32.mrb[198].mxu1  ;;  %7648 = vmatprep.mubr.bf16.mxu0 %v11142_v10  ;;  %v11147_v37 = vld [vmem:[#allocation3 + $0xd0c] ss:$36 sps:$4 sm:$0xff]  }
 0x4c7   :  { %13689 = vst [vmem:[#allocation60_spill] sm:$0xff] %v12771_v24  ;;  %v6597_v29 = vpop.f32.mrb[199].mxu1  ;;  %v2230_v24 = vpop.permute.xlu1 %2229 }
 0x4c8   :  { %v7434_v28 = vpop.f32.mrb[72].mxu0 }
 0x4c9   :  { %v12774_v39 = vadd.f32 %v9639_v34, %v7434_v28  ;;  %v7436_v43 = vpop.f32.mrb[73].mxu0  ;;  %9456 = vmatmul.mubr.bf16.gmra.mrb[48].mxu1 %v11141_v18  ;;  %v11150_v18 = vld [vmem:[#allocation3 + $0x800] ss:$36 sps:$4 sm:$0xff]  }
 0x4ca   :  { %v7437_v17 = vpop.f32.mrb[74].mxu0  ;;  %9459 = vmatprep.mubr.bf16.mxu1 %v11145_v20  ;;  %v9643_v43 = vadd.f32 %v13696_v7, %v2230_v24  ;;  %v11151_v24 = vld [vmem:[#allocation3 + $0x848] ss:$36 sps:$4 sm:$0xff]   ;;  %v2245_v7 = vpop.permute.xlu0 %2244 }
 0x4cb   :  { %13691 = vst [vmem:[#allocation18_spill] sm:$0xff] %v12774_v39  ;;  %v12777_v63 = vadd.f32 %v9641_v14, %v7437_v17  ;;  %v7439_v52 = vpop.f32.mrb[75].mxu0 }
 0x4cc   :  { %v12779_v10 = vpop.f32.mrb[200].mxu1  ;;  %v13698_v52 = vld [vmem:[#allocation21_spill] sm:$0xff] }
 0x4cd   :  { %13693 = vst [vmem:[#allocation19_spill] sm:$0xff] %v12777_v63  ;;  %13694 = vst [vmem:[#allocation61_spill] sm:$0xff] %v12779_v10  ;;  %v6602_v29 = vpop.f32.mrb[201].mxu1  ;;  %7649 = vmatmul.mubr.bf16.gmra.mrb[180].mxu0 %v11144_v35  ;;  %v9645_v14 = vadd.f32 %v13698_v52, %v2235_v58  ;;  %v11149_v63 = vld [vmem:[#allocation3 + $0xd08] ss:$36 sps:$4 sm:$0xff]   ;;  %v13702_v58 = vld [vmem:[#allocation22_spill] sm:$0xff] }
 0x4ce   :  { %v12781_v34 = vpop.f32.mrb[202].mxu1  ;;  %7656 = vmatprep.mubr.bf16.mxu0 %v11147_v37  ;;  %v11152_v35 = vld [vmem:[#allocation3 + $0xd54] ss:$36 sps:$4 sm:$0xff]  }
 0x4cf   :  { %13695 = vst [vmem:[#allocation62_spill] sm:$0xff] %v12781_v34  ;;  %v6605_v28 = vpop.f32.mrb[203].mxu1  ;;  %v2240_v34 = vpop.permute.xlu1 %2239 }
 0x4d0   :  { %v7442_v45 = vpop.f32.mrb[76].mxu0 }
 0x4d1   :  { %v12784_v20 = vadd.f32 %v9643_v43, %v7442_v45  ;;  %v7444_v17 = vpop.f32.mrb[77].mxu0  ;;  %9460 = vmatmul.mubr.bf16.gmra.mrb[52].mxu1 %v11146_v60  ;;  %v11155_v60 = vld [vmem:[#allocation3 + $0x890] ss:$36 sps:$4 sm:$0xff]  }
 0x4d2   :  { %v7445_v10 = vpop.f32.mrb[78].mxu0  ;;  %9463 = vmatprep.mubr.bf16.mxu1 %v11150_v18  ;;  %v9647_v17 = vadd.f32 %v13702_v58, %v2240_v34  ;;  %v11156_v34 = vld [vmem:[#allocation3 + $0x8d8] ss:$36 sps:$4 sm:$0xff]   ;;  %v2255_v58 = vpop.permute.xlu0 %2254 }
 0x4d3   :  { %13697 = vst [vmem:[#allocation20_spill] sm:$0xff] %v12784_v20  ;;  %v12787_v29 = vadd.f32 %v9645_v14, %v7445_v10  ;;  %v7447_v39 = vpop.f32.mrb[79].mxu0 }
 0x4d4   :  { %v12789_v37 = vpop.f32.mrb[204].mxu1  ;;  %v13704_v39 = vld [vmem:[#allocation23_spill] sm:$0xff] }
 0x4d5   :  { %13699 = vst [vmem:[#allocation21_spill] sm:$0xff] %v12787_v29  ;;  %13700 = vst [vmem:[#allocation63_spill] sm:$0xff] %v12789_v37  ;;  %v6610_v28 = vpop.f32.mrb[205].mxu1  ;;  %7657 = vmatmul.mubr.bf16.gmra.mrb[184].mxu0 %v11149_v63  ;;  %v9649_v14 = vadd.f32 %v13704_v39, %v2245_v7  ;;  %v11154_v29 = vld [vmem:[#allocation3 + $0xd50] ss:$36 sps:$4 sm:$0xff]  }
 0x4d6   :  { %v12791_v43 = vpop.f32.mrb[206].mxu1  ;;  %7664 = vmatprep.mubr.bf16.mxu0 %v11152_v35  ;;  %v11157_v63 = vld [vmem:[#allocation3 + $0xd9c] ss:$36 sps:$4 sm:$0xff]   ;;  %v13708_v7 = vld [vmem:[#allocation24_spill] sm:$0xff] }
 0x4d7   :  { %13701 = vst [vmem:[#allocation64_spill] sm:$0xff] %v12791_v43  ;;  %v6613_v45 = vpop.f32.mrb[207].mxu1  ;;  %v2250_v43 = vpop.permute.xlu1 %2249 }
 0x4d8   :  { %v7450_v52 = vpop.f32.mrb[80].mxu0 }
 0x4d9   :  { %v12794_v18 = vadd.f32 %v9647_v17, %v7450_v52  ;;  %v7452_v10 = vpop.f32.mrb[81].mxu0  ;;  %9464 = vmatmul.mubr.bf16.gmra.mrb[56].mxu1 %v11151_v24  ;;  %v11160_v24 = vld [vmem:[#allocation3 + $0x920] ss:$36 sps:$4 sm:$0xff]  }
 0x4da   :  { %v7453_v37 = vpop.f32.mrb[82].mxu0  ;;  %9467 = vmatprep.mubr.bf16.mxu1 %v11155_v60  ;;  %v9651_v10 = vadd.f32 %v13708_v7, %v2250_v43  ;;  %v11161_v43 = vld [vmem:[#allocation3 + $0x968] ss:$36 sps:$4 sm:$0xff]   ;;  %v2265_v7 = vpop.permute.xlu0 %2264 }
 0x4db   :  { %13703 = vst [vmem:[#allocation22_spill] sm:$0xff] %v12794_v18  ;;  %v12797_v28 = vadd.f32 %v9649_v14, %v7453_v37  ;;  %v7455_v20 = vpop.f32.mrb[83].mxu0 }
 0x4dc   :  { %v12799_v35 = vpop.f32.mrb[208].mxu1  ;;  %v13710_v20 = vld [vmem:[#allocation25_spill] sm:$0xff] }
 0x4dd   :  { %13705 = vst [vmem:[#allocation23_spill] sm:$0xff] %v12797_v28  ;;  %13706 = vst [vmem:[#allocation65_spill] sm:$0xff] %v12799_v35  ;;  %v6618_v45 = vpop.f32.mrb[209].mxu1  ;;  %7665 = vmatmul.mubr.bf16.gmra.mrb[188].mxu0 %v11154_v29  ;;  %v9653_v14 = vadd.f32 %v13710_v20, %v2255_v58  ;;  %v11159_v28 = vld [vmem:[#allocation3 + $0xd98] ss:$36 sps:$4 sm:$0xff]   ;;  %v13714_v58 = vld [vmem:[#allocation26_spill] sm:$0xff] }
 0x4de   :  { %v12801_v17 = vpop.f32.mrb[210].mxu1  ;;  %7672 = vmatprep.mubr.bf16.mxu0 %v11157_v63  ;;  %v11162_v29 = vld [vmem:[#allocation3 + $0xde4] ss:$36 sps:$4 sm:$0xff]  }
 0x4df   :  { %13707 = vst [vmem:[#allocation66_spill] sm:$0xff] %v12801_v17  ;;  %v6621_v52 = vpop.f32.mrb[211].mxu1  ;;  %v2260_v17 = vpop.permute.xlu1 %2259 }
 0x4e0   :  { %v7458_v39 = vpop.f32.mrb[84].mxu0 }
 0x4e1   :  { %v12804_v60 = vadd.f32 %v9651_v10, %v7458_v39  ;;  %v7460_v37 = vpop.f32.mrb[85].mxu0  ;;  %9468 = vmatmul.mubr.bf16.gmra.mrb[60].mxu1 %v11156_v34  ;;  %v11165_v34 = vld [vmem:[#allocation3 + $0x9b0] ss:$36 sps:$4 sm:$0xff]  }
 0x4e2   :  { %v7461_v35 = vpop.f32.mrb[86].mxu0  ;;  %9471 = vmatprep.mubr.bf16.mxu1 %v11160_v24  ;;  %v9655_v37 = vadd.f32 %v13714_v58, %v2260_v17  ;;  %v11166_v17 = vld [vmem:[#allocation3 + $0x9f8] ss:$36 sps:$4 sm:$0xff]   ;;  %v2275_v58 = vpop.permute.xlu0 %2274 }
 0x4e3   :  { %13709 = vst [vmem:[#allocation24_spill] sm:$0xff] %v12804_v60  ;;  %v12807_v45 = vadd.f32 %v9653_v14, %v7461_v35  ;;  %v7463_v18 = vpop.f32.mrb[87].mxu0 }
 0x4e4   :  { %v12809_v63 = vpop.f32.mrb[212].mxu1  ;;  %v13716_v18 = vld [vmem:[#allocation27_spill] sm:$0xff] }
 0x4e5   :  { %13711 = vst [vmem:[#allocation25_spill] sm:$0xff] %v12807_v45  ;;  %13712 = vst [vmem:[#allocation67_spill] sm:$0xff] %v12809_v63  ;;  %v6626_v52 = vpop.f32.mrb[213].mxu1  ;;  %7673 = vmatmul.mubr.bf16.gmra.mrb[192].mxu0 %v11159_v28  ;;  %v9657_v14 = vadd.f32 %v13716_v18, %v2265_v7  ;;  %v11164_v45 = vld [vmem:[#allocation3 + $0xde0] ss:$36 sps:$4 sm:$0xff]   ;;  %v13720_v7 = vld [vmem:[#allocation28_spill] sm:$0xff] }
 0x4e6   :  { %v12811_v10 = vpop.f32.mrb[214].mxu1  ;;  %7680 = vmatprep.mubr.bf16.mxu0 %v11162_v29  ;;  %v11167_v28 = vld [vmem:[#allocation3 + $0xe2c] ss:$36 sps:$4 sm:$0xff]  }
 0x4e7   :  { %13713 = vst [vmem:[#allocation68_spill] sm:$0xff] %v12811_v10  ;;  %v6629_v39 = vpop.f32.mrb[215].mxu1  ;;  %v2270_v10 = vpop.permute.xlu1 %2269 }
 0x4e8   :  { %v7466_v20 = vpop.f32.mrb[88].mxu0 }
 0x4e9   :  { %v12814_v24 = vadd.f32 %v9655_v37, %v7466_v20  ;;  %v7468_v35 = vpop.f32.mrb[89].mxu0  ;;  %9472 = vmatmul.mubr.bf16.gmra.mrb[64].mxu1 %v11161_v43  ;;  %v11170_v43 = vld [vmem:[#allocation3 + $0xa40] ss:$36 sps:$4 sm:$0xff]  }
 0x4ea   :  { %v7469_v63 = vpop.f32.mrb[90].mxu0  ;;  %9475 = vmatprep.mubr.bf16.mxu1 %v11165_v34  ;;  %v9659_v35 = vadd.f32 %v13720_v7, %v2270_v10  ;;  %v11171_v10 = vld [vmem:[#allocation3 + $0xa88] ss:$36 sps:$4 sm:$0xff]   ;;  %v2285_v7 = vpop.permute.xlu0 %2284 }
 0x4eb   :  { %13715 = vst [vmem:[#allocation26_spill] sm:$0xff] %v12814_v24  ;;  %v12817_v52 = vadd.f32 %v9657_v14, %v7469_v63  ;;  %v7471_v60 = vpop.f32.mrb[91].mxu0 }
 0x4ec   :  { %v12819_v29 = vpop.f32.mrb[216].mxu1  ;;  %v13722_v60 = vld [vmem:[#allocation29_spill] sm:$0xff] }
 0x4ed   :  { %13717 = vst [vmem:[#allocation27_spill] sm:$0xff] %v12817_v52  ;;  %13718 = vst [vmem:[#allocation69_spill] sm:$0xff] %v12819_v29  ;;  %v6634_v39 = vpop.f32.mrb[217].mxu1  ;;  %7681 = vmatmul.mubr.bf16.gmra.mrb[196].mxu0 %v11164_v45  ;;  %v9661_v14 = vadd.f32 %v13722_v60, %v2275_v58  ;;  %v11169_v52 = vld [vmem:[#allocation3 + $0xe28] ss:$36 sps:$4 sm:$0xff]   ;;  %v13726_v58 = vld [vmem:[#allocation30_spill] sm:$0xff] }
 0x4ee   :  { %v12821_v37 = vpop.f32.mrb[218].mxu1  ;;  %7688 = vmatprep.mubr.bf16.mxu0 %v11167_v28  ;;  %v11172_v45 = vld [vmem:[#allocation3 + $0xe74] ss:$36 sps:$4 sm:$0xff]  }
 0x4ef   :  { %13719 = vst [vmem:[#allocation70_spill] sm:$0xff] %v12821_v37  ;;  %v6637_v20 = vpop.f32.mrb[219].mxu1  ;;  %v2280_v37 = vpop.permute.xlu1 %2279 }
 0x4f0   :  { %v7474_v18 = vpop.f32.mrb[92].mxu0 }
 0x4f1   :  { %v12824_v34 = vadd.f32 %v9659_v35, %v7474_v18  ;;  %v7476_v63 = vpop.f32.mrb[93].mxu0  ;;  %9476 = vmatmul.mubr.bf16.gmra.mrb[68].mxu1 %v11166_v17  ;;  %v11175_v17 = vld [vmem:[#allocation3 + $0xad0] ss:$36 sps:$4 sm:$0xff]  }
 0x4f2   :  { %v7477_v29 = vpop.f32.mrb[94].mxu0  ;;  %9479 = vmatprep.mubr.bf16.mxu1 %v11170_v43  ;;  %v9663_v63 = vadd.f32 %v13726_v58, %v2280_v37  ;;  %v11176_v37 = vld [vmem:[#allocation3 + $0xb18] ss:$36 sps:$4 sm:$0xff]   ;;  %v2295_v58 = vpop.permute.xlu0 %2294 }
 0x4f3   :  { %13721 = vst [vmem:[#allocation28_spill] sm:$0xff] %v12824_v34  ;;  %v12827_v39 = vadd.f32 %v9661_v14, %v7477_v29  ;;  %v7479_v24 = vpop.f32.mrb[95].mxu0 }
 0x4f4   :  { %v12829_v28 = vpop.f32.mrb[220].mxu1  ;;  %v13728_v24 = vld [vmem:[#allocation31_spill] sm:$0xff] }
 0x4f5   :  { %13723 = vst [vmem:[#allocation29_spill] sm:$0xff] %v12827_v39  ;;  %13724 = vst [vmem:[#allocation71_spill] sm:$0xff] %v12829_v28  ;;  %v6642_v20 = vpop.f32.mrb[221].mxu1  ;;  %7689 = vmatmul.mubr.bf16.gmra.mrb[200].mxu0 %v11169_v52  ;;  %v9665_v14 = vadd.f32 %v13728_v24, %v2285_v7  ;;  %v11174_v39 = vld [vmem:[#allocation3 + $0xe70] ss:$36 sps:$4 sm:$0xff]  }
 0x4f6   :  { %v12831_v35 = vpop.f32.mrb[222].mxu1  ;;  %7696 = vmatprep.mubr.bf16.mxu0 %v11172_v45  ;;  %v11177_v52 = vld [vmem:[#allocation3 + $0xebc] ss:$36 sps:$4 sm:$0xff]   ;;  %v13732_v7 = vld [vmem:[#allocation32_spill] sm:$0xff] }
 0x4f7   :  { %13725 = vst [vmem:[#allocation72_spill] sm:$0xff] %v12831_v35  ;;  %v6645_v18 = vpop.f32.mrb[223].mxu1  ;;  %v2290_v35 = vpop.permute.xlu1 %2289 }
 0x4f8   :  { %v7482_v60 = vpop.f32.mrb[96].mxu0 }
 0x4f9   :  { %v12834_v43 = vadd.f32 %v9663_v63, %v7482_v60  ;;  %v7484_v29 = vpop.f32.mrb[97].mxu0  ;;  %9480 = vmatmul.mubr.bf16.gmra.mrb[72].mxu1 %v11171_v10  ;;  %v11180_v10 = vld [vmem:[#allocation3 + $0xb60] ss:$36 sps:$4 sm:$0xff]  }
 0x4fa   :  { %v7485_v28 = vpop.f32.mrb[98].mxu0  ;;  %9483 = vmatprep.mubr.bf16.mxu1 %v11175_v17  ;;  %v9667_v29 = vadd.f32 %v13732_v7, %v2290_v35  ;;  %v11181_v35 = vld [vmem:[#allocation3 + $0xba8] ss:$36 sps:$4 sm:$0xff]   ;;  %v2305_v7 = vpop.permute.xlu0 %2304 }
 0x4fb   :  { %13727 = vst [vmem:[#allocation30_spill] sm:$0xff] %v12834_v43  ;;  %v12837_v20 = vadd.f32 %v9665_v14, %v7485_v28  ;;  %v7487_v34 = vpop.f32.mrb[99].mxu0 }
 0x4fc   :  { %v12839_v45 = vpop.f32.mrb[224].mxu1  ;;  %v13734_v34 = vld [vmem:[#allocation33_spill] sm:$0xff] }
 0x4fd   :  { %13729 = vst [vmem:[#allocation31_spill] sm:$0xff] %v12837_v20  ;;  %13730 = vst [vmem:[#allocation73_spill] sm:$0xff] %v12839_v45  ;;  %v6650_v18 = vpop.f32.mrb[225].mxu1  ;;  %7697 = vmatmul.mubr.bf16.gmra.mrb[204].mxu0 %v11174_v39  ;;  %v9669_v14 = vadd.f32 %v13734_v34, %v2295_v58  ;;  %v11179_v20 = vld [vmem:[#allocation3 + $0xeb8] ss:$36 sps:$4 sm:$0xff]   ;;  %v13738_v58 = vld [vmem:[#allocation34_spill] sm:$0xff] }
 0x4fe   :  { %v12841_v63 = vpop.f32.mrb[226].mxu1  ;;  %7704 = vmatprep.mubr.bf16.mxu0 %v11177_v52  ;;  %v11182_v39 = vld [vmem:[#allocation3 + $0xf04] ss:$36 sps:$4 sm:$0xff]  }
 0x4ff   :  { %13731 = vst [vmem:[#allocation74_spill] sm:$0xff] %v12841_v63  ;;  %v6653_v60 = vpop.f32.mrb[227].mxu1  ;;  %v2300_v63 = vpop.permute.xlu1 %2299 }
 0x500   :  { %v7490_v24 = vpop.f32.mrb[100].mxu0 }
 0x501   :  { %v12844_v17 = vadd.f32 %v9667_v29, %v7490_v24  ;;  %v7492_v28 = vpop.f32.mrb[101].mxu0  ;;  %9484 = vmatmul.mubr.bf16.gmra.mrb[76].mxu1 %v11176_v37  ;;  %v11185_v37 = vld [vmem:[#allocation3 + $0xbf0] ss:$36 sps:$4 sm:$0xff]  }
 0x502   :  { %v7493_v45 = vpop.f32.mrb[102].mxu0  ;;  %9487 = vmatprep.mubr.bf16.mxu1 %v11180_v10  ;;  %v9671_v28 = vadd.f32 %v13738_v58, %v2300_v63  ;;  %v11186_v63 = vld [vmem:[#allocation3 + $0xc38] ss:$36 sps:$4 sm:$0xff]   ;;  %v2315_v58 = vpop.permute.xlu0 %2314 }
 0x503   :  { %13733 = vst [vmem:[#allocation32_spill] sm:$0xff] %v12844_v17  ;;  %v12847_v18 = vadd.f32 %v9669_v14, %v7493_v45  ;;  %v7495_v43 = vpop.f32.mrb[103].mxu0 }
 0x504   :  { %v12849_v52 = vpop.f32.mrb[228].mxu1  ;;  %v13740_v43 = vld [vmem:[#allocation35_spill] sm:$0xff] }
 0x505   :  { %13735 = vst [vmem:[#allocation33_spill] sm:$0xff] %v12847_v18  ;;  %13736 = vst [vmem:[#allocation75_spill] sm:$0xff] %v12849_v52  ;;  %v6658_v60 = vpop.f32.mrb[229].mxu1  ;;  %7705 = vmatmul.mubr.bf16.gmra.mrb[208].mxu0 %v11179_v20  ;;  %v9673_v14 = vadd.f32 %v13740_v43, %v2305_v7  ;;  %v11184_v18 = vld [vmem:[#allocation3 + $0xf00] ss:$36 sps:$4 sm:$0xff]   ;;  %v13744_v7 = vld [vmem:[#allocation36_spill] sm:$0xff] }
 0x506   :  { %v12851_v29 = vpop.f32.mrb[230].mxu1  ;;  %7712 = vmatprep.mubr.bf16.mxu0 %v11182_v39  ;;  %v11187_v20 = vld [vmem:[#allocation3 + $0xf4c] ss:$36 sps:$4 sm:$0xff]  }
 0x507   :  { %13737 = vst [vmem:[#allocation76_spill] sm:$0xff] %v12851_v29  ;;  %v6661_v24 = vpop.f32.mrb[231].mxu1  ;;  %v2310_v29 = vpop.permute.xlu1 %2309 }
 0x508   :  { %v7498_v34 = vpop.f32.mrb[104].mxu0 }
 0x509   :  { %v12854_v10 = vadd.f32 %v9671_v28, %v7498_v34  ;;  %v7500_v45 = vpop.f32.mrb[105].mxu0  ;;  %9488 = vmatmul.mubr.bf16.gmra.mrb[80].mxu1 %v11181_v35  ;;  %v11190_v35 = vld [vmem:[#allocation3 + $0xc80] ss:$36 sps:$4 sm:$0xff]  }
 0x50a   :  { %v7501_v52 = vpop.f32.mrb[106].mxu0  ;;  %9491 = vmatprep.mubr.bf16.mxu1 %v11185_v37  ;;  %v9675_v45 = vadd.f32 %v13744_v7, %v2310_v29  ;;  %v11191_v29 = vld [vmem:[#allocation3 + $0xcc8] ss:$36 sps:$4 sm:$0xff]   ;;  %v2325_v7 = vpop.permute.xlu0 %2324 }
 0x50b   :  { %13739 = vst [vmem:[#allocation34_spill] sm:$0xff] %v12854_v10  ;;  %v12857_v60 = vadd.f32 %v9673_v14, %v7501_v52  ;;  %v7503_v17 = vpop.f32.mrb[107].mxu0 }
 0x50c   :  { %v12859_v39 = vpop.f32.mrb[232].mxu1  ;;  %v13746_v17 = vld [vmem:[#allocation37_spill] sm:$0xff] }
 0x50d   :  { %13741 = vst [vmem:[#allocation35_spill] sm:$0xff] %v12857_v60  ;;  %13742 = vst [vmem:[#allocation77_spill] sm:$0xff] %v12859_v39  ;;  %v6666_v24 = vpop.f32.mrb[233].mxu1  ;;  %7713 = vmatmul.mubr.bf16.gmra.mrb[212].mxu0 %v11184_v18  ;;  %v9677_v14 = vadd.f32 %v13746_v17, %v2315_v58  ;;  %v11189_v60 = vld [vmem:[#allocation3 + $0xf48] ss:$36 sps:$4 sm:$0xff]   ;;  %v13750_v58 = vld [vmem:[#allocation38_spill] sm:$0xff] }
 0x50e   :  { %v12861_v28 = vpop.f32.mrb[234].mxu1  ;;  %7720 = vmatprep.mubr.bf16.mxu0 %v11187_v20  ;;  %v11192_v18 = vld [vmem:[#allocation3 + $0xf94] ss:$36 sps:$4 sm:$0xff]  }
 0x50f   :  { %13743 = vst [vmem:[#allocation78_spill] sm:$0xff] %v12861_v28  ;;  %v6669_v34 = vpop.f32.mrb[235].mxu1  ;;  %v2320_v28 = vpop.permute.xlu1 %2319 }
 0x510   :  { %v7506_v43 = vpop.f32.mrb[108].mxu0 }
 0x511   :  { %v12864_v37 = vadd.f32 %v9675_v45, %v7506_v43  ;;  %v7508_v52 = vpop.f32.mrb[109].mxu0  ;;  %9492 = vmatmul.mubr.bf16.gmra.mrb[84].mxu1 %v11186_v63  ;;  %v11195_v63 = vld [vmem:[#allocation3 + $0xd10] ss:$36 sps:$4 sm:$0xff]  }
 0x512   :  { %v7509_v39 = vpop.f32.mrb[110].mxu0  ;;  %9495 = vmatprep.mubr.bf16.mxu1 %v11190_v35  ;;  %v9679_v52 = vadd.f32 %v13750_v58, %v2320_v28  ;;  %v11196_v28 = vld [vmem:[#allocation3 + $0xd58] ss:$36 sps:$4 sm:$0xff]   ;;  %v2335_v58 = vpop.permute.xlu0 %2334 }
 0x513   :  { %13745 = vst [vmem:[#allocation36_spill] sm:$0xff] %v12864_v37  ;;  %v12867_v24 = vadd.f32 %v9677_v14, %v7509_v39  ;;  %v7511_v10 = vpop.f32.mrb[111].mxu0 }
 0x514   :  { %v12869_v20 = vpop.f32.mrb[236].mxu1  ;;  %v13752_v10 = vld [vmem:[#allocation39_spill] sm:$0xff] }
 0x515   :  { %13747 = vst [vmem:[#allocation37_spill] sm:$0xff] %v12867_v24  ;;  %13748 = vst [vmem:[#allocation79_spill] sm:$0xff] %v12869_v20  ;;  %v6674_v34 = vpop.f32.mrb[237].mxu1  ;;  %7721 = vmatmul.mubr.bf16.gmra.mrb[216].mxu0 %v11189_v60  ;;  %v9681_v14 = vadd.f32 %v13752_v10, %v2325_v7  ;;  %v11194_v24 = vld [vmem:[#allocation3 + $0xf90] ss:$36 sps:$4 sm:$0xff]  }
 0x516   :  { %v12871_v45 = vpop.f32.mrb[238].mxu1  ;;  %7728 = vmatprep.mubr.bf16.mxu0 %v11192_v18  ;;  %v11197_v60 = vld [vmem:[#allocation3 + $0xfdc] ss:$36 sps:$4 sm:$0xff]   ;;  %v13756_v7 = vld [vmem:[#allocation40_spill] sm:$0xff] }
 0x517   :  { %13749 = vst [vmem:[#allocation80_spill] sm:$0xff] %v12871_v45  ;;  %v6677_v43 = vpop.f32.mrb[239].mxu1  ;;  %v2330_v45 = vpop.permute.xlu1 %2329 }
 0x518   :  { %v7514_v17 = vpop.f32.mrb[112].mxu0 }
 0x519   :  { %v12874_v35 = vadd.f32 %v9679_v52, %v7514_v17  ;;  %v7516_v39 = vpop.f32.mrb[113].mxu0  ;;  %9496 = vmatmul.mubr.bf16.gmra.mrb[88].mxu1 %v11191_v29  ;;  %v11200_v29 = vld [vmem:[#allocation3 + $0xda0] ss:$36 sps:$4 sm:$0xff]  }
 0x51a   :  { %v7517_v20 = vpop.f32.mrb[114].mxu0  ;;  %9499 = vmatprep.mubr.bf16.mxu1 %v11195_v63  ;;  %v9683_v39 = vadd.f32 %v13756_v7, %v2330_v45  ;;  %v11201_v45 = vld [vmem:[#allocation3 + $0xde8] ss:$36 sps:$4 sm:$0xff]   ;;  %v2345_v7 = vpop.permute.xlu0 %2344 }
 0x51b   :  { %13751 = vst [vmem:[#allocation38_spill] sm:$0xff] %v12874_v35  ;;  %v12877_v34 = vadd.f32 %v9681_v14, %v7517_v20  ;;  %v7519_v37 = vpop.f32.mrb[115].mxu0 }
 0x51c   :  { %v12879_v18 = vpop.f32.mrb[240].mxu1  ;;  %v13758_v37 = vld [vmem:[#allocation41_spill] sm:$0xff] }
 0x51d   :  { %13753 = vst [vmem:[#allocation39_spill] sm:$0xff] %v12877_v34  ;;  %13754 = vst [vmem:[#allocation81_spill] sm:$0xff] %v12879_v18  ;;  %v6682_v43 = vpop.f32.mrb[241].mxu1  ;;  %7729 = vmatmul.mubr.bf16.gmra.mrb[220].mxu0 %v11194_v24  ;;  %v9685_v14 = vadd.f32 %v13758_v37, %v2335_v58  ;;  %v11199_v34 = vld [vmem:[#allocation3 + $0xfd8] ss:$36 sps:$4 sm:$0xff]   ;;  %v13762_v58 = vld [vmem:[#allocation43_spill] sm:$0xff] }
 0x51e   :  { %v12881_v52 = vpop.f32.mrb[242].mxu1  ;;  %7736 = vmatprep.mubr.bf16.mxu0 %v11197_v60  ;;  %v11202_v24 = vld [vmem:[#allocation3 + $0x1024] ss:$36 sps:$4 sm:$0xff]  }
 0x51f   :  { %13755 = vst [vmem:[#allocation82_spill] sm:$0xff] %v12881_v52  ;;  %v6685_v17 = vpop.f32.mrb[243].mxu1  ;;  %v2340_v52 = vpop.permute.xlu1 %2339 }
 0x520   :  { %v7522_v10 = vpop.f32.mrb[116].mxu0 }
 0x521   :  { %v12884_v63 = vadd.f32 %v9683_v39, %v7522_v10  ;;  %v7524_v20 = vpop.f32.mrb[117].mxu0  ;;  %9500 = vmatmul.mubr.bf16.gmra.mrb[92].mxu1 %v11196_v28  ;;  %v11205_v28 = vld [vmem:[#allocation3 + $0xe30] ss:$36 sps:$4 sm:$0xff]  }
 0x522   :  { %v7525_v18 = vpop.f32.mrb[118].mxu0  ;;  %9503 = vmatprep.mubr.bf16.mxu1 %v11200_v29  ;;  %v9687_v20 = vadd.f32 %v13762_v58, %v2340_v52  ;;  %v11206_v52 = vld [vmem:[#allocation3 + $0xe78] ss:$36 sps:$4 sm:$0xff]   ;;  %v2355_v58 = vpop.permute.xlu0 %2354 }
 0x523   :  { %13757 = vst [vmem:[#allocation40_spill] sm:$0xff] %v12884_v63  ;;  %v12887_v43 = vadd.f32 %v9685_v14, %v7525_v18  ;;  %v7527_v35 = vpop.f32.mrb[119].mxu0 }
 0x524   :  { %v12889_v60 = vpop.f32.mrb[244].mxu1  ;;  %v13764_v35 = vld [vmem:[#allocation45_spill] sm:$0xff] }
 0x525   :  { %13759 = vst [vmem:[#allocation41_spill] sm:$0xff] %v12887_v43  ;;  %13760 = vst [vmem:[#allocation83_spill] sm:$0xff] %v12889_v60  ;;  %v6690_v17 = vpop.f32.mrb[245].mxu1  ;;  %7737 = vmatmul.mubr.bf16.gmra.mrb[224].mxu0 %v11199_v34  ;;  %v9689_v14 = vadd.f32 %v13764_v35, %v2345_v7  ;;  %v11204_v43 = vld [vmem:[#allocation3 + $0x1020] ss:$36 sps:$4 sm:$0xff]   ;;  %v13768_v7 = vld [vmem:[#allocation47_spill] sm:$0xff] }
 0x526   :  { %v12891_v39 = vpop.f32.mrb[246].mxu1  ;;  %7744 = vmatprep.mubr.bf16.mxu0 %v11202_v24  ;;  %v11207_v34 = vld [vmem:[#allocation3 + $0x106c] ss:$36 sps:$4 sm:$0xff]  }
 0x527   :  { %13761 = vst [vmem:[#allocation84_spill] sm:$0xff] %v12891_v39  ;;  %v6693_v10 = vpop.f32.mrb[247].mxu1  ;;  %v2350_v39 = vpop.permute.xlu1 %2349 }
 0x528   :  { %v7530_v37 = vpop.f32.mrb[120].mxu0 }
 0x529   :  { %v12894_v29 = vadd.f32 %v9687_v20, %v7530_v37  ;;  %v7532_v18 = vpop.f32.mrb[121].mxu0  ;;  %9504 = vmatmul.mubr.bf16.gmra.mrb[96].mxu1 %v11201_v45  ;;  %v11210_v45 = vld [vmem:[#allocation3 + $0xec0] ss:$36 sps:$4 sm:$0xff]  }
 0x52a   :  { %v7533_v60 = vpop.f32.mrb[122].mxu0  ;;  %9507 = vmatprep.mubr.bf16.mxu1 %v11205_v28  ;;  %v9691_v18 = vadd.f32 %v13768_v7, %v2350_v39  ;;  %v11211_v39 = vld [vmem:[#allocation3 + $0xf08] ss:$36 sps:$4 sm:$0xff]   ;;  %v2365_v7 = vpop.permute.xlu0 %2364 }
 0x52b   :  { %13763 = vst [vmem:[#allocation43_spill] sm:$0xff] %v12894_v29  ;;  %v12897_v17 = vadd.f32 %v9689_v14, %v7533_v60  ;;  %v7535_v63 = vpop.f32.mrb[123].mxu0 }
 0x52c   :  { %v12899_v24 = vpop.f32.mrb[248].mxu1  ;;  %v13769_v63 = vld [vmem:[#allocation49_spill] sm:$0xff] }
 0x52d   :  { %13765 = vst [vmem:[#allocation45_spill] sm:$0xff] %v12897_v17  ;;  %13766 = vst [vmem:[#allocation85_spill] sm:$0xff] %v12899_v24  ;;  %v6698_v10 = vpop.f32.mrb[249].mxu1  ;;  %7745 = vmatmul.mubr.bf16.gmra.mrb[228].mxu0 %v11204_v43  ;;  %v9693_v14 = vadd.f32 %v13769_v63, %v2355_v58  ;;  %v11209_v17 = vld [vmem:[#allocation3 + $0x1068] ss:$36 sps:$4 sm:$0xff]  }
 0x52e   :  { %v12901_v20 = vpop.f32.mrb[250].mxu1  ;;  %7752 = vmatprep.mubr.bf16.mxu0 %v11207_v34  ;;  %v11212_v43 = vld [vmem:[#allocation3 + $0x10b4] ss:$36 sps:$4 sm:$0xff]  }
 0x52f   :  { %13767 = vst [vmem:[#allocation86_spill] sm:$0xff] %v12901_v20  ;;  %v6701_v37 = vpop.f32.mrb[251].mxu1  ;;  %v2360_v20 = vpop.permute.xlu1 %2359  ;;  %v11214_v63 = vld [vmem:[#allocation3 + $0x10b0] ss:$36 sps:$4 sm:$0xff]  }
 0x530   :  { %v7538_v35 = vpop.f32.mrb[124].mxu0  ;;  %v9695_v58 = vadd.f32 %v12571_v13, %v2360_v20  ;;  %v11216_v20 = vld [vmem:[#allocation3 + $0xf98] ss:$36 sps:$4 sm:$0xff]  }
 0x531   :  { %v12904_v28 = vadd.f32 %v9691_v18, %v7538_v35  ;;  %v7540_v60 = vpop.f32.mrb[125].mxu0  ;;  %9508 = vmatmul.mubr.bf16.gmra.mrb[100].mxu1 %v11206_v52  ;;  %v11215_v52 = vld [vmem:[#allocation3 + $0xf50] ss:$36 sps:$4 sm:$0xff]  }
 0x532   :  { %v7541_v24 = vpop.f32.mrb[126].mxu0  ;;  %9511 = vmatprep.mubr.bf16.mxu1 %v11210_v45  ;;  %v9697_v45 = vadd.f32 %v12573_v2, %v2365_v7 }
 0x533   :  { %v12907_v10 = vadd.f32 %v9693_v14, %v7541_v24  ;;  %v7543_v29 = vpop.f32.mrb[127].mxu0 }
 0x534   :  { %v12909_v34 = vpop.f32.mrb[252].mxu1 }
 0x535   :  { %13770 = vst [vmem:[#allocation47_spill] sm:$0xff] %v12907_v10  ;;  %13771 = vst [vmem:[#allocation49_spill] sm:$0xff] %v12909_v34  ;;  %v6706_v37 = vpop.f32.mrb[253].mxu1  ;;  %7753 = vmatmul.mubr.bf16.gmra.mrb[232].mxu0 %v11209_v17  ;;  %v11217_v17 = vld [vmem:[#allocation3 + $0x10fc] ss:$36 sps:$4 sm:$0xff]  }
 0x536   :  { %v12911_v18 = vpop.f32.mrb[254].mxu1  ;;  %7760 = vmatprep.mubr.bf16.mxu0 %v11212_v43 }
 0x537   :  { %13772 = vst [vmem:[#allocation87_spill] sm:$0xff] %v12911_v18  ;;  %v6709_v35 = vpop.f32.mrb[255].mxu1  ;;  %v2370_v18 = vpop.permute.xlu1 %2369 }
 0x538   :  { %v7546_v60 = vpop.f32.mrb[128].mxu0  ;;  %v2375_v35 = vpop.permute.xlu0 %2374 }
 0x539   :  { %v12915_v24 = vadd.f32 %v9695_v58, %v7546_v60  ;;  %v7548_v29 = vpop.f32.mrb[129].mxu0  ;;  %9512 = vmatmul.mubr.bf16.gmra.mrb[104].mxu1 %v11211_v39  ;;  %v11220_v39 = vld [vmem:[#allocation3 + $0xfe0] ss:$36 sps:$4 sm:$0xff]   ;;  %v9699_v58 = vadd.f32 %v12583_v6, %v2370_v18  ;;  %v11219_v6 = vld [vmem:[#allocation3 + $0x10f8] ss:$36 sps:$4 sm:$0xff]  }
 0x53a   :  { %v7549_v14 = vpop.f32.mrb[130].mxu0  ;;  %9515 = vmatprep.mubr.bf16.mxu1 %v11215_v52  ;;  %v13774_v29 = vld [vmem:[#allocation50_spill] sm:$0xff] }
 0x53b   :  { %v12917_v37 = vadd.f32 %v9697_v45, %v7549_v14  ;;  %v7551_v34 = vpop.f32.mrb[131].mxu0  ;;  %v11222_v18 = vld [vmem:[#allocation3 + $0x1144] ss:$36 sps:$4 sm:$0xff]  }
 0x53c   :  { %v9409_v43 = vpop.f32.mrb[0].mxu1 }
 0x53d   :  { %13773 = vst [vmem:[#allocation88_spill] sm:$0xff] %v12917_v37  ;;  %v7844_v10 = vadd.f32 %v12577_v22, %v9409_v43  ;;  %7761 = vmatmul.mubr.bf16.gmra.mrb[236].mxu0 %v11214_v63  ;;  %v7835_v13 = vpop.f32.mrb[1].mxu1  ;;  %v9701_v22 = vadd.f32 %v12585_v1, %v2375_v35 }
 0x53e   :  { %v7836_v2 = vadd.f32 %v12565_v38, %v7835_v13  ;;  %v9410_v7 = vpop.f32.mrb[2].mxu1  ;;  %7768 = vmatprep.mubr.bf16.mxu0 %v11217_v17 }
 0x53f   :  { %v8348_v52 = vmax.f32 %v7844_v10, 0.0  ;;  %v7847_v60 = vadd.f32 %v12581_v21, %v9410_v7  ;;  %v7838_v45 = vpop.f32.mrb[3].mxu1  ;;  %v2385_v7 = vpop.permute.xlu0 %2384 }
 0x540   :  { %v8346_v34 = vmax.f32 %v7836_v2, 0.0  ;;  %v7839_v14 = vadd.f32 %v13774_v29, %v7838_v45  ;;  %v7554_v37 = vpop.f32.mrb[132].mxu0  ;;  %v11221_v2 = vld [vmem:[#allocation3 + $0x1028] ss:$36 sps:$4 sm:$0xff]  }
 0x541   :  { %8476 = vst [vmem:[%s13602_s3 + $0x10] sm:$0xff] %v8348_v52  ;;  %v8349_v38 = vmax.f32 %v7847_v60, 0.0  ;;  %v12928_v63 = vadd.f32 %v9699_v58, %v7554_v37  ;;  %v7556_v17 = vpop.f32.mrb[133].mxu0  ;;  %9516 = vmatmul.mubr.bf16.gmra.mrb[108].mxu1 %v11216_v20  ;;  %v2380_v37 = vpop.permute.xlu1 %2379  ;;  %v11225_v52 = vld [vmem:[#allocation3 + $0x1070] ss:$36 sps:$4 sm:$0xff]  }
 0x542   :  { %8474 = vst [vmem:[%s13602_s3] sm:$0xff] %v8346_v34  ;;  %v8347_v21 = vmax.f32 %v7839_v14, 0.0  ;;  %v7557_v10 = vpop.f32.mrb[134].mxu0  ;;  %9519 = vmatprep.mubr.bf16.mxu1 %v11220_v39  ;;  %v9703_v60 = vadd.f32 %v12595_v11, %v2380_v37  ;;  %v11224_v11 = vld [vmem:[#allocation3 + $0x1140] ss:$36 sps:$4 sm:$0xff]  }
 0x543   :  { %8477 = vst [vmem:[%s13602_s3 + $0x18] sm:$0xff] %v8349_v38  ;;  %v12936_v1 = vadd.f32 %v9701_v22, %v7557_v10  ;;  %v7559_v43 = vpop.f32.mrb[135].mxu0 }
 0x544   :  { %8475 = vst [vmem:[%s13602_s3 + $0x8] sm:$0xff] %v8347_v21  ;;  %v9413_v13 = vpop.f32.mrb[4].mxu1 }
 0x545   :  { %v7860_v20 = vadd.f32 %v12601_v59, %v9413_v13  ;;  %7769 = vmatmul.mubr.bf16.gmra.mrb[240].mxu0 %v11219_v6  ;;  %v7851_v35 = vpop.f32.mrb[5].mxu1  ;;  %v9705_v59 = vadd.f32 %v12597_v41, %v2385_v7 }
 0x546   :  { %v7852_v39 = vadd.f32 %v12589_v9, %v7851_v35  ;;  %v9414_v58 = vpop.f32.mrb[6].mxu1  ;;  %7776 = vmatprep.mubr.bf16.mxu0 %v11222_v18  ;;  %v2390_v18 = vpop.permute.xlu1 %2389 }
 0x547   :  { %v8352_v45 = vmax.f32 %v7860_v20, 0.0  ;;  %v7863_v34 = vadd.f32 %v12605_v49, %v9414_v58  ;;  %v7854_v29 = vpop.f32.mrb[7].mxu1  ;;  %v11226_v20 = vld [vmem:[#allocation3 + $0x10b8] ss:$36 sps:$4 sm:$0xff]   ;;  %v2395_v35 = vpop.permute.xlu0 %2394  ;;  %v9707_v58 = vadd.f32 %v12607_v47, %v2390_v18  ;;  %v11229_v47 = vld [vmem:[#allocation3 + $0x1188] ss:$36 sps:$4 sm:$0xff]  }
 0x548   :  { %v8350_v14 = vmax.f32 %v7852_v39, 0.0  ;;  %v7855_v22 = vadd.f32 %v12593_v5, %v7854_v29  ;;  %v7562_v38 = vpop.f32.mrb[136].mxu0  ;;  %v11227_v5 = vld [vmem:[#allocation3 + $0x118c] ss:$36 sps:$4 sm:$0xff]   ;;  %v11230_v39 = vld [vmem:[#allocation3 + $0x1100] ss:$36 sps:$4 sm:$0xff]  }
 0x549   :  { %8480 = vst [vmem:[%s13602_s3 + $0x30] sm:$0xff] %v8352_v45  ;;  %v8353_v9 = vmax.f32 %v7863_v34, 0.0  ;;  %v12950_v17 = vadd.f32 %v9703_v60, %v7562_v38  ;;  %v7564_v6 = vpop.f32.mrb[137].mxu0  ;;  %9520 = vmatmul.mubr.bf16.gmra.mrb[112].mxu1 %v11221_v2 }
 0x54a   :  { %8478 = vst [vmem:[%s13602_s3 + $0x20] sm:$0xff] %v8350_v14  ;;  %v8351_v49 = vmax.f32 %v7855_v22, 0.0  ;;  %v7565_v21 = vpop.f32.mrb[138].mxu0  ;;  %9523 = vmatprep.mubr.bf16.mxu1 %v11225_v52  ;;  %v2400_v6 = vpop.permute.xlu1 %2399 }
 0x54b   :  { %8481 = vst [vmem:[%s13602_s3 + $0x38] sm:$0xff] %v8353_v9  ;;  %v12958_v41 = vadd.f32 %v9705_v59, %v7565_v21  ;;  %v7567_v10 = vpop.f32.mrb[139].mxu0 }
 0x54c   :  { %8479 = vst [vmem:[%s13602_s3 + $0x28] sm:$0xff] %v8351_v49  ;;  %v9417_v43 = vpop.f32.mrb[8].mxu1  ;;  %v2405_v10 = vpop.permute.xlu0 %2404 }
 0x54d   :  { %v7876_v37 = vadd.f32 %v12625_v36, %v9417_v43  ;;  %7777 = vmatmul.mubr.bf16.gmra.mrb[244].mxu0 %v11224_v11  ;;  %v7867_v13 = vpop.f32.mrb[9].mxu1  ;;  %v9709_v36 = vadd.f32 %v12609_v61, %v2395_v35 }
 0x54e   :  { %v7868_v2 = vadd.f32 %v12613_v27, %v7867_v13  ;;  %v9418_v7 = vpop.f32.mrb[10].mxu1  ;;  %7784 = vmatprep.mubr.bf16.mxu0 %v11227_v5  ;;  %v11231_v5 = vld [vmem:[#allocation3 + $0x1148] ss:$36 sps:$4 sm:$0xff]   ;;  %v9711_v13 = vadd.f32 %v12619_v33, %v2400_v6  ;;  %v11234_v33 = vld [vmem:[#allocation3 + $0x11d0] ss:$36 sps:$4 sm:$0xff]  }
 0x54f   :  { %v8356_v52 = vmax.f32 %v7876_v37, 0.0  ;;  %v7879_v60 = vadd.f32 %v12629_v19, %v9418_v7  ;;  %v7870_v45 = vpop.f32.mrb[11].mxu1  ;;  %v11235_v37 = vld [vmem:[#allocation3 + $0x1190] ss:$36 sps:$4 sm:$0xff]  }
 0x550   :  { %v8354_v34 = vmax.f32 %v7868_v2, 0.0  ;;  %v7871_v29 = vadd.f32 %v12617_v62, %v7870_v45  ;;  %v7570_v14 = vpop.f32.mrb[140].mxu0  ;;  %v11232_v62 = vld [vmem:[#allocation3 + $0x11d4] ss:$36 sps:$4 sm:$0xff]  }
 0x551   :  { %8484 = vst [vmem:[%s13602_s3 + $0x50] sm:$0xff] %v8356_v52  ;;  %v8357_v27 = vmax.f32 %v7879_v60, 0.0  ;;  %v12972_v22 = vadd.f32 %v9707_v58, %v7570_v14  ;;  %v7572_v38 = vpop.f32.mrb[141].mxu0  ;;  %9524 = vmatmul.mubr.bf16.gmra.mrb[116].mxu1 %v11226_v20 }
 0x552   :  { %8482 = vst [vmem:[%s13602_s3 + $0x40] sm:$0xff] %v8354_v34  ;;  %v8355_v19 = vmax.f32 %v7871_v29, 0.0  ;;  %v7573_v59 = vpop.f32.mrb[142].mxu0  ;;  %9527 = vmatprep.mubr.bf16.mxu1 %v11230_v39  ;;  %v2410_v34 = vpop.permute.xlu1 %2409 }
 0x553   :  { %8485 = vst [vmem:[%s13602_s3 + $0x58] sm:$0xff] %v8357_v27  ;;  %v12980_v61 = vadd.f32 %v9709_v36, %v7573_v59  ;;  %v7575_v9 = vpop.f32.mrb[143].mxu0  ;;  %v11236_v27 = vld [vmem:[#allocation3 + $0x11d8] ss:$36 sps:$4 sm:$0xff]   ;;  %v2415_v38 = vpop.permute.xlu0 %2414  ;;  %v9715_v59 = vadd.f32 %v12631_v3, %v2410_v34 }
 0x554   :  { %8483 = vst [vmem:[%s13602_s3 + $0x48] sm:$0xff] %v8355_v19  ;;  %v9421_v11 = vpop.f32.mrb[12].mxu1 }
 0x555   :  { %v7892_v49 = vadd.f32 %v12649_v56, %v9421_v11  ;;  %7785 = vmatmul.mubr.bf16.gmra.mrb[248].mxu0 %v11229_v47  ;;  %v7883_v21 = vpop.f32.mrb[13].mxu1  ;;  %v9713_v56 = vadd.f32 %v12621_v40, %v2405_v10 }
 0x556   :  { %v7884_v18 = vadd.f32 %v12637_v50, %v7883_v21  ;;  %v9422_v43 = vpop.f32.mrb[14].mxu1  ;;  %7792 = vmatprep.mubr.bf16.mxu0 %v11232_v62 }
 0x557   :  { %v8360_v20 = vmax.f32 %v7892_v49, 0.0  ;;  %v7895_v35 = vadd.f32 %v12653_v31, %v9422_v43  ;;  %v7886_v2 = vpop.f32.mrb[15].mxu1 }
 0x558   :  { %v8358_v7 = vmax.f32 %v7884_v18, 0.0  ;;  %v7887_v39 = vadd.f32 %v12641_v42, %v7886_v2  ;;  %v7578_v58 = vpop.f32.mrb[144].mxu0  ;;  %v2420_v18 = vpop.permute.xlu1 %2419 }
 0x559   :  { %8488 = vst [vmem:[%s13602_s3 + $0x70] sm:$0xff] %v8360_v20  ;;  %v8361_v50 = vmax.f32 %v7895_v35, 0.0  ;;  %v12994_v52 = vadd.f32 %v9711_v13, %v7578_v58  ;;  %v7580_v60 = vpop.f32.mrb[145].mxu0  ;;  %9528 = vmatmul.mubr.bf16.gmra.mrb[120].mxu1 %v11231_v5  ;;  %v9717_v5 = vadd.f32 %v12633_v44, %v2415_v38  ;;  %v2425_v20 = vpop.permute.xlu0 %2424 }
 0x55a   :  { %8486 = vst [vmem:[%s13602_s3 + $0x60] sm:$0xff] %v8358_v7  ;;  %v8359_v31 = vmax.f32 %v7887_v39, 0.0  ;;  %v7581_v45 = vpop.f32.mrb[146].mxu0  ;;  %9531 = vmatprep.mubr.bf16.mxu1 %v11235_v37  ;;  %v9719_v7 = vadd.f32 %v12643_v46, %v2420_v18 }
 0x55b   :  { %8489 = vst [vmem:[%s13602_s3 + $0x78] sm:$0xff] %v8361_v50  ;;  %v13002_v40 = vadd.f32 %v9713_v56, %v7581_v45  ;;  %v7583_v42 = vpop.f32.mrb[147].mxu0 }
 0x55c   :  { %8487 = vst [vmem:[%s13602_s3 + $0x68] sm:$0xff] %v8359_v31  ;;  %v9425_v29 = vpop.f32.mrb[16].mxu1  ;;  %v9721_v31 = vadd.f32 %v12645_v30, %v2425_v20  ;;  %v2430_v42 = vpop.permute.xlu1 %2429  ;;  %v13776_v20 = vld [vmem:[#allocation48_spill] sm:$0xff] }
 0x55d   :  { %v7908_v14 = vadd.f32 %v12673_v0, %v9425_v29  ;;  %7793 = vmatmul.mubr.bf16.gmra.mrb[252].mxu0 %v11234_v33  ;;  %v7899_v36 = vpop.f32.mrb[17].mxu1 }
 0x55e   :  { %v7900_v47 = vadd.f32 %v12661_v51, %v7899_v36  ;;  %v9426_v19 = vpop.f32.mrb[18].mxu1  ;;  %v2435_v36 = vpop.permute.xlu0 %2434 }
 0x55f   :  { %v8364_v62 = vmax.f32 %v7908_v14, 0.0  ;;  %v7911_v9 = vadd.f32 %v12677_v8, %v9426_v19  ;;  %v7902_v6 = vpop.f32.mrb[19].mxu1 }
 0x560   :  { %v8362_v11 = vmax.f32 %v7900_v47, 0.0  ;;  %v7903_v49 = vadd.f32 %v12665_v12, %v7902_v6  ;;  %v7586_v21 = vpop.f32.mrb[148].mxu0  ;;  %v9723_v47 = vadd.f32 %v12655_v57, %v2430_v42  ;;  %v13779_v42 = vld [vmem:[#allocation16_spill] sm:$0xff] }
 0x561   :  { %8492 = vst [vmem:[%s13602_s3 + $0x90] sm:$0xff] %v8364_v62  ;;  %v8365_v0 = vmax.f32 %v7911_v9, 0.0  ;;  %v13016_v10 = vadd.f32 %v9715_v59, %v7586_v21  ;;  %v7588_v51 = vpop.f32.mrb[149].mxu0  ;;  %9532 = vmatmul.mubr.bf16.gmra.mrb[124].mxu1 %v11236_v27 }
 0x562   :  { %8490 = vst [vmem:[%s13602_s3 + $0x80] sm:$0xff] %v8362_v11  ;;  %v8363_v3 = vmax.f32 %v7903_v49, 0.0  ;;  %v7589_v8 = vpop.f32.mrb[150].mxu0  ;;  %v9725_v49 = vadd.f32 %v12657_v55, %v2435_v36  ;;  %v13780_v36 = vld [vmem:[#allocation12_spill] sm:$0xff] }
 0x563   :  { %8493 = vst [vmem:[%s13602_s3 + $0x98] sm:$0xff] %v8365_v0  ;;  %v13024_v44 = vadd.f32 %v9717_v5, %v7589_v8  ;;  %v7591_v12 = vpop.f32.mrb[151].mxu0  ;;  %v2440_v5 = vpop.permute.xlu1 %2439 }
 0x564   :  { %8491 = vst [vmem:[%s13602_s3 + $0x88] sm:$0xff] %v8363_v3  ;;  %v9429_v43 = vpop.f32.mrb[20].mxu1  ;;  %v2445_v8 = vpop.permute.xlu0 %2444 }
 0x565   :  { %v7924_v37 = vadd.f32 %v12697_v23, %v9429_v43  ;;  %v7915_v13 = vpop.f32.mrb[21].mxu1  ;;  %v13775_v43 = vld [vmem:[#allocation51_spill] sm:$0xff] }
 0x566   :  { %v7916_v35 = vadd.f32 %v12685_v16, %v7915_v13  ;;  %v9430_v2 = vpop.f32.mrb[22].mxu1 }
 0x567   :  { %v8368_v39 = vmax.f32 %v7924_v37, 0.0  ;;  %v7927_v58 = vadd.f32 %v12701_v4, %v9430_v2  ;;  %v7918_v56 = vpop.f32.mrb[23].mxu1  ;;  %v9727_v37 = vadd.f32 %v13775_v43, %v2440_v5 }
 0x568   :  { %v8366_v50 = vmax.f32 %v7916_v35, 0.0  ;;  %v7919_v60 = vadd.f32 %v12689_v26, %v7918_v56  ;;  %v7594_v33 = vpop.f32.mrb[152].mxu0 }
 0x569   :  { %8496 = vst [vmem:[%s13602_s3 + $0xb0] sm:$0xff] %v8368_v39  ;;  %v8369_v23 = vmax.f32 %v7927_v58, 0.0  ;;  %v13038_v45 = vadd.f32 %v9719_v7, %v7594_v33  ;;  %v7596_v16 = vpop.f32.mrb[153].mxu0  ;;  %v13777_v39 = vld [vmem:[#allocation8_spill] sm:$0xff] }
 0x56a   :  { %8494 = vst [vmem:[%s13602_s3 + $0xa0] sm:$0xff] %v8366_v50  ;;  %v8367_v46 = vmax.f32 %v7919_v60, 0.0  ;;  %v7597_v4 = vpop.f32.mrb[154].mxu0  ;;  %v13778_v50 = vld [vmem:[#allocation52_spill] sm:$0xff] }
 0x56b   :  { %8497 = vst [vmem:[%s13602_s3 + $0xb8] sm:$0xff] %v8369_v23  ;;  %v13046_v26 = vadd.f32 %v9721_v31, %v7597_v4  ;;  %v7599_v30 = vpop.f32.mrb[155].mxu0  ;;  %v9729_v60 = vadd.f32 %v13778_v50, %v2445_v8  ;;  %v2450_v4 = vpop.permute.xlu1 %2449 }
 0x56c   :  { %8495 = vst [vmem:[%s13602_s3 + $0xa8] sm:$0xff] %v8367_v46  ;;  %v9433_v34 = vpop.f32.mrb[24].mxu1 }
 0x56d   :  { %v7940_v29 = vadd.f32 %v12721_v48, %v9433_v34  ;;  %v7931_v14 = vpop.f32.mrb[25].mxu1 }
 0x56e   :  { %v7932_v27 = vadd.f32 %v12709_v53, %v7931_v14  ;;  %v9434_v38 = vpop.f32.mrb[26].mxu1  ;;  %v2455_v14 = vpop.permute.xlu0 %2454 }
 0x56f   :  { %v8372_v19 = vmax.f32 %v7940_v29, 0.0  ;;  %v7943_v59 = vadd.f32 %v12725_v32, %v9434_v38  ;;  %v7934_v62 = vpop.f32.mrb[27].mxu1 }
 0x570   :  { %v8370_v9 = vmax.f32 %v7932_v27, 0.0  ;;  %v7935_v6 = vadd.f32 %v12713_v25, %v7934_v62  ;;  %v7602_v11 = vpop.f32.mrb[156].mxu0  ;;  %v13782_v62 = vld [vmem:[#allocation17_spill] sm:$0xff] }
 0x571   :  { %8500 = vst [vmem:[%s13602_s3 + $0xd0] sm:$0xff] %v8372_v19  ;;  %v8373_v48 = vmax.f32 %v7943_v59, 0.0  ;;  %v13060_v21 = vadd.f32 %v9723_v47, %v7602_v11  ;;  %v7604_v53 = vpop.f32.mrb[157].mxu0  ;;  %v13781_v47 = vld [vmem:[#allocation53_spill] sm:$0xff] }
 0x572   :  { %8498 = vst [vmem:[%s13602_s3 + $0xc0] sm:$0xff] %v8370_v9  ;;  %v8371_v57 = vmax.f32 %v7935_v6, 0.0  ;;  %v7605_v32 = vpop.f32.mrb[158].mxu0  ;;  %v9731_v19 = vadd.f32 %v13781_v47, %v2450_v4 }
 0x573   :  { %8501 = vst [vmem:[%s13602_s3 + $0xd8] sm:$0xff] %v8373_v48  ;;  %v13068_v25 = vadd.f32 %v9725_v49, %v7605_v32  ;;  %v7607_v55 = vpop.f32.mrb[159].mxu0  ;;  %v13783_v49 = vld [vmem:[#allocation13_spill] sm:$0xff] }
 0x574   :  { %8499 = vst [vmem:[%s13602_s3 + $0xc8] sm:$0xff] %v8371_v57  ;;  %v9437_v0 = vpop.f32.mrb[28].mxu1  ;;  %v13784_v57 = vld [vmem:[#allocation54_spill] sm:$0xff] }
 0x575   :  { %v7956_v51 = vadd.f32 %v12744_v15, %v9437_v0  ;;  %v7947_v3 = vpop.f32.mrb[29].mxu1  ;;  %v9733_v32 = vadd.f32 %v13784_v57, %v2455_v14  ;;  %v13793_v57 = vld [vmem:[#allocation57_spill] sm:$0xff] }
 0x576   :  { %v7948_v12 = vadd.f32 %v12733_v54, %v7947_v3  ;;  %v9438_v18 = vpop.f32.mrb[30].mxu1 }
 0x577   :  { %v8376_v13 = vmax.f32 %v7956_v51, 0.0  ;;  %v7959_v35 = vadd.f32 %v13776_v20, %v9438_v18  ;;  %v7950_v2 = vpop.f32.mrb[31].mxu1  ;;  %v2460_v18 = vpop.permute.xlu1 %2459 }
 0x578   :  { %v8374_v7 = vmax.f32 %v7948_v12, 0.0  ;;  %v7951_v58 = vadd.f32 %v13777_v39, %v7950_v2  ;;  %v7610_v56 = vpop.f32.mrb[160].mxu0  ;;  %v13786_v2 = vld [vmem:[#allocation18_spill] sm:$0xff] }
 0x579   :  { %8504 = vst [vmem:[%s13602_s3 + $0xf0] sm:$0xff] %v8376_v13  ;;  %v8377_v15 = vmax.f32 %v7959_v35, 0.0  ;;  %v13082_v33 = vadd.f32 %v9727_v37, %v7610_v56  ;;  %v7612_v54 = vpop.f32.mrb[161].mxu0  ;;  %v13785_v37 = vld [vmem:[#allocation20_spill] sm:$0xff]  ;;  %v2465_v35 = vpop.permute.xlu0 %2464 }
 0x57a   :  { %8502 = vst [vmem:[%s13602_s3 + $0xe0] sm:$0xff] %v8374_v7  ;;  %v8375_v31 = vmax.f32 %v7951_v58, 0.0  ;;  %v7613_v23 = vpop.f32.mrb[162].mxu0  ;;  %v13787_v58 = vld [vmem:[#allocation55_spill] sm:$0xff] }
 0x57b   :  { %8505 = vst [vmem:[%s13602_s3 + $0xf8] sm:$0xff] %v8377_v15  ;;  %v13090_v16 = vadd.f32 %v9729_v60, %v7613_v23  ;;  %v7615_v46 = vpop.f32.mrb[163].mxu0  ;;  %v9735_v56 = vadd.f32 %v13787_v58, %v2460_v18  ;;  %v13788_v60 = vld [vmem:[#allocation21_spill] sm:$0xff]  ;;  %v13789_v23 = vld [vmem:[#allocation19_spill] sm:$0xff] }
 0x57c   :  { %8503 = vst [vmem:[%s13602_s3 + $0xe8] sm:$0xff] %v8375_v31  ;;  %v9441_v30 = vpop.f32.mrb[32].mxu1  ;;  %v13795_v18 = vld [vmem:[#allocation23_spill] sm:$0xff] }
 0x57d   :  { %v7972_v34 = vadd.f32 %v13779_v42, %v9441_v30  ;;  %v7963_v29 = vpop.f32.mrb[33].mxu1  ;;  %v13790_v30 = vld [vmem:[#allocation56_spill] sm:$0xff] }
 0x57e   :  { %v7964_v27 = vadd.f32 %v13780_v36, %v7963_v29  ;;  %v9442_v38 = vpop.f32.mrb[34].mxu1  ;;  %v9737_v42 = vadd.f32 %v13790_v30, %v2465_v35 }
 0x57f   :  { %v8380_v59 = vmax.f32 %v7972_v34, 0.0  ;;  %v7975_v9 = vadd.f32 %v13782_v62, %v9442_v38  ;;  %v7966_v6 = vpop.f32.mrb[35].mxu1  ;;  %v13791_v62 = vld [vmem:[#allocation24_spill] sm:$0xff] }
 0x580   :  { %v8378_v11 = vmax.f32 %v7964_v27, 0.0  ;;  %v7967_v48 = vadd.f32 %v13783_v49, %v7966_v6  ;;  %v7618_v53 = vpop.f32.mrb[164].mxu0  ;;  %v13792_v49 = vld [vmem:[#allocation22_spill] sm:$0xff] }
 0x581   :  { %8508 = vst [vmem:[%s13602_s3 + $0x110] sm:$0xff] %v8380_v59  ;;  %v8381_v55 = vmax.f32 %v7975_v9, 0.0  ;;  %v13104_v5 = vadd.f32 %v9731_v19, %v7618_v53  ;;  %v7620_v0 = vpop.f32.mrb[165].mxu0  ;;  %v2470_v19 = vpop.permute.xlu1 %2469 }
 0x582   :  { %8506 = vst [vmem:[%s13602_s3 + $0x100] sm:$0xff] %v8378_v11  ;;  %v8379_v51 = vmax.f32 %v7967_v48, 0.0  ;;  %v7621_v3 = vpop.f32.mrb[166].mxu0  ;;  %v2475_v11 = vpop.permute.xlu0 %2474  ;;  %v13794_v0 = vld [vmem:[#allocation25_spill] sm:$0xff] }
 0x583   :  { %8509 = vst [vmem:[%s13602_s3 + $0x118] sm:$0xff] %v8381_v55  ;;  %v13112_v8 = vadd.f32 %v9733_v32, %v7621_v3  ;;  %v7623_v12 = vpop.f32.mrb[167].mxu0  ;;  %v9739_v32 = vadd.f32 %v13793_v57, %v2470_v19 }
 0x584   :  { %8507 = vst [vmem:[%s13602_s3 + $0x108] sm:$0xff] %v8379_v51  ;;  %v9445_v43 = vpop.f32.mrb[36].mxu1 }
 0x585   :  { %v7988_v13 = vadd.f32 %v13785_v37, %v9445_v43  ;;  %v7979_v20 = vpop.f32.mrb[37].mxu1 }
 0x586   :  { %v7980_v7 = vadd.f32 %v13786_v2, %v7979_v20  ;;  %v9446_v39 = vpop.f32.mrb[38].mxu1 }
 0x587   :  { %v8384_v50 = vmax.f32 %v7988_v13, 0.0  ;;  %v7991_v15 = vadd.f32 %v13788_v60, %v9446_v39  ;;  %v7982_v54 = vpop.f32.mrb[39].mxu1  ;;  %v13796_v13 = vld [vmem:[#allocation58_spill] sm:$0xff]  ;;  %v2480_v60 = vpop.permute.xlu1 %2479 }
 0x588   :  { %v8382_v31 = vmax.f32 %v7980_v7, 0.0  ;;  %v7983_v46 = vadd.f32 %v13789_v23, %v7982_v54  ;;  %v7626_v4 = vpop.f32.mrb[168].mxu0  ;;  %v9741_v20 = vadd.f32 %v13796_v13, %v2475_v11  ;;  %v13797_v54 = vld [vmem:[#allocation28_spill] sm:$0xff]  ;;  %v13802_v11 = vld [vmem:[#allocation42_spill] sm:$0xff] }
 0x589   :  { %8512 = vst [vmem:[%s13602_s3 + $0x130] sm:$0xff] %v8384_v50  ;;  %v8385_v34 = vmax.f32 %v7991_v15, 0.0  ;;  %v13126_v29 = vadd.f32 %v9735_v56, %v7626_v4  ;;  %v7628_v14 = vpop.f32.mrb[169].mxu0  ;;  %v13798_v4 = vld [vmem:[#allocation26_spill] sm:$0xff] }
 0x58a   :  { %8510 = vst [vmem:[%s13602_s3 + $0x120] sm:$0xff] %v8382_v31  ;;  %v8383_v36 = vmax.f32 %v7983_v46, 0.0  ;;  %v7629_v27 = vpop.f32.mrb[170].mxu0  ;;  %v2485_v46 = vpop.permute.xlu0 %2484 }
 0x58b   :  { %8513 = vst [vmem:[%s13602_s3 + $0x138] sm:$0xff] %v8385_v34  ;;  %v13134_v38 = vadd.f32 %v9737_v42, %v7629_v27  ;;  %v7631_v47 = vpop.f32.mrb[171].mxu0  ;;  %v13799_v34 = vld [vmem:[#allocation6_spill] sm:$0xff]  ;;  %v13800_v27 = vld [vmem:[#allocation29_spill] sm:$0xff] }
 0x58c   :  { %8511 = vst [vmem:[%s13602_s3 + $0x128] sm:$0xff] %v8383_v36  ;;  %v9449_v59 = vpop.f32.mrb[40].mxu1  ;;  %v9743_v14 = vadd.f32 %v13799_v34, %v2480_v60  ;;  %v13806_v60 = vld [vmem:[#allocation33_spill] sm:$0xff] }
 0x58d   :  { %v8004_v9 = vadd.f32 %v13791_v62, %v9449_v59  ;;  %v7995_v6 = vpop.f32.mrb[41].mxu1  ;;  %v13801_v62 = vld [vmem:[#allocation27_spill] sm:$0xff] }
 0x58e   :  { %v7996_v48 = vadd.f32 %v13792_v49, %v7995_v6  ;;  %v9450_v53 = vpop.f32.mrb[42].mxu1  ;;  %v9745_v49 = vadd.f32 %v13802_v11, %v2485_v46  ;;  %v2495_v13 = vpop.permute.xlu0 %2494 }
 0x58f   :  { %v8388_v55 = vmax.f32 %v8004_v9, 0.0  ;;  %v8007_v51 = vadd.f32 %v13794_v0, %v9450_v53  ;;  %v7998_v3 = vpop.f32.mrb[43].mxu1 }
 0x590   :  { %v8386_v12 = vmax.f32 %v7996_v48, 0.0  ;;  %v7999_v43 = vadd.f32 %v13795_v18, %v7998_v3  ;;  %v7634_v37 = vpop.f32.mrb[172].mxu0  ;;  %v2490_v3 = vpop.permute.xlu1 %2489  ;;  %v13803_v18 = vld [vmem:[#allocation32_spill] sm:$0xff] }
 0x591   :  { %8516 = vst [vmem:[%s13602_s3 + $0x150] sm:$0xff] %v8388_v55  ;;  %v8389_v35 = vmax.f32 %v8007_v51, 0.0  ;;  %v13148_v2 = vadd.f32 %v9739_v32, %v7634_v37  ;;  %v7636_v7 = vpop.f32.mrb[173].mxu0 }
 0x592   :  { %8514 = vst [vmem:[%s13602_s3 + $0x140] sm:$0xff] %v8386_v12  ;;  %v8387_v39 = vmax.f32 %v7999_v43, 0.0  ;;  %v7637_v58 = vpop.f32.mrb[174].mxu0 }
 0x593   :  { %8517 = vst [vmem:[%s13602_s3 + $0x158] sm:$0xff] %v8389_v35  ;;  %v13156_v56 = vadd.f32 %v9741_v20, %v7637_v58  ;;  %v7639_v50 = vpop.f32.mrb[175].mxu0  ;;  %v13804_v20 = vld [vmem:[#allocation30_spill] sm:$0xff] }
 0x594   :  { %8515 = vst [vmem:[%s13602_s3 + $0x148] sm:$0xff] %v8387_v39  ;;  %v9453_v15 = vpop.f32.mrb[44].mxu1  ;;  %v13805_v39 = vld [vmem:[#allocation7_spill] sm:$0xff] }
 0x595   :  { %v8020_v31 = vadd.f32 %v13797_v54, %v9453_v15  ;;  %v8011_v23 = vpop.f32.mrb[45].mxu1  ;;  %v9747_v58 = vadd.f32 %v13805_v39, %v2490_v3  ;;  %v13814_v39 = vld [vmem:[#allocation9_spill] sm:$0xff] }
 0x596   :  { %v8012_v30 = vadd.f32 %v13798_v4, %v8011_v23  ;;  %v9454_v42 = vpop.f32.mrb[46].mxu1  ;;  %v13807_v23 = vld [vmem:[#allocation31_spill] sm:$0xff] }
 0x597   :  { %v8392_v36 = vmax.f32 %v8020_v31, 0.0  ;;  %v8023_v47 = vadd.f32 %v13800_v27, %v9454_v42  ;;  %v8014_v19 = vpop.f32.mrb[47].mxu1 }
 0x598   :  { %v8390_v59 = vmax.f32 %v8012_v30, 0.0  ;;  %v8015_v9 = vadd.f32 %v13801_v62, %v8014_v19  ;;  %v7642_v6 = vpop.f32.mrb[176].mxu0  ;;  %v13808_v30 = vld [vmem:[#allocation44_spill] sm:$0xff]  ;;  %v2500_v62 = vpop.permute.xlu1 %2499 }
 0x599   :  { %8520 = vst [vmem:[%s13602_s3 + $0x170] sm:$0xff] %v8392_v36  ;;  %v8393_v48 = vmax.f32 %v8023_v47, 0.0  ;;  %v13170_v53 = vadd.f32 %v9743_v14, %v7642_v6  ;;  %v7644_v57 = vpop.f32.mrb[177].mxu0  ;;  %v9749_v42 = vadd.f32 %v13808_v30, %v2495_v13  ;;  %v13809_v6 = vld [vmem:[#allocation36_spill] sm:$0xff] }
 0x59a   :  { %8518 = vst [vmem:[%s13602_s3 + $0x160] sm:$0xff] %v8390_v59  ;;  %v8391_v32 = vmax.f32 %v8015_v9, 0.0  ;;  %v7645_v55 = vpop.f32.mrb[178].mxu0  ;;  %v13810_v57 = vld [vmem:[#allocation34_spill] sm:$0xff] }
 0x59b   :  { %8521 = vst [vmem:[%s13602_s3 + $0x178] sm:$0xff] %v8393_v48  ;;  %v13178_v0 = vadd.f32 %v9745_v49, %v7645_v55  ;;  %v7647_v51 = vpop.f32.mrb[179].mxu0  ;;  %v2505_v48 = vpop.permute.xlu0 %2504 }
 0x59c   :  { %8519 = vst [vmem:[%s13602_s3 + $0x168] sm:$0xff] %v8391_v32  ;;  %v9457_v12 = vpop.f32.mrb[48].mxu1  ;;  %v13811_v51 = vld [vmem:[#allocation46_spill] sm:$0xff] }
 0x59d   :  { %v8036_v43 = vadd.f32 %v13803_v18, %v9457_v12  ;;  %v8027_v37 = vpop.f32.mrb[49].mxu1  ;;  %v9751_v3 = vadd.f32 %v13811_v51, %v2500_v62  ;;  %v13812_v18 = vld [vmem:[#allocation37_spill] sm:$0xff] }
 0x59e   :  { %v8028_v35 = vadd.f32 %v13804_v20, %v8027_v37  ;;  %v9458_v7 = vpop.f32.mrb[50].mxu1  ;;  %v13813_v20 = vld [vmem:[#allocation35_spill] sm:$0xff] }
 0x59f   :  { %v8396_v50 = vmax.f32 %v8036_v43, 0.0  ;;  %v8039_v15 = vadd.f32 %v13806_v60, %v9458_v7  ;;  %v8030_v54 = vpop.f32.mrb[51].mxu1 }
 0x5a0   :  { %v8394_v31 = vmax.f32 %v8028_v35, 0.0  ;;  %v8031_v46 = vadd.f32 %v13807_v23, %v8030_v54  ;;  %v7650_v4 = vpop.f32.mrb[180].mxu0 }
 0x5a1   :  { %8524 = vst [vmem:[%s13602_s3 + $0x190] sm:$0xff] %v8396_v50  ;;  %v8397_v34 = vmax.f32 %v8039_v15, 0.0  ;;  %v13192_v14 = vadd.f32 %v9747_v58, %v7650_v4  ;;  %v7652_v36 = vpop.f32.mrb[181].mxu0  ;;  %v9753_v58 = vadd.f32 %v13814_v39, %v2505_v48  ;;  %v2510_v4 = vpop.permute.xlu1 %2509 }
 0x5a2   :  { %8522 = vst [vmem:[%s13602_s3 + $0x180] sm:$0xff] %v8394_v31  ;;  %v8395_v27 = vmax.f32 %v8031_v46, 0.0  ;;  %v7653_v47 = vpop.f32.mrb[182].mxu0 }
 0x5a3   :  { %8525 = vst [vmem:[%s13602_s3 + $0x198] sm:$0xff] %v8397_v34  ;;  %v13200_v19 = vadd.f32 %v9749_v42, %v7653_v47  ;;  %v7655_v59 = vpop.f32.mrb[183].mxu0  ;;  %v13815_v42 = vld [vmem:[#allocation40_spill] sm:$0xff]  ;;  %v13816_v47 = vld [vmem:[#allocation38_spill] sm:$0xff] }
 0x5a4   :  { %8523 = vst [vmem:[%s13602_s3 + $0x188] sm:$0xff] %v8395_v27  ;;  %v9461_v9 = vpop.f32.mrb[52].mxu1  ;;  %v2515_v27 = vpop.permute.xlu0 %2514 }
 0x5a5   :  { %v8052_v11 = vadd.f32 %v13809_v6, %v9461_v9  ;;  %v8043_v49 = vpop.f32.mrb[53].mxu1  ;;  %v13817_v9 = vld [vmem:[#allocation10_spill] sm:$0xff] }
 0x5a6   :  { %v8044_v32 = vadd.f32 %v13810_v57, %v8043_v49  ;;  %v9462_v55 = vpop.f32.mrb[54].mxu1  ;;  %v9755_v6 = vadd.f32 %v13817_v9, %v2510_v4  ;;  %v13818_v49 = vld [vmem:[#allocation41_spill] sm:$0xff] }
 0x5a7   :  { %v8400_v12 = vmax.f32 %v8052_v11, 0.0  ;;  %v8055_v43 = vadd.f32 %v13812_v18, %v9462_v55  ;;  %v8046_v37 = vpop.f32.mrb[55].mxu1  ;;  %v13819_v55 = vld [vmem:[#allocation39_spill] sm:$0xff]  ;;  %v13824_v9 = vld [vmem:[#allocation45_spill] sm:$0xff] }
 0x5a8   :  { %v8398_v13 = vmax.f32 %v8044_v32, 0.0  ;;  %v8047_v35 = vadd.f32 %v13813_v20, %v8046_v37  ;;  %v7658_v7 = vpop.f32.mrb[184].mxu0 }
 0x5a9   :  { %8528 = vst [vmem:[%s13602_s3 + $0x1b0] sm:$0xff] %v8400_v12  ;;  %v8401_v50 = vmax.f32 %v8055_v43, 0.0  ;;  %v13214_v60 = vadd.f32 %v9751_v3, %v7658_v7  ;;  %v7660_v15 = vpop.f32.mrb[185].mxu0  ;;  %v13820_v12 = vld [vmem:[#allocation11_spill] sm:$0xff] }
 0x5aa   :  { %8526 = vst [vmem:[%s13602_s3 + $0x1a0] sm:$0xff] %v8398_v13  ;;  %v8399_v54 = vmax.f32 %v8047_v35, 0.0  ;;  %v7661_v31 = vpop.f32.mrb[186].mxu0  ;;  %v9757_v18 = vadd.f32 %v13820_v12, %v2515_v27  ;;  %v13823_v27 = vld [vmem:[#allocation47_spill] sm:$0xff] }
 0x5ab   :  { %8529 = vst [vmem:[%s13602_s3 + $0x1b8] sm:$0xff] %v8401_v50  ;;  %v13222_v23 = vadd.f32 %v9753_v58, %v7661_v31  ;;  %v7663_v46 = vpop.f32.mrb[187].mxu0  ;;  %v2520_v58 = vpop.permute.xlu1 %2519 }
 0x5ac   :  { %8527 = vst [vmem:[%s13602_s3 + $0x1a8] sm:$0xff] %v8399_v54  ;;  %v9465_v30 = vpop.f32.mrb[56].mxu1  ;;  %v2525_v31 = vpop.permute.xlu0 %2524  ;;  %v13821_v46 = vld [vmem:[#allocation43_spill] sm:$0xff] }
 0x5ad   :  { %v8068_v34 = vadd.f32 %v13815_v42, %v9465_v30  ;;  %v8059_v36 = vpop.f32.mrb[57].mxu1  ;;  %v13822_v42 = vld [vmem:[#allocation14_spill] sm:$0xff] }
 0x5ae   :  { %v8060_v59 = vadd.f32 %v13816_v47, %v8059_v36  ;;  %v9466_v62 = vpop.f32.mrb[58].mxu1 }
 0x5af   :  { %v8404_v11 = vmax.f32 %v8068_v34, 0.0  ;;  %v8071_v48 = vadd.f32 %v13818_v49, %v9466_v62  ;;  %v8062_v57 = vpop.f32.mrb[59].mxu1  ;;  %v9759_v34 = vadd.f32 %v13822_v42, %v2520_v58  ;;  %v13825_v49 = vld [vmem:[#allocation15_spill] sm:$0xff] }
 0x5b0   :  { %v8402_v32 = vmax.f32 %v8060_v59, 0.0  ;;  %v8063_v51 = vadd.f32 %v13819_v55, %v8062_v57  ;;  %v7666_v3 = vpop.f32.mrb[188].mxu0 }
 0x5b1   :  { %8532 = vst [vmem:[%s13602_s3 + $0x1d0] sm:$0xff] %v8404_v11  ;;  %v8405_v43 = vmax.f32 %v8071_v48, 0.0  ;;  %v13236_v37 = vadd.f32 %v9755_v6, %v7666_v3  ;;  %v7668_v13 = vpop.f32.mrb[189].mxu0  ;;  %v9761_v48 = vadd.f32 %v13825_v49, %v2525_v31 }
 0x5b2   :  { %8530 = vst [vmem:[%s13602_s3 + $0x1c0] sm:$0xff] %v8402_v32  ;;  %v8403_v20 = vmax.f32 %v8063_v51, 0.0  ;;  %v7669_v35 = vpop.f32.mrb[190].mxu0 }
 0x5b3   :  { %8533 = vst [vmem:[%s13602_s3 + $0x1d8] sm:$0xff] %v8405_v43  ;;  %v13244_v7 = vadd.f32 %v9757_v18, %v7669_v35  ;;  %v7671_v39 = vpop.f32.mrb[191].mxu0  ;;  %v2530_v18 = vpop.permute.xlu1 %2529 }
 0x5b4   :  { %8531 = vst [vmem:[%s13602_s3 + $0x1c8] sm:$0xff] %v8403_v20  ;;  %v9469_v50 = vpop.f32.mrb[60].mxu1  ;;  %v2535_v35 = vpop.permute.xlu0 %2534 }
 0x5b5   :  { %v8084_v15 = vadd.f32 %v12904_v28, %v9469_v50  ;;  %v8075_v54 = vpop.f32.mrb[61].mxu1  ;;  %v13826_v50 = vld [vmem:[#allocation59_spill] sm:$0xff] }
 0x5b6   :  { %v8076_v4 = vadd.f32 %v13821_v46, %v8075_v54  ;;  %v9470_v30 = vpop.f32.mrb[62].mxu1 }
 0x5b7   :  { %v8408_v36 = vmax.f32 %v8084_v15, 0.0  ;;  %v8087_v47 = vadd.f32 %v13823_v27, %v9470_v30  ;;  %v8078_v59 = vpop.f32.mrb[63].mxu1  ;;  %v9763_v15 = vadd.f32 %v13826_v50, %v2530_v18  ;;  %v13827_v30 = vld [vmem:[#allocation88_spill] sm:$0xff] }
 0x5b8   :  { %v8406_v62 = vmax.f32 %v8076_v4, 0.0  ;;  %v8079_v6 = vadd.f32 %v13824_v9, %v8078_v59  ;;  %v7674_v11 = vpop.f32.mrb[192].mxu0 }
 0x5b9   :  { %8536 = vst [vmem:[%s13602_s3 + $0x1f0] sm:$0xff] %v8408_v36  ;;  %v8409_v28 = vmax.f32 %v8087_v47, 0.0  ;;  %v13258_v57 = vadd.f32 %v9759_v34, %v7674_v11  ;;  %v7676_v32 = vpop.f32.mrb[193].mxu0  ;;  %v13828_v36 = vld [vmem:[#allocation60_spill] sm:$0xff] }
 0x5ba   :  { %8534 = vst [vmem:[%s13602_s3 + $0x1e0] sm:$0xff] %v8406_v62  ;;  %v8407_v55 = vmax.f32 %v8079_v6, 0.0  ;;  %v7677_v51 = vpop.f32.mrb[194].mxu0  ;;  %v9765_v27 = vadd.f32 %v13828_v36, %v2535_v35  ;;  %v2540_v6 = vpop.permute.xlu1 %2539 }
 0x5bb   :  { %8537 = vst [vmem:[%s13602_s3 + $0x1f8] sm:$0xff] %v8409_v28  ;;  %v13266_v3 = vadd.f32 %v9761_v48, %v7677_v51  ;;  %v7679_v12 = vpop.f32.mrb[195].mxu0  ;;  %v2545_v28 = vpop.permute.xlu0 %2544  ;;  %v13829_v51 = vld [vmem:[#allocation61_spill] sm:$0xff] }
 0x5bc   :  { %8535 = vst [vmem:[%s13602_s3 + $0x1e8] sm:$0xff] %v8407_v55  ;;  %v9473_v43 = vpop.f32.mrb[64].mxu1  ;;  %v9767_v12 = vadd.f32 %v13829_v51, %v2540_v6 }
 0x5bd   :  { %v8100_v13 = vadd.f32 %v12928_v63, %v9473_v43  ;;  %v8091_v20 = vpop.f32.mrb[65].mxu1 }
 0x5be   :  { %v8092_v39 = vadd.f32 %v12915_v24, %v8091_v20  ;;  %v9474_v58 = vpop.f32.mrb[66].mxu1 }
 0x5bf   :  { %v8412_v54 = vmax.f32 %v8100_v13, 0.0  ;;  %v8103_v31 = vadd.f32 %v12936_v1, %v9474_v58  ;;  %v8094_v46 = vpop.f32.mrb[67].mxu1  ;;  %v13830_v58 = vld [vmem:[#allocation62_spill] sm:$0xff] }
 0x5c0   :  { %v8410_v4 = vmax.f32 %v8092_v39, 0.0  ;;  %v8095_v42 = vadd.f32 %v13827_v30, %v8094_v46  ;;  %v7682_v34 = vpop.f32.mrb[196].mxu0  ;;  %v9769_v50 = vadd.f32 %v13830_v58, %v2545_v28  ;;  %v2550_v46 = vpop.permute.xlu1 %2549  ;;  %v13833_v58 = vld [vmem:[#allocation65_spill] sm:$0xff] }
 0x5c1   :  { %8540 = vst [vmem:[%s13602_s3 + $0x210] sm:$0xff] %v8412_v54  ;;  %v8413_v63 = vmax.f32 %v8103_v31, 0.0  ;;  %v13280_v47 = vadd.f32 %v9763_v15, %v7682_v34  ;;  %v7684_v24 = vpop.f32.mrb[197].mxu0  ;;  %v2555_v34 = vpop.permute.xlu0 %2554 }
 0x5c2   :  { %8538 = vst [vmem:[%s13602_s3 + $0x200] sm:$0xff] %v8410_v4  ;;  %v8411_v1 = vmax.f32 %v8095_v42, 0.0  ;;  %v7685_v59 = vpop.f32.mrb[198].mxu0 }
 0x5c3   :  { %8541 = vst [vmem:[%s13602_s3 + $0x218] sm:$0xff] %v8413_v63  ;;  %v13288_v62 = vadd.f32 %v9765_v27, %v7685_v59  ;;  %v7687_v9 = vpop.f32.mrb[199].mxu0  ;;  %v13831_v63 = vld [vmem:[#allocation63_spill] sm:$0xff] }
 0x5c4   :  { %8539 = vst [vmem:[%s13602_s3 + $0x208] sm:$0xff] %v8411_v1  ;;  %v9477_v11 = vpop.f32.mrb[68].mxu1  ;;  %v9771_v24 = vadd.f32 %v13831_v63, %v2550_v46 }
 0x5c5   :  { %v8116_v49 = vadd.f32 %v12972_v22, %v9477_v11  ;;  %v8107_v48 = vpop.f32.mrb[69].mxu1 }
 0x5c6   :  { %v8108_v32 = vadd.f32 %v12950_v17, %v8107_v48  ;;  %v9478_v55 = vpop.f32.mrb[70].mxu1  ;;  %v13832_v48 = vld [vmem:[#allocation64_spill] sm:$0xff] }
 0x5c7   :  { %v8416_v18 = vmax.f32 %v8116_v49, 0.0  ;;  %v8119_v43 = vadd.f32 %v12980_v61, %v9478_v55  ;;  %v8110_v13 = vpop.f32.mrb[71].mxu1  ;;  %v9773_v28 = vadd.f32 %v13832_v48, %v2555_v34 }
 0x5c8   :  { %v8414_v20 = vmax.f32 %v8108_v32, 0.0  ;;  %v8111_v35 = vadd.f32 %v12958_v41, %v8110_v13  ;;  %v7690_v39 = vpop.f32.mrb[200].mxu0 }
 0x5c9   :  { %8544 = vst [vmem:[%s13602_s3 + $0x230] sm:$0xff] %v8416_v18  ;;  %v8417_v22 = vmax.f32 %v8119_v43, 0.0  ;;  %v13302_v15 = vadd.f32 %v9767_v12, %v7690_v39  ;;  %v7692_v17 = vpop.f32.mrb[201].mxu0  ;;  %v2560_v12 = vpop.permute.xlu1 %2559 }
 0x5ca   :  { %8542 = vst [vmem:[%s13602_s3 + $0x220] sm:$0xff] %v8414_v20  ;;  %v8415_v61 = vmax.f32 %v8111_v35, 0.0  ;;  %v7693_v54 = vpop.f32.mrb[202].mxu0  ;;  %v2565_v20 = vpop.permute.xlu0 %2564 }
 0x5cb   :  { %8545 = vst [vmem:[%s13602_s3 + $0x238] sm:$0xff] %v8417_v22  ;;  %v13310_v41 = vadd.f32 %v9769_v50, %v7693_v54  ;;  %v7695_v31 = vpop.f32.mrb[203].mxu0  ;;  %v9775_v50 = vadd.f32 %v13833_v58, %v2560_v12 }
 0x5cc   :  { %8543 = vst [vmem:[%s13602_s3 + $0x228] sm:$0xff] %v8415_v61  ;;  %v9481_v4 = vpop.f32.mrb[72].mxu1 }
 0x5cd   :  { %v8132_v30 = vadd.f32 %v13016_v10, %v9481_v4  ;;  %v8123_v42 = vpop.f32.mrb[73].mxu1  ;;  %v13834_v4 = vld [vmem:[#allocation66_spill] sm:$0xff] }
 0x5ce   :  { %v8124_v36 = vadd.f32 %v12994_v52, %v8123_v42  ;;  %v9482_v27 = vpop.f32.mrb[74].mxu1 }
 0x5cf   :  { %v8420_v1 = vmax.f32 %v8132_v30, 0.0  ;;  %v8135_v59 = vadd.f32 %v13024_v44, %v9482_v27  ;;  %v8126_v9 = vpop.f32.mrb[75].mxu1  ;;  %v9777_v30 = vadd.f32 %v13834_v4, %v2565_v20  ;;  %v2570_v27 = vpop.permute.xlu1 %2569 }
 0x5d0   :  { %v8418_v6 = vmax.f32 %v8124_v36, 0.0  ;;  %v8127_v11 = vadd.f32 %v13002_v40, %v8126_v9  ;;  %v7698_v49 = vpop.f32.mrb[204].mxu0 }
 0x5d1   :  { %8548 = vst [vmem:[%s13602_s3 + $0x250] sm:$0xff] %v8420_v1  ;;  %v8421_v10 = vmax.f32 %v8135_v59, 0.0  ;;  %v13324_v32 = vadd.f32 %v9771_v24, %v7698_v49  ;;  %v7700_v52 = vpop.f32.mrb[205].mxu0  ;;  %v2575_v59 = vpop.permute.xlu0 %2574 }
 0x5d2   :  { %8546 = vst [vmem:[%s13602_s3 + $0x240] sm:$0xff] %v8418_v6  ;;  %v8419_v44 = vmax.f32 %v8127_v11, 0.0  ;;  %v7701_v55 = vpop.f32.mrb[206].mxu0  ;;  %v13835_v11 = vld [vmem:[#allocation67_spill] sm:$0xff] }
 0x5d3   :  { %8549 = vst [vmem:[%s13602_s3 + $0x258] sm:$0xff] %v8421_v10  ;;  %v13332_v40 = vadd.f32 %v9773_v28, %v7701_v55  ;;  %v7703_v51 = vpop.f32.mrb[207].mxu0  ;;  %v9779_v49 = vadd.f32 %v13835_v11, %v2570_v27  ;;  %v2580_v20 = vpop.permute.xlu1 %2579 }
 0x5d4   :  { %8547 = vst [vmem:[%s13602_s3 + $0x248] sm:$0xff] %v8419_v44  ;;  %v9485_v18 = vpop.f32.mrb[76].mxu1  ;;  %v13836_v51 = vld [vmem:[#allocation68_spill] sm:$0xff] }
 0x5d5   :  { %v8148_v43 = vadd.f32 %v13060_v21, %v9485_v18  ;;  %v8139_v13 = vpop.f32.mrb[77].mxu1  ;;  %v9781_v12 = vadd.f32 %v13836_v51, %v2575_v59 }
 0x5d6   :  { %v8140_v35 = vadd.f32 %v13038_v45, %v8139_v13  ;;  %v9486_v39 = vpop.f32.mrb[78].mxu1 }
 0x5d7   :  { %v8424_v22 = vmax.f32 %v8148_v43, 0.0  ;;  %v8151_v17 = vadd.f32 %v13068_v25, %v9486_v39  ;;  %v8142_v61 = vpop.f32.mrb[79].mxu1 }
 0x5d8   :  { %v8422_v54 = vmax.f32 %v8140_v35, 0.0  ;;  %v8143_v31 = vadd.f32 %v13046_v26, %v8142_v61  ;;  %v7706_v46 = vpop.f32.mrb[208].mxu0  ;;  %v13837_v61 = vld [vmem:[#allocation69_spill] sm:$0xff] }
 0x5d9   :  { %8552 = vst [vmem:[%s13602_s3 + $0x270] sm:$0xff] %v8424_v22  ;;  %v8425_v21 = vmax.f32 %v8151_v17, 0.0  ;;  %v13346_v42 = vadd.f32 %v9775_v50, %v7706_v46  ;;  %v7708_v45 = vpop.f32.mrb[209].mxu0  ;;  %v2585_v50 = vpop.permute.xlu0 %2584 }
 0x5da   :  { %8550 = vst [vmem:[%s13602_s3 + $0x260] sm:$0xff] %v8422_v54  ;;  %v8423_v25 = vmax.f32 %v8143_v31, 0.0  ;;  %v7709_v34 = vpop.f32.mrb[210].mxu0  ;;  %v9783_v54 = vadd.f32 %v13837_v61, %v2580_v20  ;;  %v13841_v61 = vld [vmem:[#allocation73_spill] sm:$0xff] }
 0x5db   :  { %8553 = vst [vmem:[%s13602_s3 + $0x278] sm:$0xff] %v8425_v21  ;;  %v13354_v26 = vadd.f32 %v9777_v30, %v7709_v34  ;;  %v7711_v36 = vpop.f32.mrb[211].mxu0 }
 0x5dc   :  { %8551 = vst [vmem:[%s13602_s3 + $0x268] sm:$0xff] %v8423_v25  ;;  %v9489_v63 = vpop.f32.mrb[80].mxu1  ;;  %v13838_v25 = vld [vmem:[#allocation70_spill] sm:$0xff] }
 0x5dd   :  { %v8164_v24 = vadd.f32 %v13104_v5, %v9489_v63  ;;  %v8155_v1 = vpop.f32.mrb[81].mxu1  ;;  %v9785_v34 = vadd.f32 %v13838_v25, %v2585_v50  ;;  %v13842_v25 = vld [vmem:[#allocation74_spill] sm:$0xff] }
 0x5de   :  { %v8156_v9 = vadd.f32 %v13082_v33, %v8155_v1  ;;  %v9490_v6 = vpop.f32.mrb[82].mxu1 }
 0x5df   :  { %v8428_v48 = vmax.f32 %v8164_v24, 0.0  ;;  %v8167_v28 = vadd.f32 %v13112_v8, %v9490_v6  ;;  %v8158_v10 = vpop.f32.mrb[83].mxu1  ;;  %v2590_v24 = vpop.permute.xlu1 %2589 }
 0x5e0   :  { %v8426_v52 = vmax.f32 %v8156_v9, 0.0  ;;  %v8159_v44 = vadd.f32 %v13090_v16, %v8158_v10  ;;  %v7714_v55 = vpop.f32.mrb[212].mxu0  ;;  %v2595_v6 = vpop.permute.xlu0 %2594 }
 0x5e1   :  { %8556 = vst [vmem:[%s13602_s3 + $0x290] sm:$0xff] %v8428_v48  ;;  %v8429_v5 = vmax.f32 %v8167_v28, 0.0  ;;  %v13368_v18 = vadd.f32 %v9779_v49, %v7714_v55  ;;  %v7716_v33 = vpop.f32.mrb[213].mxu0  ;;  %v13839_v48 = vld [vmem:[#allocation71_spill] sm:$0xff] }
 0x5e2   :  { %8554 = vst [vmem:[%s13602_s3 + $0x280] sm:$0xff] %v8426_v52  ;;  %v8427_v8 = vmax.f32 %v8159_v44, 0.0  ;;  %v7717_v43 = vpop.f32.mrb[214].mxu0  ;;  %v9787_v28 = vadd.f32 %v13839_v48, %v2590_v24 }
 0x5e3   :  { %8557 = vst [vmem:[%s13602_s3 + $0x298] sm:$0xff] %v8429_v5  ;;  %v13376_v16 = vadd.f32 %v9781_v12, %v7717_v43  ;;  %v7719_v13 = vpop.f32.mrb[215].mxu0  ;;  %v13840_v5 = vld [vmem:[#allocation72_spill] sm:$0xff]  ;;  %v2600_v20 = vpop.permute.xlu1 %2599 }
 0x5e4   :  { %8555 = vst [vmem:[%s13602_s3 + $0x288] sm:$0xff] %v8427_v8  ;;  %v9493_v35 = vpop.f32.mrb[84].mxu1  ;;  %v9789_v33 = vadd.f32 %v13840_v5, %v2595_v6  ;;  %v2605_v50 = vpop.permute.xlu0 %2604 }
 0x5e5   :  { %v8180_v39 = vadd.f32 %v13148_v2, %v9493_v35  ;;  %v8171_v58 = vpop.f32.mrb[85].mxu1 }
 0x5e6   :  { %v8172_v22 = vadd.f32 %v13126_v29, %v8171_v58  ;;  %v9494_v17 = vpop.f32.mrb[86].mxu1 }
 0x5e7   :  { %v8432_v31 = vmax.f32 %v8180_v39, 0.0  ;;  %v8183_v46 = vadd.f32 %v13156_v56, %v9494_v17  ;;  %v8174_v4 = vpop.f32.mrb[87].mxu1 }
 0x5e8   :  { %v8430_v30 = vmax.f32 %v8172_v22, 0.0  ;;  %v8175_v21 = vadd.f32 %v13134_v38, %v8174_v4  ;;  %v7722_v45 = vpop.f32.mrb[216].mxu0 }
 0x5e9   :  { %8560 = vst [vmem:[%s13602_s3 + $0x2b0] sm:$0xff] %v8432_v31  ;;  %v8433_v2 = vmax.f32 %v8183_v46, 0.0  ;;  %v13390_v36 = vadd.f32 %v9783_v54, %v7722_v45  ;;  %v7724_v29 = vpop.f32.mrb[217].mxu0  ;;  %v9791_v54 = vadd.f32 %v13841_v61, %v2600_v20 }
 0x5ea   :  { %8558 = vst [vmem:[%s13602_s3 + $0x2a0] sm:$0xff] %v8430_v30  ;;  %v8431_v56 = vmax.f32 %v8175_v21, 0.0  ;;  %v7725_v27 = vpop.f32.mrb[218].mxu0 }
 0x5eb   :  { %8561 = vst [vmem:[%s13602_s3 + $0x2b8] sm:$0xff] %v8433_v2  ;;  %v13398_v38 = vadd.f32 %v9785_v34, %v7725_v27  ;;  %v7727_v63 = vpop.f32.mrb[219].mxu0  ;;  %v9793_v34 = vadd.f32 %v13842_v25, %v2605_v50  ;;  %v2610_v27 = vpop.permute.xlu1 %2609 }
 0x5ec   :  { %8559 = vst [vmem:[%s13602_s3 + $0x2a8] sm:$0xff] %v8431_v56  ;;  %v9497_v1 = vpop.f32.mrb[88].mxu1 }
 0x5ed   :  { %v8196_v59 = vadd.f32 %v13192_v14, %v9497_v1  ;;  %v8187_v9 = vpop.f32.mrb[89].mxu1 }
 0x5ee   :  { %v8188_v11 = vadd.f32 %v13170_v53, %v8187_v9  ;;  %v9498_v49 = vpop.f32.mrb[90].mxu1 }
 0x5ef   :  { %v8436_v10 = vmax.f32 %v8196_v59, 0.0  ;;  %v8199_v52 = vadd.f32 %v13200_v19, %v9498_v49  ;;  %v8190_v44 = vpop.f32.mrb[91].mxu1  ;;  %v2615_v59 = vpop.permute.xlu0 %2614 }
 0x5f0   :  { %v8434_v55 = vmax.f32 %v8188_v11, 0.0  ;;  %v8191_v51 = vadd.f32 %v13178_v0, %v8190_v44  ;;  %v7730_v12 = vpop.f32.mrb[220].mxu0  ;;  %v13843_v11 = vld [vmem:[#allocation75_spill] sm:$0xff] }
 0x5f1   :  { %8564 = vst [vmem:[%s13602_s3 + $0x2d0] sm:$0xff] %v8436_v10  ;;  %v8437_v14 = vmax.f32 %v8199_v52, 0.0  ;;  %v13412_v8 = vadd.f32 %v9787_v28, %v7730_v12  ;;  %v7732_v53 = vpop.f32.mrb[221].mxu0  ;;  %v9795_v49 = vadd.f32 %v13843_v11, %v2610_v27 }
 0x5f2   :  { %8562 = vst [vmem:[%s13602_s3 + $0x2c0] sm:$0xff] %v8434_v55  ;;  %v8435_v19 = vmax.f32 %v8191_v51, 0.0  ;;  %v7733_v43 = vpop.f32.mrb[222].mxu0  ;;  %v13844_v51 = vld [vmem:[#allocation76_spill] sm:$0xff]  ;;  %v2620_v53 = vpop.permute.xlu1 %2619 }
 0x5f3   :  { %8565 = vst [vmem:[%s13602_s3 + $0x2d8] sm:$0xff] %v8437_v14  ;;  %v13420_v0 = vadd.f32 %v9789_v33, %v7733_v43  ;;  %v7735_v13 = vpop.f32.mrb[223].mxu0  ;;  %v9797_v12 = vadd.f32 %v13844_v51, %v2615_v59  ;;  %v2625_v20 = vpop.permute.xlu0 %2624 }
 0x5f4   :  { %8563 = vst [vmem:[%s13602_s3 + $0x2c8] sm:$0xff] %v8435_v19  ;;  %v9501_v35 = vpop.f32.mrb[92].mxu1 }
 0x5f5   :  { %v8212_v39 = vadd.f32 %v13236_v37, %v9501_v35  ;;  %v8203_v58 = vpop.f32.mrb[93].mxu1 }
 0x5f6   :  { %v8204_v22 = vadd.f32 %v13214_v60, %v8203_v58  ;;  %v9502_v17 = vpop.f32.mrb[94].mxu1  ;;  %v13845_v58 = vld [vmem:[#allocation77_spill] sm:$0xff] }
 0x5f7   :  { %v8440_v31 = vmax.f32 %v8212_v39, 0.0  ;;  %v8215_v46 = vadd.f32 %v13244_v7, %v9502_v17  ;;  %v8206_v4 = vpop.f32.mrb[95].mxu1  ;;  %v9799_v50 = vadd.f32 %v13845_v58, %v2620_v53  ;;  %v13850_v58 = vld [vmem:[#allocation82_spill] sm:$0xff] }
 0x5f8   :  { %v8438_v30 = vmax.f32 %v8204_v22, 0.0  ;;  %v8207_v21 = vadd.f32 %v13222_v23, %v8206_v4  ;;  %v7738_v45 = vpop.f32.mrb[224].mxu0  ;;  %v13846_v4 = vld [vmem:[#allocation78_spill] sm:$0xff] }
 0x5f9   :  { %8568 = vst [vmem:[%s13602_s3 + $0x2f0] sm:$0xff] %v8440_v31  ;;  %v8441_v37 = vmax.f32 %v8215_v46, 0.0  ;;  %v13434_v2 = vadd.f32 %v9791_v54, %v7738_v45  ;;  %v7740_v60 = vpop.f32.mrb[225].mxu0 }
 0x5fa   :  { %8566 = vst [vmem:[%s13602_s3 + $0x2e0] sm:$0xff] %v8438_v30  ;;  %v8439_v7 = vmax.f32 %v8207_v21, 0.0  ;;  %v7741_v29 = vpop.f32.mrb[226].mxu0  ;;  %v9801_v30 = vadd.f32 %v13846_v4, %v2625_v20 }
 0x5fb   :  { %8569 = vst [vmem:[%s13602_s3 + $0x2f8] sm:$0xff] %v8441_v37  ;;  %v13442_v23 = vadd.f32 %v9793_v34, %v7741_v29  ;;  %v7743_v56 = vpop.f32.mrb[227].mxu0  ;;  %v2630_v34 = vpop.permute.xlu1 %2629 }
 0x5fc   :  { %8567 = vst [vmem:[%s13602_s3 + $0x2e8] sm:$0xff] %v8439_v7  ;;  %v9505_v63 = vpop.f32.mrb[96].mxu1  ;;  %v2635_v29 = vpop.permute.xlu0 %2634 }
 0x5fd   :  { %v8228_v24 = vadd.f32 %v13280_v47, %v9505_v63  ;;  %v8219_v1 = vpop.f32.mrb[97].mxu1  ;;  %v13847_v63 = vld [vmem:[#allocation79_spill] sm:$0xff] }
 0x5fe   :  { %v8220_v9 = vadd.f32 %v13258_v57, %v8219_v1  ;;  %v9506_v6 = vpop.f32.mrb[98].mxu1 }
 0x5ff   :  { %v8444_v48 = vmax.f32 %v8228_v24, 0.0  ;;  %v8231_v28 = vadd.f32 %v13288_v62, %v9506_v6  ;;  %v8222_v10 = vpop.f32.mrb[99].mxu1  ;;  %v9803_v24 = vadd.f32 %v13847_v63, %v2630_v34 }
 0x600   :  { %v8442_v52 = vmax.f32 %v8220_v9, 0.0  ;;  %v8223_v44 = vadd.f32 %v13266_v3, %v8222_v10  ;;  %v7746_v55 = vpop.f32.mrb[228].mxu0 }
 0x601   :  { %8572 = vst [vmem:[%s13602_s3 + $0x310] sm:$0xff] %v8444_v48  ;;  %v8445_v47 = vmax.f32 %v8231_v28, 0.0  ;;  %v13456_v5 = vadd.f32 %v9795_v49, %v7746_v55  ;;  %v7748_v57 = vpop.f32.mrb[229].mxu0  ;;  %v13848_v48 = vld [vmem:[#allocation80_spill] sm:$0xff]  ;;  %v2640_v55 = vpop.permute.xlu1 %2639 }
 0x602   :  { %8570 = vst [vmem:[%s13602_s3 + $0x300] sm:$0xff] %v8442_v52  ;;  %v8443_v62 = vmax.f32 %v8223_v44, 0.0  ;;  %v7749_v33 = vpop.f32.mrb[230].mxu0  ;;  %v9805_v28 = vadd.f32 %v13848_v48, %v2635_v29  ;;  %v2645_v57 = vpop.permute.xlu0 %2644 }
 0x603   :  { %8573 = vst [vmem:[%s13602_s3 + $0x318] sm:$0xff] %v8445_v47  ;;  %v13464_v3 = vadd.f32 %v9797_v12, %v7749_v33  ;;  %v7751_v14 = vpop.f32.mrb[231].mxu0 }
 0x604   :  { %8571 = vst [vmem:[%s13602_s3 + $0x308] sm:$0xff] %v8443_v62  ;;  %v9509_v19 = vpop.f32.mrb[100].mxu1  ;;  %v13849_v14 = vld [vmem:[#allocation81_spill] sm:$0xff] }
 0x605   :  { %v8244_v43 = vadd.f32 %v13324_v32, %v9509_v19  ;;  %v8235_v13 = vpop.f32.mrb[101].mxu1  ;;  %v9807_v53 = vadd.f32 %v13849_v14, %v2640_v55 }
 0x606   :  { %v8236_v35 = vadd.f32 %v13302_v15, %v8235_v13  ;;  %v9510_v39 = vpop.f32.mrb[102].mxu1 }
 0x607   :  { %v8448_v22 = vmax.f32 %v8244_v43, 0.0  ;;  %v8247_v17 = vadd.f32 %v13332_v40, %v9510_v39  ;;  %v8238_v61 = vpop.f32.mrb[103].mxu1 }
 0x608   :  { %v8446_v54 = vmax.f32 %v8236_v35, 0.0  ;;  %v8239_v31 = vadd.f32 %v13310_v41, %v8238_v61  ;;  %v7754_v46 = vpop.f32.mrb[232].mxu0 }
 0x609   :  { %8576 = vst [vmem:[%s13602_s3 + $0x330] sm:$0xff] %v8448_v22  ;;  %v8449_v32 = vmax.f32 %v8247_v17, 0.0  ;;  %v13478_v21 = vadd.f32 %v9799_v50, %v7754_v46  ;;  %v7756_v15 = vpop.f32.mrb[233].mxu0  ;;  %v9809_v50 = vadd.f32 %v13850_v58, %v2645_v57  ;;  %v13855_v58 = vld [vmem:[#allocation49_spill] sm:$0xff] }
 0x60a   :  { %8574 = vst [vmem:[%s13602_s3 + $0x320] sm:$0xff] %v8446_v54  ;;  %v8447_v40 = vmax.f32 %v8239_v31, 0.0  ;;  %v7757_v45 = vpop.f32.mrb[234].mxu0  ;;  %v2650_v54 = vpop.permute.xlu1 %2649 }
 0x60b   :  { %8577 = vst [vmem:[%s13602_s3 + $0x338] sm:$0xff] %v8449_v32  ;;  %v13486_v41 = vadd.f32 %v9801_v30, %v7757_v45  ;;  %v7759_v25 = vpop.f32.mrb[235].mxu0  ;;  %v2655_v30 = vpop.permute.xlu0 %2654 }
 0x60c   :  { %8575 = vst [vmem:[%s13602_s3 + $0x328] sm:$0xff] %v8447_v40  ;;  %v9513_v37 = vpop.f32.mrb[104].mxu1  ;;  %v13851_v40 = vld [vmem:[#allocation83_spill] sm:$0xff] }
 0x60d   :  { %v8260_v60 = vadd.f32 %v13368_v18, %v9513_v37  ;;  %v8251_v7 = vpop.f32.mrb[105].mxu1  ;;  %v9811_v45 = vadd.f32 %v13851_v40, %v2650_v54 }
 0x60e   :  { %v8252_v56 = vadd.f32 %v13346_v42, %v8251_v7  ;;  %v9514_v27 = vpop.f32.mrb[106].mxu1 }
 0x60f   :  { %v8452_v1 = vmax.f32 %v8260_v60, 0.0  ;;  %v8263_v59 = vadd.f32 %v13376_v16, %v9514_v27  ;;  %v8254_v9 = vpop.f32.mrb[107].mxu1 }
 0x610   :  { %v8450_v6 = vmax.f32 %v8252_v56, 0.0  ;;  %v8255_v11 = vadd.f32 %v13354_v26, %v8254_v9  ;;  %v7762_v49 = vpop.f32.mrb[236].mxu0  ;;  %v13852_v56 = vld [vmem:[#allocation84_spill] sm:$0xff] }
 0x611   :  { %8580 = vst [vmem:[%s13602_s3 + $0x350] sm:$0xff] %v8452_v1  ;;  %v8453_v18 = vmax.f32 %v8263_v59, 0.0  ;;  %v13500_v10 = vadd.f32 %v9803_v24, %v7762_v49  ;;  %v7764_v42 = vpop.f32.mrb[237].mxu0  ;;  %v9813_v27 = vadd.f32 %v13852_v56, %v2655_v30  ;;  %v2660_v59 = vpop.permute.xlu1 %2659 }
 0x612   :  { %8578 = vst [vmem:[%s13602_s3 + $0x340] sm:$0xff] %v8450_v6  ;;  %v8451_v16 = vmax.f32 %v8255_v11, 0.0  ;;  %v7765_v52 = vpop.f32.mrb[238].mxu0  ;;  %v2665_v49 = vpop.permute.xlu0 %2664 }
 0x613   :  { %8581 = vst [vmem:[%s13602_s3 + $0x358] sm:$0xff] %v8453_v18  ;;  %v13508_v26 = vadd.f32 %v9805_v28, %v7765_v52  ;;  %v7767_v44 = vpop.f32.mrb[239].mxu0  ;;  %v13853_v18 = vld [vmem:[#allocation85_spill] sm:$0xff] }
 0x614   :  { %8579 = vst [vmem:[%s13602_s3 + $0x348] sm:$0xff] %v8451_v16  ;;  %v9517_v51 = vpop.f32.mrb[108].mxu1  ;;  %v9815_v42 = vadd.f32 %v13853_v18, %v2660_v59 }
 0x615   :  { %v8276_v12 = vadd.f32 %v13412_v8, %v9517_v51  ;;  %v8267_v47 = vpop.f32.mrb[109].mxu1 }
 0x616   :  { %v8268_v62 = vadd.f32 %v13390_v36, %v8267_v47  ;;  %v9518_v33 = vpop.f32.mrb[110].mxu1  ;;  %v13854_v47 = vld [vmem:[#allocation86_spill] sm:$0xff] }
 0x617   :  { %v8456_v19 = vmax.f32 %v8276_v12, 0.0  ;;  %v8279_v43 = vadd.f32 %v13420_v0, %v9518_v33  ;;  %v8270_v13 = vpop.f32.mrb[111].mxu1  ;;  %v9817_v57 = vadd.f32 %v13854_v47, %v2665_v49 }
 0x618   :  { %v8454_v20 = vmax.f32 %v8268_v62, 0.0  ;;  %v8271_v35 = vadd.f32 %v13398_v38, %v8270_v13  ;;  %v7770_v39 = vpop.f32.mrb[240].mxu0 }
 0x619   :  { %8584 = vst [vmem:[%s13602_s3 + $0x370] sm:$0xff] %v8456_v19  ;;  %v8457_v8 = vmax.f32 %v8279_v43, 0.0  ;;  %v13522_v22 = vadd.f32 %v9807_v53, %v7770_v39  ;;  %v7772_v36 = vpop.f32.mrb[241].mxu0  ;;  %v2670_v53 = vpop.permute.xlu1 %2669 }
 0x61a   :  { %8582 = vst [vmem:[%s13602_s3 + $0x360] sm:$0xff] %v8454_v20  ;;  %v8455_v0 = vmax.f32 %v8271_v35, 0.0  ;;  %v7773_v17 = vpop.f32.mrb[242].mxu0  ;;  %v2675_v20 = vpop.permute.xlu0 %2674 }
 0x61b   :  { %8585 = vst [vmem:[%s13602_s3 + $0x378] sm:$0xff] %v8457_v8  ;;  %v13530_v38 = vadd.f32 %v9809_v50, %v7773_v17  ;;  %v7775_v61 = vpop.f32.mrb[243].mxu0  ;;  %v9819_v50 = vadd.f32 %v13855_v58, %v2670_v53 }
 0x61c   :  { %8583 = vst [vmem:[%s13602_s3 + $0x368] sm:$0xff] %v8455_v0  ;;  %v9521_v31 = vpop.f32.mrb[112].mxu1 }
 0x61d   :  { %v8292_v46 = vadd.f32 %v13456_v5, %v9521_v31  ;;  %v8283_v4 = vpop.f32.mrb[113].mxu1  ;;  %v13856_v31 = vld [vmem:[#allocation87_spill] sm:$0xff] }
 0x61e   :  { %v8284_v32 = vadd.f32 %v13434_v2, %v8283_v4  ;;  %v9522_v15 = vpop.f32.mrb[114].mxu1 }
 0x61f   :  { %v8460_v25 = vmax.f32 %v8292_v46, 0.0  ;;  %v8295_v34 = vadd.f32 %v13464_v3, %v9522_v15  ;;  %v8286_v37 = vpop.f32.mrb[115].mxu1  ;;  %v9821_v46 = vadd.f32 %v13856_v31, %v2675_v20 }
 0x620   :  { %v8458_v60 = vmax.f32 %v8284_v32, 0.0  ;;  %v8287_v7 = vadd.f32 %v13442_v23, %v8286_v37  ;;  %v7778_v29 = vpop.f32.mrb[244].mxu0 }
 0x621   :  { %8588 = vst [vmem:[%s13602_s3 + $0x390] sm:$0xff] %v8460_v25  ;;  %v8461_v5 = vmax.f32 %v8295_v34, 0.0  ;;  %v9812_v63 = vadd.f32 %v9811_v45, %v7778_v29  ;;  %v7780_v2 = vpop.f32.mrb[245].mxu0 }
 0x622   :  { %8586 = vst [vmem:[%s13602_s3 + $0x380] sm:$0xff] %v8458_v60  ;;  %v8459_v24 = vmax.f32 %v8287_v7, 0.0  ;;  %v7781_v3 = vpop.f32.mrb[246].mxu0 }
 0x623   :  { %8589 = vst [vmem:[%s13602_s3 + $0x398] sm:$0xff] %v8461_v5  ;;  %v9814_v23 = vadd.f32 %v9813_v27, %v7781_v3  ;;  %v7783_v1 = vpop.f32.mrb[247].mxu0 }
 0x624   :  { %8587 = vst [vmem:[%s13602_s3 + $0x388] sm:$0xff] %v8459_v24  ;;  %v9525_v9 = vpop.f32.mrb[116].mxu1 }
 0x625   :  { %v8308_v6 = vadd.f32 %v13500_v10, %v9525_v9  ;;  %v8299_v11 = vpop.f32.mrb[117].mxu1 }
 0x626   :  { %v8300_v48 = vadd.f32 %v13478_v21, %v8299_v11  ;;  %v9526_v28 = vpop.f32.mrb[118].mxu1 }
 0x627   :  { %v8464_v16 = vmax.f32 %v8308_v6, 0.0  ;;  %v8311_v52 = vadd.f32 %v13508_v26, %v9526_v28  ;;  %v8302_v44 = vpop.f32.mrb[119].mxu1 }
 0x628   :  { %v8462_v55 = vmax.f32 %v8300_v48, 0.0  ;;  %v8303_v51 = vadd.f32 %v13486_v41, %v8302_v44  ;;  %v7786_v12 = vpop.f32.mrb[248].mxu0 }
 0x629   :  { %8592 = vst [vmem:[%s13602_s3 + $0x3b0] sm:$0xff] %v8464_v16  ;;  %v8465_v10 = vmax.f32 %v8311_v52, 0.0  ;;  %v9816_v62 = vadd.f32 %v9815_v42, %v7786_v12  ;;  %v7788_v21 = vpop.f32.mrb[249].mxu0 }
 0x62a   :  { %8590 = vst [vmem:[%s13602_s3 + $0x3a0] sm:$0xff] %v8462_v55  ;;  %v8463_v33 = vmax.f32 %v8303_v51, 0.0  ;;  %v7789_v26 = vpop.f32.mrb[250].mxu0 }
 0x62b   :  { %8593 = vst [vmem:[%s13602_s3 + $0x3b8] sm:$0xff] %v8465_v10  ;;  %v9818_v41 = vadd.f32 %v9817_v57, %v7789_v26  ;;  %v7791_v14 = vpop.f32.mrb[251].mxu0 }
 0x62c   :  { %8591 = vst [vmem:[%s13602_s3 + $0x3a8] sm:$0xff] %v8463_v33  ;;  %v9529_v19 = vpop.f32.mrb[120].mxu1 }
 0x62d   :  { %v8324_v43 = vadd.f32 %v9812_v63, %v9529_v19  ;;  %v8315_v13 = vpop.f32.mrb[121].mxu1 }
 0x62e   :  { %v8316_v35 = vadd.f32 %v13522_v22, %v8315_v13  ;;  %v9530_v39 = vpop.f32.mrb[122].mxu1 }
 0x62f   :  { %v8468_v8 = vmax.f32 %v8324_v43, 0.0  ;;  %v8327_v36 = vadd.f32 %v9814_v23, %v9530_v39  ;;  %v8318_v0 = vpop.f32.mrb[123].mxu1 }
 0x630   :  { %v8466_v17 = vmax.f32 %v8316_v35, 0.0  ;;  %v8319_v61 = vadd.f32 %v13530_v38, %v8318_v0  ;;  %v7794_v54 = vpop.f32.mrb[252].mxu0 }
 0x631   :  { %8596 = vst [vmem:[%s13602_s3 + $0x3d0] sm:$0xff] %v8468_v8  ;;  %v8469_v4 = vmax.f32 %v8327_v36, 0.0  ;;  %v9820_v30 = vadd.f32 %v9819_v50, %v7794_v54  ;;  %v7796_v32 = vpop.f32.mrb[253].mxu0 }
 0x632   :  { %8594 = vst [vmem:[%s13602_s3 + $0x3c0] sm:$0xff] %v8466_v17  ;;  %v8467_v22 = vmax.f32 %v8319_v61, 0.0  ;;  %v7797_v15 = vpop.f32.mrb[254].mxu0 }
 0x633   :  { %8597 = vst [vmem:[%s13602_s3 + $0x3d8] sm:$0xff] %v8469_v4  ;;  %v9822_v38 = vadd.f32 %v9821_v46, %v7797_v15  ;;  %v7799_v40 = vpop.f32.mrb[255].mxu0 }
 0x634   :  { %8595 = vst [vmem:[%s13602_s3 + $0x3c8] sm:$0xff] %v8467_v22  ;;  %v9533_v45 = vpop.f32.mrb[124].mxu1 }
 0x635   :  { %v8340_v25 = vadd.f32 %v9820_v30, %v9533_v45  ;;  %v8331_v34 = vpop.f32.mrb[125].mxu1 }
 0x636   :  { %v8332_v37 = vadd.f32 %v9816_v62, %v8331_v34  ;;  %v9534_v60 = vpop.f32.mrb[126].mxu1 }
 0x637   :  { %v8472_v7 = vmax.f32 %v8340_v25, 0.0  ;;  %v8343_v29 = vadd.f32 %v9822_v38, %v9534_v60  ;;  %v8334_v56 = vpop.f32.mrb[127].mxu1 }
 0x638   :  { %v8470_v27 = vmax.f32 %v8332_v37, 0.0  ;;  %v8335_v5 = vadd.f32 %v9818_v41, %v8334_v56 }
 0x639   :  { %8600 = vst [vmem:[%s13602_s3 + $0x3f0] sm:$0xff] %v8472_v7  ;;  %v8473_v63 = vmax.f32 %v8343_v29, 0.0 }
 0x63a   :  { %8598 = vst [vmem:[%s13602_s3 + $0x3e0] sm:$0xff] %v8470_v27  ;;  %v8471_v2 = vmax.f32 %v8335_v5, 0.0 }
 0x63b   :  { %8601 = vst [vmem:[%s13602_s3 + $0x3f8] sm:$0xff] %v8473_v63 }
 0x63c   :  { %8599 = vst [vmem:[%s13602_s3 + $0x3e8] sm:$0xff] %v8471_v2 }
 0x63d   :  { %8606 = vsyncpa [#allocation4], 1 }

</bundles_post_ra>
